<compile_context>
chip_gen: v6e
topology: v6e:2x2x1
jax: 0.10.0
libtpu: 0.0.40
codegen_flags: <defaults>
</compile_context>

<pallas_src>
import numpy as np

import jax
import jax.numpy as jnp
from jax.experimental import pallas as pl
from jax.experimental.pallas import tpu as pltpu

_CPAD = 128    # lane width for activations / conv outputs / gamma-beta segments
_CDPAD = 64    # lane width for the conditioning vector (z | class embedding)
_ROWPAD = 16   # zero rows on each side of the row-shift scratch (>= W + 1)


# ----------------------------------------------------------------------------
# Fused forward kernel (built per geometry).
# ----------------------------------------------------------------------------
def _make_biggan_kernel(B, H, W, ch0, ch1):
    """Fused generator kernel for a fixed geometry.

    Ref layout (whole-array VMEM blocks, grid-less pallas_call):
      cond_ref : [BPAD, 64]   f32   per-sample (z | embed) rows, sublane padded
      w_all    : [64, 640]    bf16  packed cond-linears (lin | g1 | b1 | g2 | b2)
      bias     : [1, 640]     f32   packed biases (gamma segments biased to 1.0)
      posb     : [H*W, 128]   f32   learned 4x4 positional bias, pre-upsampled
      wc1      : [9*ch0, 128] bf16  3x3 conv1 weights, tap-major, REAL channels
      bc1      : [1, 128]     f32
      wc2      : [9*ch1, 128] bf16  3x3 conv2 weights
      bc2      : [1, 128]     f32
      o_ref    : [B*H*W, 128] f32   tanh image, RGB in lanes [0:3]
      xpad_ref : scratch [B*H*W + 2*_ROWPAD, 128] f32 (row-shift buffer)
    """
    NR, HW, CP = B * H * W, H * W, _CPAD
    assert (H & (H - 1)) == 0 and (W & (W - 1)) == 0, "power-of-two spatial dims"
    assert W + 1 <= _ROWPAD
    wshift = int(np.log2(W))

    def kernel(cond_ref, w_all_ref, bias_ref, posb_ref,
               wc1_ref, bc1_ref, wc2_ref, bc2_ref, o_ref, xpad_ref):
        # zero the shift-scratch border rows once; the middle is rewritten per conv
        zpad = jnp.zeros((_ROWPAD, CP), jnp.float32)
        xpad_ref[0:_ROWPAD, :] = zpad
        xpad_ref[_ROWPAD + NR:_ROWPAD + NR + _ROWPAD, :] = zpad

        # ---- conditioning: ONE tiny batch-granular matmul for all cond-linears
        cond_out = jnp.dot(cond_ref[...].astype(jnp.bfloat16), w_all_ref[...],
                           preferred_element_type=jnp.float32) + bias_ref[...]
        lin    = cond_out[:, 0 * CP:1 * CP]        # [BPAD, 128] -- 1 vreg each
        gamma1 = cond_out[:, 1 * CP:2 * CP]
        beta1  = cond_out[:, 2 * CP:3 * CP]
        gamma2 = cond_out[:, 3 * CP:4 * CP]
        beta2  = cond_out[:, 4 * CP:5 * CP]

        def cbn_relu(x, gamma, beta):
            # batch-pooled (training-mode) BN stats, per-sample gamma/beta.
            # TODO(synk): a real pretrained BigGAN uses running (inference) stats.
            mean = jnp.mean(x, axis=0, keepdims=True)
            var = jnp.mean(jnp.square(x - mean), axis=0, keepdims=True)
            xn = (x - mean) * jax.lax.rsqrt(var + 1e-5)
            chunks = [jnp.maximum(gamma[b:b + 1, :] * xn[b * HW:(b + 1) * HW, :]
                                  + beta[b:b + 1, :], 0.0)
                      for b in range(B)]
            return chunks[0] if B == 1 else jnp.concatenate(chunks, axis=0)

        def conv3x3(x, wc_ref, bc_ref, cin):
            # 3x3 "same" conv as 9 accumulated small-K matmuls: tap (dy,dx) is a
            # row shift of the flat [NR, CP] map, realised as an (unaligned)
            # pl.ds read from the zero-padded scratch; spatial/batch borders are
            # masked with iota-derived [NR,1] masks (no shift matrices, no
            # 128-padded K, no im2col scratch).
            xpad_ref[_ROWPAD:_ROWPAD + NR, :] = x
            row = jax.lax.broadcasted_iota(jnp.int32, (NR, 1), 0)
            ww = jnp.bitwise_and(row, W - 1)                 # W, H powers of two
            hh = jnp.bitwise_and(jnp.right_shift(row, wshift), H - 1)
            acc = jnp.zeros((NR, CP), jnp.float32)
            for t in range(9):
                dy, dx = t // 3 - 1, t % 3 - 1
                shifted = xpad_ref[pl.ds(_ROWPAD + dy * W + dx, NR), :]
                tap = shifted[:, :cin]                       # [NR, cin] f32
                terms = []
                if dy != 0:
                    terms.append((hh + dy >= 0) & (hh + dy < H))
                if dx != 0:
                    terms.append((ww + dx >= 0) & (ww + dx < W))
                if terms:
                    m = terms[0]
                    for extra in terms[1:]:
                        m = m & extra
                    tap = tap * m.astype(jnp.float32)        # [NR,1] lane-broadcast
                acc = acc + jnp.dot(tap.astype(jnp.bfloat16),
                                    wc_ref[t * cin:(t + 1) * cin, :],
                                    preferred_element_type=jnp.float32)
            return acc + bc_ref[...]

        # initial 4x4 map nearest-upsampled to HxW (upsample commutes with
        # CBN+ReLU, so it is folded into the pre-upsampled posb rows).
        h_chunks = [lin[b:b + 1, :] + posb_ref[...] for b in range(B)]
        h = h_chunks[0] if B == 1 else jnp.concatenate(h_chunks, axis=0)
        h = cbn_relu(h, gamma1, beta1)
        h = conv3x3(h, wc1_ref, bc1_ref, ch0)
        h = cbn_relu(h, gamma2, beta2)
        h = conv3x3(h, wc2_ref, bc2_ref, ch1)
        o_ref[...] = jnp.tanh(h)

    return kernel


# ----------------------------------------------------------------------------
# Host-side (init-time) packing helpers — pure weight preprocessing.
# ----------------------------------------------------------------------------
def _pack_cond_weights(w_lin, w_g1, w_b1, w_g2, w_b2, cond_dim, ch0, ch1):
    """[_CDPAD, 5*_CPAD] weight + [1, 5*_CPAD] bias (gamma segments biased to 1)."""
    w_all = np.zeros((_CDPAD, 5 * _CPAD), np.float32)
    bias = np.zeros((1, 5 * _CPAD), np.float32)
    segs = [(0, w_lin, ch0, 0.0), (1, w_g1, ch0, 1.0), (2, w_b1, ch0, 0.0),
            (3, w_g2, ch1, 1.0), (4, w_b2, ch1, 0.0)]
    for si, w, c, b0 in segs:
        w_all[:cond_dim, si * _CPAD: si * _CPAD + c] = np.asarray(w)
        bias[0, si * _CPAD: si * _CPAD + c] = b0
    return w_all, bias


def _pack_conv(w_hwio, b):
    """3x3 conv weights packed tap-major with REAL input channels: [9*cin, 128]."""
    cin, cout = w_hwio.shape[2], w_hwio.shape[3]
    wn = np.asarray(w_hwio)
    wp = np.zeros((9 * cin, _CPAD), np.float32)
    bp = np.zeros((1, _CPAD), np.float32)
    for t in range(9):
        ky, kx = divmod(t, 3)
        wp[t * cin:(t + 1) * cin, :cout] = wn[ky, kx]
    bp[0, :cout] = np.asarray(b)
    return wp, bp


def _pos_rows(pos_bias_np, H, W):
    """Learned base x base positional bias, nearest-upsampled to HxW: [H*W, 128]."""
    ch0 = pos_bias_np.shape[-1]
    base = pos_bias_np.shape[0]
    pr = np.zeros((H * W, _CPAD), np.float32)
    for p in range(H * W):
        h, w = divmod(p, W)
        pr[p, :ch0] = pos_bias_np[h * base // H, w * base // W]
    return pr


# ----------------------------------------------------------------------------
# Synthetic small BigGAN generator (stand-in for the pretrained `big_gan`).
# ----------------------------------------------------------------------------
class SyntheticBigGAN:
    def __init__(self, key, dim_z=32, shared_dim=16, n_classes=256,
                 ch0=16, ch1=8, base_res=4):
        assert dim_z + shared_dim <= _CDPAD
        assert ch0 % 8 == 0 and ch1 % 8 == 0   # keeps bf16 weight slices aligned
        self.dim_z, self.shared_dim, self.n_classes = dim_z, shared_dim, n_classes
        self.ch0, self.ch1, self.base_res = ch0, ch1, base_res
        self.out_res = base_res * 2
        cd = dim_z + shared_dim

        ks = jax.random.split(key, 9)
        s = 0.05
        embed = s * jax.random.normal(ks[0], (n_classes, shared_dim), jnp.float32)
        w_lin = s * jax.random.normal(ks[1], (cd, ch0), jnp.float32)
        pos_b = s * jax.random.normal(ks[2], (base_res, base_res, ch0), jnp.float32)
        w_g1 = s * jax.random.normal(ks[3], (cd, ch0), jnp.float32)
        w_b1 = s * jax.random.normal(ks[4], (cd, ch0), jnp.float32)
        w_c1 = s * jax.random.normal(ks[5], (3, 3, ch0, ch1), jnp.float32)
        w_g2 = s * jax.random.normal(ks[6], (cd, ch1), jnp.float32)
        w_b2 = s * jax.random.normal(ks[7], (cd, ch1), jnp.float32)
        w_c2 = s * jax.random.normal(ks[8], (3, 3, ch1, 3), jnp.float32)
        b_c1 = np.zeros((ch1,), np.float32)
        b_c2 = np.zeros((3,), np.float32)

        # class-embedding table stays un-padded; only the B needed rows are
        # gathered (in XLA) and fed to the kernel — no 128 KiB table DMA.
        self.embed = embed                                            # [n_cls, shared]

        w_all, bias_all = _pack_cond_weights(w_lin, w_g1, w_b1, w_g2, w_b2,
                                             cd, ch0, ch1)
        self.w_all = jnp.asarray(w_all, jnp.bfloat16)                 # [64, 640]
        self.bias_all = jnp.asarray(bias_all)                         # [1, 640] f32

        wc1, bc1 = _pack_conv(w_c1, b_c1)                             # [144,128]
        wc2, bc2 = _pack_conv(w_c2, b_c2)                             # [72, 128]
        self.wc1 = jnp.asarray(wc1, jnp.bfloat16)
        self.bc1 = jnp.asarray(bc1)
        self.wc2 = jnp.asarray(wc2, jnp.bfloat16)
        self.bc2 = jnp.asarray(bc2)

        # learned 4x4 positional bias, pre-upsampled to out_res, shared over batch
        self.posb = jnp.asarray(_pos_rows(np.asarray(pos_b), self.out_res,
                                          self.out_res))              # [H*W, 128]

    def shared(self, classes):
        # embedding lookup: tiny [B, shared_dim] gather, kept in the XLA wrapper.
        return self.embed[jnp.asarray(classes, jnp.int32)]

    def __call__(self, z, shared_emb):
        B = z.shape[0]
        H = W = self.out_res
        NR, CP = B * H * W, _CPAD
        bpad = max(8, -(-B // 8) * 8)

        # conditioning rows (z | embed), sublane/lane padded: [bpad, 64]
        cond = jnp.concatenate([z.astype(jnp.float32),
                                shared_emb.astype(jnp.float32)], axis=1)
        cond = jnp.pad(cond, ((0, bpad - B), (0, _CDPAD - cond.shape[1])))

        inputs = (cond, self.w_all, self.bias_all, self.posb,
                  self.wc1, self.bc1, self.wc2, self.bc2)
        in_bytes = sum(int(np.prod(a.shape)) * a.dtype.itemsize for a in inputs)
        flops = 2 * NR * CP * 9 * (self.ch0 + self.ch1) + 2 * bpad * _CDPAD * 5 * CP
        cost = pl.CostEstimate(flops=flops, transcendentals=NR * CP,
                               bytes_accessed=in_bytes + NR * CP * 4)

        out_flat = pl.pallas_call(
            _make_biggan_kernel(B, H, W, self.ch0, self.ch1),
            out_shape=jax.ShapeDtypeStruct((NR, CP), jnp.float32),
            scratch_shapes=[pltpu.VMEM((NR + 2 * _ROWPAD, CP), jnp.float32)],
            compiler_params=pltpu.CompilerParams(
                vmem_limit_bytes=16 * 1024 * 1024),
            cost_estimate=cost,
        )(*inputs)

        img = out_flat[:, :3].reshape(B, H, W, 3)      # un-pad lanes (layout glue)
        return jnp.transpose(img, (0, 3, 1, 2))        # NCHW [B, 3, H, W]


# ----------------------------------------------------------------------------
# ConditionedBigGAN — mirrors the PyTorch module's forward semantics.
# ----------------------------------------------------------------------------
class ConditionedBigGAN:
    def __init__(self, big_gan, target_classes=239):
        self.big_gan = big_gan
        self.set_classes(target_classes)
        self.dim_z = self.big_gan.dim_z

    def set_classes(self, target_classes):
        self.target_classes = np.asarray(target_classes, dtype=np.int64)

    def mixed_classes(self, batch_size):
        if self.target_classes.ndim == 0:
            return jnp.full((batch_size,), int(self.target_classes), jnp.int32)
        # reference uses host-side np.random.choice for the vector case
        return jnp.asarray(np.random.choice(self.target_classes, [batch_size]),
                           dtype=jnp.int32)

    def __call__(self, z, classes=None):
        if classes is None:
            classes = self.mixed_classes(z.shape[0])
        return self.big_gan(z, self.big_gan.shared(classes))


if __name__ == "__main__":
    key = jax.random.PRNGKey(0)
    k_params, k_z = jax.random.split(key)

    big_gan = SyntheticBigGAN(k_params, dim_z=32, shared_dim=16,
                              n_classes=256, ch0=16, ch1=8, base_res=4)
    model = ConditionedBigGAN(big_gan, target_classes=239)

    z = jax.random.normal(k_z, (2, model.dim_z), dtype=jnp.float32)

    out = jax.block_until_ready(model(z))        # default `classes=None` path

    assert out.shape == (2, 3, 8, 8), out.shape
    assert out.dtype == jnp.float32
    assert bool(jnp.all(jnp.isfinite(out)))
    print("KERNEL_OK")
</pallas_src>

<mosaic_0001>
module attributes {stable_mosaic.version = 11 : i64} {
  func.func @kernel(%arg0: memref<8x64xf32, #tpu.memory_space<vmem>>, %arg1: memref<64x640xbf16, #tpu.memory_space<vmem>>, %arg2: memref<1x640xf32, #tpu.memory_space<vmem>>, %arg3: memref<64x128xf32, #tpu.memory_space<vmem>>, %arg4: memref<144x128xbf16, #tpu.memory_space<vmem>>, %arg5: memref<1x128xf32, #tpu.memory_space<vmem>>, %arg6: memref<72x128xbf16, #tpu.memory_space<vmem>>, %arg7: memref<1x128xf32, #tpu.memory_space<vmem>>, %arg8: memref<128x128xf32, #tpu.memory_space<vmem>>, %arg9: memref<160x128xf32, #tpu.memory_space<vmem>>) attributes {dimension_semantics = [], scalar_prefetch = 0 : i64, scratch_operands = 1 : i64, tpu.core_type = #tpu.core_type<tc>} {
    %cst = arith.constant 0.000000e+00 : f32
    %0 = vector.broadcast %cst : f32 to vector<16x128xf32>
    %c0 = arith.constant 0 : index
    %c0_0 = arith.constant 0 : index
    %1 = vector.load %arg9[%c0, %c0_0] : memref<160x128xf32, #tpu.memory_space<vmem>>, vector<16x128xf32>
    tpu.vector_store %arg9[%c0, %c0_0], %0 {strides = array<i32>} : memref<160x128xf32, #tpu.memory_space<vmem>>, vector<16x128xf32>,
    %c144 = arith.constant 144 : index
    %c0_1 = arith.constant 0 : index
    %2 = vector.load %arg9[%c144, %c0_1] : memref<160x128xf32, #tpu.memory_space<vmem>>, vector<16x128xf32>
    tpu.vector_store %arg9[%c144, %c0_1], %0 {strides = array<i32>} : memref<160x128xf32, #tpu.memory_space<vmem>>, vector<16x128xf32>,
    %c0_2 = arith.constant 0 : index
    %c0_3 = arith.constant 0 : index
    %3 = vector.load %arg0[%c0_2, %c0_3] : memref<8x64xf32, #tpu.memory_space<vmem>>, vector<8x64xf32>
    %4 = arith.truncf %3 : vector<8x64xf32> to vector<8x64xbf16>
    %c0_4 = arith.constant 0 : index
    %c0_5 = arith.constant 0 : index
    %5 = vector.load %arg1[%c0_4, %c0_5] : memref<64x640xbf16, #tpu.memory_space<vmem>>, vector<64x640xbf16>
    %cst_6 = arith.constant dense<0.000000e+00> : vector<8x640xf32>
    %6 = tpu.matmul %4, %5, %cst_6 {dimension_numbers = #tpu.dot_dimension_numbers<[1], [0], [0], [1], [0, 0, 1, 1], [], []>} : vector<8x64xbf16>, vector<64x640xbf16>, vector<8x640xf32> -> vector<8x640xf32>
    %c0_7 = arith.constant 0 : index
    %c0_8 = arith.constant 0 : index
    %7 = vector.load %arg2[%c0_7, %c0_8] : memref<1x640xf32, #tpu.memory_space<vmem>>, vector<1x640xf32>
    %8 = vector.broadcast %7 : vector<1x640xf32> to vector<8x640xf32>
    %9 = arith.addf %6, %8 : vector<8x640xf32>
    %10 = vector.extract_strided_slice %9 {offsets = [0, 0], sizes = [8, 128], strides = [1, 1]} : vector<8x640xf32> to vector<8x128xf32>
    %11 = vector.extract_strided_slice %9 {offsets = [0, 128], sizes = [8, 128], strides = [1, 1]} : vector<8x640xf32> to vector<8x128xf32>
    %12 = vector.extract_strided_slice %9 {offsets = [0, 256], sizes = [8, 128], strides = [1, 1]} : vector<8x640xf32> to vector<8x128xf32>
    %13 = vector.extract_strided_slice %9 {offsets = [0, 384], sizes = [8, 128], strides = [1, 1]} : vector<8x640xf32> to vector<8x128xf32>
    %14 = vector.extract_strided_slice %9 {offsets = [0, 512], sizes = [8, 128], strides = [1, 1]} : vector<8x640xf32> to vector<8x128xf32>
    %15 = vector.extract_strided_slice %10 {offsets = [0, 0], sizes = [1, 128], strides = [1, 1]} : vector<8x128xf32> to vector<1x128xf32>
    %c0_9 = arith.constant 0 : index
    %c0_10 = arith.constant 0 : index
    %16 = vector.load %arg3[%c0_9, %c0_10] : memref<64x128xf32, #tpu.memory_space<vmem>>, vector<64x128xf32>
    %17 = vector.broadcast %15 : vector<1x128xf32> to vector<64x128xf32>
    %18 = arith.addf %17, %16 : vector<64x128xf32>
    %19 = vector.extract_strided_slice %10 {offsets = [1, 0], sizes = [1, 128], strides = [1, 1]} : vector<8x128xf32> to vector<1x128xf32>
    %c0_11 = arith.constant 0 : index
    %c0_12 = arith.constant 0 : index
    %20 = vector.load %arg3[%c0_11, %c0_12] : memref<64x128xf32, #tpu.memory_space<vmem>>, vector<64x128xf32>
    %21 = vector.broadcast %19 : vector<1x128xf32> to vector<64x128xf32>
    %22 = arith.addf %21, %20 : vector<64x128xf32>
    %23 = tpu.concatenate %18, %22 in 0 : vector<64x128xf32>, vector<64x128xf32> -> vector<128x128xf32>
    %cst_13 = arith.constant dense<0.000000e+00> : vector<128xf32>
    %24 = vector.multi_reduction <add>, %23, %cst_13 [0] : vector<128x128xf32> to vector<128xf32>
    %25 = vector.shape_cast %24 : vector<128xf32> to vector<1x128xf32>
    %cst_14 = arith.constant 1.280000e+02 : f32
    %26 = vector.broadcast %cst_14 : f32 to vector<1x128xf32>
    %27 = arith.divf %25, %26 : vector<1x128xf32>
    %28 = vector.broadcast %27 : vector<1x128xf32> to vector<128x128xf32>
    %29 = arith.subf %23, %28 : vector<128x128xf32>
    %30 = arith.mulf %29, %29 : vector<128x128xf32>
    %cst_15 = arith.constant dense<0.000000e+00> : vector<128xf32>
    %31 = vector.multi_reduction <add>, %30, %cst_15 [0] : vector<128x128xf32> to vector<128xf32>
    %32 = vector.shape_cast %31 : vector<128xf32> to vector<1x128xf32>
    %cst_16 = arith.constant 1.280000e+02 : f32
    %33 = vector.broadcast %cst_16 : f32 to vector<1x128xf32>
    %34 = arith.divf %32, %33 : vector<1x128xf32>
    %35 = vector.broadcast %27 : vector<1x128xf32> to vector<128x128xf32>
    %36 = arith.subf %23, %35 : vector<128x128xf32>
    %cst_17 = arith.constant 9.99999974E-6 : f32
    %37 = vector.broadcast %cst_17 : f32 to vector<1x128xf32>
    %38 = arith.addf %34, %37 : vector<1x128xf32>
    %39 = math.rsqrt %38 : vector<1x128xf32>
    %40 = vector.broadcast %39 : vector<1x128xf32> to vector<128x128xf32>
    %41 = arith.mulf %36, %40 : vector<128x128xf32>
    %42 = vector.extract_strided_slice %11 {offsets = [0, 0], sizes = [1, 128], strides = [1, 1]} : vector<8x128xf32> to vector<1x128xf32>
    %43 = vector.extract_strided_slice %41 {offsets = [0, 0], sizes = [64, 128], strides = [1, 1]} : vector<128x128xf32> to vector<64x128xf32>
    %44 = vector.broadcast %42 : vector<1x128xf32> to vector<64x128xf32>
    %45 = arith.mulf %44, %43 : vector<64x128xf32>
    %46 = vector.extract_strided_slice %12 {offsets = [0, 0], sizes = [1, 128], strides = [1, 1]} : vector<8x128xf32> to vector<1x128xf32>
    %47 = vector.broadcast %46 : vector<1x128xf32> to vector<64x128xf32>
    %48 = arith.addf %45, %47 : vector<64x128xf32>
    %cst_18 = arith.constant 0.000000e+00 : f32
    %49 = vector.broadcast %cst_18 : f32 to vector<64x128xf32>
    %50 = arith.maximumf %48, %49 : vector<64x128xf32>
    %51 = vector.extract_strided_slice %11 {offsets = [1, 0], sizes = [1, 128], strides = [1, 1]} : vector<8x128xf32> to vector<1x128xf32>
    %52 = vector.extract_strided_slice %41 {offsets = [64, 0], sizes = [64, 128], strides = [1, 1]} : vector<128x128xf32> to vector<64x128xf32>
    %53 = vector.broadcast %51 : vector<1x128xf32> to vector<64x128xf32>
    %54 = arith.mulf %53, %52 : vector<64x128xf32>
    %55 = vector.extract_strided_slice %12 {offsets = [1, 0], sizes = [1, 128], strides = [1, 1]} : vector<8x128xf32> to vector<1x128xf32>
    %56 = vector.broadcast %55 : vector<1x128xf32> to vector<64x128xf32>
    %57 = arith.addf %54, %56 : vector<64x128xf32>
    %cst_19 = arith.constant 0.000000e+00 : f32
    %58 = vector.broadcast %cst_19 : f32 to vector<64x128xf32>
    %59 = arith.maximumf %57, %58 : vector<64x128xf32>
    %60 = tpu.concatenate %50, %59 in 0 : vector<64x128xf32>, vector<64x128xf32> -> vector<128x128xf32>
    %c16 = arith.constant 16 : index
    %c0_20 = arith.constant 0 : index
    %61 = vector.load %arg9[%c16, %c0_20] : memref<160x128xf32, #tpu.memory_space<vmem>>, vector<128x128xf32>
    tpu.vector_store %arg9[%c16, %c0_20], %60 {strides = array<i32>} : memref<160x128xf32, #tpu.memory_space<vmem>>, vector<128x128xf32>,
    %62 = tpu.iota {dimensions = array<i32: 0>} : vector<128x1xi32>
    %c7_i32 = arith.constant 7 : i32
    %63 = vector.broadcast %c7_i32 : i32 to vector<128x1xi32>
    %64 = arith.andi %62, %63 : vector<128x1xi32>
    %c3_i32 = arith.constant 3 : i32
    %65 = vector.broadcast %c3_i32 : i32 to vector<128x1xi32>
    %66 = arith.shrsi %62, %65 : vector<128x1xi32>
    %c7_i32_21 = arith.constant 7 : i32
    %67 = vector.broadcast %c7_i32_21 : i32 to vector<128x1xi32>
    %68 = arith.andi %66, %67 : vector<128x1xi32>
    %cst_22 = arith.constant 0.000000e+00 : f32
    %69 = vector.broadcast %cst_22 : f32 to vector<128x128xf32>
    %c7 = arith.constant 7 : index
    %c0_23 = arith.constant 0 : index
    %70 = vector.load %arg9[%c7, %c0_23] : memref<160x128xf32, #tpu.memory_space<vmem>>, vector<128x128xf32>
    %71 = vector.extract_strided_slice %70 {offsets = [0, 0], sizes = [128, 16], strides = [1, 1]} : vector<128x128xf32> to vector<128x16xf32>
    %c-1_i32 = arith.constant -1 : i32
    %72 = vector.broadcast %c-1_i32 : i32 to vector<128x1xi32>
    %73 = arith.addi %68, %72 : vector<128x1xi32>
    %c0_i32 = arith.constant 0 : i32
    %74 = vector.broadcast %c0_i32 : i32 to vector<128x1xi32>
    %75 = arith.cmpi sge, %73, %74 : vector<128x1xi32>
    %c-1_i32_24 = arith.constant -1 : i32
    %76 = vector.broadcast %c-1_i32_24 : i32 to vector<128x1xi32>
    %77 = arith.addi %68, %76 : vector<128x1xi32>
    %c8_i32 = arith.constant 8 : i32
    %78 = vector.broadcast %c8_i32 : i32 to vector<128x1xi32>
    %79 = arith.cmpi slt, %77, %78 : vector<128x1xi32>
    %80 = arith.andi %75, %79 : vector<128x1xi1>
    %c-1_i32_25 = arith.constant -1 : i32
    %81 = vector.broadcast %c-1_i32_25 : i32 to vector<128x1xi32>
    %82 = arith.addi %64, %81 : vector<128x1xi32>
    %c0_i32_26 = arith.constant 0 : i32
    %83 = vector.broadcast %c0_i32_26 : i32 to vector<128x1xi32>
    %84 = arith.cmpi sge, %82, %83 : vector<128x1xi32>
    %c-1_i32_27 = arith.constant -1 : i32
    %85 = vector.broadcast %c-1_i32_27 : i32 to vector<128x1xi32>
    %86 = arith.addi %64, %85 : vector<128x1xi32>
    %c8_i32_28 = arith.constant 8 : i32
    %87 = vector.broadcast %c8_i32_28 : i32 to vector<128x1xi32>
    %88 = arith.cmpi slt, %86, %87 : vector<128x1xi32>
    %89 = arith.andi %84, %88 : vector<128x1xi1>
    %90 = arith.andi %80, %89 : vector<128x1xi1>
    %91 = arith.extui %90 : vector<128x1xi1> to vector<128x1xi32>
    %92 = arith.sitofp %91 : vector<128x1xi32> to vector<128x1xf32>
    %93 = vector.broadcast %92 : vector<128x1xf32> to vector<128x16xf32>
    %94 = arith.mulf %71, %93 : vector<128x16xf32>
    %95 = arith.truncf %94 : vector<128x16xf32> to vector<128x16xbf16>
    %c0_29 = arith.constant 0 : index
    %c0_30 = arith.constant 0 : index
    %96 = vector.load %arg4[%c0_29, %c0_30] : memref<144x128xbf16, #tpu.memory_space<vmem>>, vector<16x128xbf16>
    %cst_31 = arith.constant dense<0.000000e+00> : vector<128x128xf32>
    %97 = tpu.matmul %95, %96, %cst_31 {dimension_numbers = #tpu.dot_dimension_numbers<[1], [0], [0], [1], [0, 0, 1, 1], [], []>} : vector<128x16xbf16>, vector<16x128xbf16>, vector<128x128xf32> -> vector<128x128xf32>
    %98 = arith.addf %69, %97 : vector<128x128xf32>
    %c8 = arith.constant 8 : index
    %c0_32 = arith.constant 0 : index
    %99 = vector.load %arg9[%c8, %c0_32] : memref<160x128xf32, #tpu.memory_space<vmem>>, vector<128x128xf32>
    %100 = vector.extract_strided_slice %99 {offsets = [0, 0], sizes = [128, 16], strides = [1, 1]} : vector<128x128xf32> to vector<128x16xf32>
    %c-1_i32_33 = arith.constant -1 : i32
    %101 = vector.broadcast %c-1_i32_33 : i32 to vector<128x1xi32>
    %102 = arith.addi %68, %101 : vector<128x1xi32>
    %c0_i32_34 = arith.constant 0 : i32
    %103 = vector.broadcast %c0_i32_34 : i32 to vector<128x1xi32>
    %104 = arith.cmpi sge, %102, %103 : vector<128x1xi32>
    %c-1_i32_35 = arith.constant -1 : i32
    %105 = vector.broadcast %c-1_i32_35 : i32 to vector<128x1xi32>
    %106 = arith.addi %68, %105 : vector<128x1xi32>
    %c8_i32_36 = arith.constant 8 : i32
    %107 = vector.broadcast %c8_i32_36 : i32 to vector<128x1xi32>
    %108 = arith.cmpi slt, %106, %107 : vector<128x1xi32>
    %109 = arith.andi %104, %108 : vector<128x1xi1>
    %110 = arith.extui %109 : vector<128x1xi1> to vector<128x1xi32>
    %111 = arith.sitofp %110 : vector<128x1xi32> to vector<128x1xf32>
    %112 = vector.broadcast %111 : vector<128x1xf32> to vector<128x16xf32>
    %113 = arith.mulf %100, %112 : vector<128x16xf32>
    %114 = arith.truncf %113 : vector<128x16xf32> to vector<128x16xbf16>
    %c16_37 = arith.constant 16 : index
    %c0_38 = arith.constant 0 : index
    %115 = vector.load %arg4[%c16_37, %c0_38] : memref<144x128xbf16, #tpu.memory_space<vmem>>, vector<16x128xbf16>
    %cst_39 = arith.constant dense<0.000000e+00> : vector<128x128xf32>
    %116 = tpu.matmul %114, %115, %cst_39 {dimension_numbers = #tpu.dot_dimension_numbers<[1], [0], [0], [1], [0, 0, 1, 1], [], []>} : vector<128x16xbf16>, vector<16x128xbf16>, vector<128x128xf32> -> vector<128x128xf32>
    %117 = arith.addf %98, %116 : vector<128x128xf32>
    %c9 = arith.constant 9 : index
    %c0_40 = arith.constant 0 : index
    %118 = vector.load %arg9[%c9, %c0_40] : memref<160x128xf32, #tpu.memory_space<vmem>>, vector<128x128xf32>
    %119 = vector.extract_strided_slice %118 {offsets = [0, 0], sizes = [128, 16], strides = [1, 1]} : vector<128x128xf32> to vector<128x16xf32>
    %c-1_i32_41 = arith.constant -1 : i32
    %120 = vector.broadcast %c-1_i32_41 : i32 to vector<128x1xi32>
    %121 = arith.addi %68, %120 : vector<128x1xi32>
    %c0_i32_42 = arith.constant 0 : i32
    %122 = vector.broadcast %c0_i32_42 : i32 to vector<128x1xi32>
    %123 = arith.cmpi sge, %121, %122 : vector<128x1xi32>
    %c-1_i32_43 = arith.constant -1 : i32
    %124 = vector.broadcast %c-1_i32_43 : i32 to vector<128x1xi32>
    %125 = arith.addi %68, %124 : vector<128x1xi32>
    %c8_i32_44 = arith.constant 8 : i32
    %126 = vector.broadcast %c8_i32_44 : i32 to vector<128x1xi32>
    %127 = arith.cmpi slt, %125, %126 : vector<128x1xi32>
    %128 = arith.andi %123, %127 : vector<128x1xi1>
    %c1_i32 = arith.constant 1 : i32
    %129 = vector.broadcast %c1_i32 : i32 to vector<128x1xi32>
    %130 = arith.addi %64, %129 : vector<128x1xi32>
    %c0_i32_45 = arith.constant 0 : i32
    %131 = vector.broadcast %c0_i32_45 : i32 to vector<128x1xi32>
    %132 = arith.cmpi sge, %130, %131 : vector<128x1xi32>
    %c1_i32_46 = arith.constant 1 : i32
    %133 = vector.broadcast %c1_i32_46 : i32 to vector<128x1xi32>
    %134 = arith.addi %64, %133 : vector<128x1xi32>
    %c8_i32_47 = arith.constant 8 : i32
    %135 = vector.broadcast %c8_i32_47 : i32 to vector<128x1xi32>
    %136 = arith.cmpi slt, %134, %135 : vector<128x1xi32>
    %137 = arith.andi %132, %136 : vector<128x1xi1>
    %138 = arith.andi %128, %137 : vector<128x1xi1>
    %139 = arith.extui %138 : vector<128x1xi1> to vector<128x1xi32>
    %140 = arith.sitofp %139 : vector<128x1xi32> to vector<128x1xf32>
    %141 = vector.broadcast %140 : vector<128x1xf32> to vector<128x16xf32>
    %142 = arith.mulf %119, %141 : vector<128x16xf32>
    %143 = arith.truncf %142 : vector<128x16xf32> to vector<128x16xbf16>
    %c32 = arith.constant 32 : index
    %c0_48 = arith.constant 0 : index
    %144 = vector.load %arg4[%c32, %c0_48] : memref<144x128xbf16, #tpu.memory_space<vmem>>, vector<16x128xbf16>
    %cst_49 = arith.constant dense<0.000000e+00> : vector<128x128xf32>
    %145 = tpu.matmul %143, %144, %cst_49 {dimension_numbers = #tpu.dot_dimension_numbers<[1], [0], [0], [1], [0, 0, 1, 1], [], []>} : vector<128x16xbf16>, vector<16x128xbf16>, vector<128x128xf32> -> vector<128x128xf32>
    %146 = arith.addf %117, %145 : vector<128x128xf32>
    %c15 = arith.constant 15 : index
    %c0_50 = arith.constant 0 : index
    %147 = vector.load %arg9[%c15, %c0_50] : memref<160x128xf32, #tpu.memory_space<vmem>>, vector<128x128xf32>
    %148 = vector.extract_strided_slice %147 {offsets = [0, 0], sizes = [128, 16], strides = [1, 1]} : vector<128x128xf32> to vector<128x16xf32>
    %c-1_i32_51 = arith.constant -1 : i32
    %149 = vector.broadcast %c-1_i32_51 : i32 to vector<128x1xi32>
    %150 = arith.addi %64, %149 : vector<128x1xi32>
    %c0_i32_52 = arith.constant 0 : i32
    %151 = vector.broadcast %c0_i32_52 : i32 to vector<128x1xi32>
    %152 = arith.cmpi sge, %150, %151 : vector<128x1xi32>
    %c-1_i32_53 = arith.constant -1 : i32
    %153 = vector.broadcast %c-1_i32_53 : i32 to vector<128x1xi32>
    %154 = arith.addi %64, %153 : vector<128x1xi32>
    %c8_i32_54 = arith.constant 8 : i32
    %155 = vector.broadcast %c8_i32_54 : i32 to vector<128x1xi32>
    %156 = arith.cmpi slt, %154, %155 : vector<128x1xi32>
    %157 = arith.andi %152, %156 : vector<128x1xi1>
    %158 = arith.extui %157 : vector<128x1xi1> to vector<128x1xi32>
    %159 = arith.sitofp %158 : vector<128x1xi32> to vector<128x1xf32>
    %160 = vector.broadcast %159 : vector<128x1xf32> to vector<128x16xf32>
    %161 = arith.mulf %148, %160 : vector<128x16xf32>
    %162 = arith.truncf %161 : vector<128x16xf32> to vector<128x16xbf16>
    %c48 = arith.constant 48 : index
    %c0_55 = arith.constant 0 : index
    %163 = vector.load %arg4[%c48, %c0_55] : memref<144x128xbf16, #tpu.memory_space<vmem>>, vector<16x128xbf16>
    %cst_56 = arith.constant dense<0.000000e+00> : vector<128x128xf32>
    %164 = tpu.matmul %162, %163, %cst_56 {dimension_numbers = #tpu.dot_dimension_numbers<[1], [0], [0], [1], [0, 0, 1, 1], [], []>} : vector<128x16xbf16>, vector<16x128xbf16>, vector<128x128xf32> -> vector<128x128xf32>
    %165 = arith.addf %146, %164 : vector<128x128xf32>
    %c16_57 = arith.constant 16 : index
    %c0_58 = arith.constant 0 : index
    %166 = vector.load %arg9[%c16_57, %c0_58] : memref<160x128xf32, #tpu.memory_space<vmem>>, vector<128x128xf32>
    %167 = vector.extract_strided_slice %166 {offsets = [0, 0], sizes = [128, 16], strides = [1, 1]} : vector<128x128xf32> to vector<128x16xf32>
    %168 = arith.truncf %167 : vector<128x16xf32> to vector<128x16xbf16>
    %c64 = arith.constant 64 : index
    %c0_59 = arith.constant 0 : index
    %169 = vector.load %arg4[%c64, %c0_59] : memref<144x128xbf16, #tpu.memory_space<vmem>>, vector<16x128xbf16>
    %cst_60 = arith.constant dense<0.000000e+00> : vector<128x128xf32>
    %170 = tpu.matmul %168, %169, %cst_60 {dimension_numbers = #tpu.dot_dimension_numbers<[1], [0], [0], [1], [0, 0, 1, 1], [], []>} : vector<128x16xbf16>, vector<16x128xbf16>, vector<128x128xf32> -> vector<128x128xf32>
    %171 = arith.addf %165, %170 : vector<128x128xf32>
    %c17 = arith.constant 17 : index
    %c0_61 = arith.constant 0 : index
    %172 = vector.load %arg9[%c17, %c0_61] : memref<160x128xf32, #tpu.memory_space<vmem>>, vector<128x128xf32>
    %173 = vector.extract_strided_slice %172 {offsets = [0, 0], sizes = [128, 16], strides = [1, 1]} : vector<128x128xf32> to vector<128x16xf32>
    %c1_i32_62 = arith.constant 1 : i32
    %174 = vector.broadcast %c1_i32_62 : i32 to vector<128x1xi32>
    %175 = arith.addi %64, %174 : vector<128x1xi32>
    %c0_i32_63 = arith.constant 0 : i32
    %176 = vector.broadcast %c0_i32_63 : i32 to vector<128x1xi32>
    %177 = arith.cmpi sge, %175, %176 : vector<128x1xi32>
    %c1_i32_64 = arith.constant 1 : i32
    %178 = vector.broadcast %c1_i32_64 : i32 to vector<128x1xi32>
    %179 = arith.addi %64, %178 : vector<128x1xi32>
    %c8_i32_65 = arith.constant 8 : i32
    %180 = vector.broadcast %c8_i32_65 : i32 to vector<128x1xi32>
    %181 = arith.cmpi slt, %179, %180 : vector<128x1xi32>
    %182 = arith.andi %177, %181 : vector<128x1xi1>
    %183 = arith.extui %182 : vector<128x1xi1> to vector<128x1xi32>
    %184 = arith.sitofp %183 : vector<128x1xi32> to vector<128x1xf32>
    %185 = vector.broadcast %184 : vector<128x1xf32> to vector<128x16xf32>
    %186 = arith.mulf %173, %185 : vector<128x16xf32>
    %187 = arith.truncf %186 : vector<128x16xf32> to vector<128x16xbf16>
    %c80 = arith.constant 80 : index
    %c0_66 = arith.constant 0 : index
    %188 = vector.load %arg4[%c80, %c0_66] : memref<144x128xbf16, #tpu.memory_space<vmem>>, vector<16x128xbf16>
    %cst_67 = arith.constant dense<0.000000e+00> : vector<128x128xf32>
    %189 = tpu.matmul %187, %188, %cst_67 {dimension_numbers = #tpu.dot_dimension_numbers<[1], [0], [0], [1], [0, 0, 1, 1], [], []>} : vector<128x16xbf16>, vector<16x128xbf16>, vector<128x128xf32> -> vector<128x128xf32>
    %190 = arith.addf %171, %189 : vector<128x128xf32>
    %c23 = arith.constant 23 : index
    %c0_68 = arith.constant 0 : index
    %191 = vector.load %arg9[%c23, %c0_68] : memref<160x128xf32, #tpu.memory_space<vmem>>, vector<128x128xf32>
    %192 = vector.extract_strided_slice %191 {offsets = [0, 0], sizes = [128, 16], strides = [1, 1]} : vector<128x128xf32> to vector<128x16xf32>
    %c1_i32_69 = arith.constant 1 : i32
    %193 = vector.broadcast %c1_i32_69 : i32 to vector<128x1xi32>
    %194 = arith.addi %68, %193 : vector<128x1xi32>
    %c0_i32_70 = arith.constant 0 : i32
    %195 = vector.broadcast %c0_i32_70 : i32 to vector<128x1xi32>
    %196 = arith.cmpi sge, %194, %195 : vector<128x1xi32>
    %c1_i32_71 = arith.constant 1 : i32
    %197 = vector.broadcast %c1_i32_71 : i32 to vector<128x1xi32>
    %198 = arith.addi %68, %197 : vector<128x1xi32>
    %c8_i32_72 = arith.constant 8 : i32
    %199 = vector.broadcast %c8_i32_72 : i32 to vector<128x1xi32>
    %200 = arith.cmpi slt, %198, %199 : vector<128x1xi32>
    %201 = arith.andi %196, %200 : vector<128x1xi1>
    %c-1_i32_73 = arith.constant -1 : i32
    %202 = vector.broadcast %c-1_i32_73 : i32 to vector<128x1xi32>
    %203 = arith.addi %64, %202 : vector<128x1xi32>
    %c0_i32_74 = arith.constant 0 : i32
    %204 = vector.broadcast %c0_i32_74 : i32 to vector<128x1xi32>
    %205 = arith.cmpi sge, %203, %204 : vector<128x1xi32>
    %c-1_i32_75 = arith.constant -1 : i32
    %206 = vector.broadcast %c-1_i32_75 : i32 to vector<128x1xi32>
    %207 = arith.addi %64, %206 : vector<128x1xi32>
    %c8_i32_76 = arith.constant 8 : i32
    %208 = vector.broadcast %c8_i32_76 : i32 to vector<128x1xi32>
    %209 = arith.cmpi slt, %207, %208 : vector<128x1xi32>
    %210 = arith.andi %205, %209 : vector<128x1xi1>
    %211 = arith.andi %201, %210 : vector<128x1xi1>
    %212 = arith.extui %211 : vector<128x1xi1> to vector<128x1xi32>
    %213 = arith.sitofp %212 : vector<128x1xi32> to vector<128x1xf32>
    %214 = vector.broadcast %213 : vector<128x1xf32> to vector<128x16xf32>
    %215 = arith.mulf %192, %214 : vector<128x16xf32>
    %216 = arith.truncf %215 : vector<128x16xf32> to vector<128x16xbf16>
    %c96 = arith.constant 96 : index
    %c0_77 = arith.constant 0 : index
    %217 = vector.load %arg4[%c96, %c0_77] : memref<144x128xbf16, #tpu.memory_space<vmem>>, vector<16x128xbf16>
    %cst_78 = arith.constant dense<0.000000e+00> : vector<128x128xf32>
    %218 = tpu.matmul %216, %217, %cst_78 {dimension_numbers = #tpu.dot_dimension_numbers<[1], [0], [0], [1], [0, 0, 1, 1], [], []>} : vector<128x16xbf16>, vector<16x128xbf16>, vector<128x128xf32> -> vector<128x128xf32>
    %219 = arith.addf %190, %218 : vector<128x128xf32>
    %c24 = arith.constant 24 : index
    %c0_79 = arith.constant 0 : index
    %220 = vector.load %arg9[%c24, %c0_79] : memref<160x128xf32, #tpu.memory_space<vmem>>, vector<128x128xf32>
    %221 = vector.extract_strided_slice %220 {offsets = [0, 0], sizes = [128, 16], strides = [1, 1]} : vector<128x128xf32> to vector<128x16xf32>
    %c1_i32_80 = arith.constant 1 : i32
    %222 = vector.broadcast %c1_i32_80 : i32 to vector<128x1xi32>
    %223 = arith.addi %68, %222 : vector<128x1xi32>
    %c0_i32_81 = arith.constant 0 : i32
    %224 = vector.broadcast %c0_i32_81 : i32 to vector<128x1xi32>
    %225 = arith.cmpi sge, %223, %224 : vector<128x1xi32>
    %c1_i32_82 = arith.constant 1 : i32
    %226 = vector.broadcast %c1_i32_82 : i32 to vector<128x1xi32>
    %227 = arith.addi %68, %226 : vector<128x1xi32>
    %c8_i32_83 = arith.constant 8 : i32
    %228 = vector.broadcast %c8_i32_83 : i32 to vector<128x1xi32>
    %229 = arith.cmpi slt, %227, %228 : vector<128x1xi32>
    %230 = arith.andi %225, %229 : vector<128x1xi1>
    %231 = arith.extui %230 : vector<128x1xi1> to vector<128x1xi32>
    %232 = arith.sitofp %231 : vector<128x1xi32> to vector<128x1xf32>
    %233 = vector.broadcast %232 : vector<128x1xf32> to vector<128x16xf32>
    %234 = arith.mulf %221, %233 : vector<128x16xf32>
    %235 = arith.truncf %234 : vector<128x16xf32> to vector<128x16xbf16>
    %c112 = arith.constant 112 : index
    %c0_84 = arith.constant 0 : index
    %236 = vector.load %arg4[%c112, %c0_84] : memref<144x128xbf16, #tpu.memory_space<vmem>>, vector<16x128xbf16>
    %cst_85 = arith.constant dense<0.000000e+00> : vector<128x128xf32>
    %237 = tpu.matmul %235, %236, %cst_85 {dimension_numbers = #tpu.dot_dimension_numbers<[1], [0], [0], [1], [0, 0, 1, 1], [], []>} : vector<128x16xbf16>, vector<16x128xbf16>, vector<128x128xf32> -> vector<128x128xf32>
    %238 = arith.addf %219, %237 : vector<128x128xf32>
    %c25 = arith.constant 25 : index
    %c0_86 = arith.constant 0 : index
    %239 = vector.load %arg9[%c25, %c0_86] : memref<160x128xf32, #tpu.memory_space<vmem>>, vector<128x128xf32>
    %240 = vector.extract_strided_slice %239 {offsets = [0, 0], sizes = [128, 16], strides = [1, 1]} : vector<128x128xf32> to vector<128x16xf32>
    %c1_i32_87 = arith.constant 1 : i32
    %241 = vector.broadcast %c1_i32_87 : i32 to vector<128x1xi32>
    %242 = arith.addi %68, %241 : vector<128x1xi32>
    %c0_i32_88 = arith.constant 0 : i32
    %243 = vector.broadcast %c0_i32_88 : i32 to vector<128x1xi32>
    %244 = arith.cmpi sge, %242, %243 : vector<128x1xi32>
    %c1_i32_89 = arith.constant 1 : i32
    %245 = vector.broadcast %c1_i32_89 : i32 to vector<128x1xi32>
    %246 = arith.addi %68, %245 : vector<128x1xi32>
    %c8_i32_90 = arith.constant 8 : i32
    %247 = vector.broadcast %c8_i32_90 : i32 to vector<128x1xi32>
    %248 = arith.cmpi slt, %246, %247 : vector<128x1xi32>
    %249 = arith.andi %244, %248 : vector<128x1xi1>
    %c1_i32_91 = arith.constant 1 : i32
    %250 = vector.broadcast %c1_i32_91 : i32 to vector<128x1xi32>
    %251 = arith.addi %64, %250 : vector<128x1xi32>
    %c0_i32_92 = arith.constant 0 : i32
    %252 = vector.broadcast %c0_i32_92 : i32 to vector<128x1xi32>
    %253 = arith.cmpi sge, %251, %252 : vector<128x1xi32>
    %c1_i32_93 = arith.constant 1 : i32
    %254 = vector.broadcast %c1_i32_93 : i32 to vector<128x1xi32>
    %255 = arith.addi %64, %254 : vector<128x1xi32>
    %c8_i32_94 = arith.constant 8 : i32
    %256 = vector.broadcast %c8_i32_94 : i32 to vector<128x1xi32>
    %257 = arith.cmpi slt, %255, %256 : vector<128x1xi32>
    %258 = arith.andi %253, %257 : vector<128x1xi1>
    %259 = arith.andi %249, %258 : vector<128x1xi1>
    %260 = arith.extui %259 : vector<128x1xi1> to vector<128x1xi32>
    %261 = arith.sitofp %260 : vector<128x1xi32> to vector<128x1xf32>
    %262 = vector.broadcast %261 : vector<128x1xf32> to vector<128x16xf32>
    %263 = arith.mulf %240, %262 : vector<128x16xf32>
    %264 = arith.truncf %263 : vector<128x16xf32> to vector<128x16xbf16>
    %c128 = arith.constant 128 : index
    %c0_95 = arith.constant 0 : index
    %265 = vector.load %arg4[%c128, %c0_95] : memref<144x128xbf16, #tpu.memory_space<vmem>>, vector<16x128xbf16>
    %cst_96 = arith.constant dense<0.000000e+00> : vector<128x128xf32>
    %266 = tpu.matmul %264, %265, %cst_96 {dimension_numbers = #tpu.dot_dimension_numbers<[1], [0], [0], [1], [0, 0, 1, 1], [], []>} : vector<128x16xbf16>, vector<16x128xbf16>, vector<128x128xf32> -> vector<128x128xf32>
    %267 = arith.addf %238, %266 : vector<128x128xf32>
    %c0_97 = arith.constant 0 : index
    %c0_98 = arith.constant 0 : index
    %268 = vector.load %arg5[%c0_97, %c0_98] : memref<1x128xf32, #tpu.memory_space<vmem>>, vector<1x128xf32>
    %269 = vector.broadcast %268 : vector<1x128xf32> to vector<128x128xf32>
    %270 = arith.addf %267, %269 : vector<128x128xf32>
    %cst_99 = arith.constant dense<0.000000e+00> : vector<128xf32>
    %271 = vector.multi_reduction <add>, %270, %cst_99 [0] : vector<128x128xf32> to vector<128xf32>
    %272 = vector.shape_cast %271 : vector<128xf32> to vector<1x128xf32>
    %cst_100 = arith.constant 1.280000e+02 : f32
    %273 = vector.broadcast %cst_100 : f32 to vector<1x128xf32>
    %274 = arith.divf %272, %273 : vector<1x128xf32>
    %275 = vector.broadcast %274 : vector<1x128xf32> to vector<128x128xf32>
    %276 = arith.subf %270, %275 : vector<128x128xf32>
    %277 = arith.mulf %276, %276 : vector<128x128xf32>
    %cst_101 = arith.constant dense<0.000000e+00> : vector<128xf32>
    %278 = vector.multi_reduction <add>, %277, %cst_101 [0] : vector<128x128xf32> to vector<128xf32>
    %279 = vector.shape_cast %278 : vector<128xf32> to vector<1x128xf32>
    %cst_102 = arith.constant 1.280000e+02 : f32
    %280 = vector.broadcast %cst_102 : f32 to vector<1x128xf32>
    %281 = arith.divf %279, %280 : vector<1x128xf32>
    %282 = vector.broadcast %274 : vector<1x128xf32> to vector<128x128xf32>
    %283 = arith.subf %270, %282 : vector<128x128xf32>
    %cst_103 = arith.constant 9.99999974E-6 : f32
    %284 = vector.broadcast %cst_103 : f32 to vector<1x128xf32>
    %285 = arith.addf %281, %284 : vector<1x128xf32>
    %286 = math.rsqrt %285 : vector<1x128xf32>
    %287 = vector.broadcast %286 : vector<1x128xf32> to vector<128x128xf32>
    %288 = arith.mulf %283, %287 : vector<128x128xf32>
    %289 = vector.extract_strided_slice %13 {offsets = [0, 0], sizes = [1, 128], strides = [1, 1]} : vector<8x128xf32> to vector<1x128xf32>
    %290 = vector.extract_strided_slice %288 {offsets = [0, 0], sizes = [64, 128], strides = [1, 1]} : vector<128x128xf32> to vector<64x128xf32>
    %291 = vector.broadcast %289 : vector<1x128xf32> to vector<64x128xf32>
    %292 = arith.mulf %291, %290 : vector<64x128xf32>
    %293 = vector.extract_strided_slice %14 {offsets = [0, 0], sizes = [1, 128], strides = [1, 1]} : vector<8x128xf32> to vector<1x128xf32>
    %294 = vector.broadcast %293 : vector<1x128xf32> to vector<64x128xf32>
    %295 = arith.addf %292, %294 : vector<64x128xf32>
    %cst_104 = arith.constant 0.000000e+00 : f32
    %296 = vector.broadcast %cst_104 : f32 to vector<64x128xf32>
    %297 = arith.maximumf %295, %296 : vector<64x128xf32>
    %298 = vector.extract_strided_slice %13 {offsets = [1, 0], sizes = [1, 128], strides = [1, 1]} : vector<8x128xf32> to vector<1x128xf32>
    %299 = vector.extract_strided_slice %288 {offsets = [64, 0], sizes = [64, 128], strides = [1, 1]} : vector<128x128xf32> to vector<64x128xf32>
    %300 = vector.broadcast %298 : vector<1x128xf32> to vector<64x128xf32>
    %301 = arith.mulf %300, %299 : vector<64x128xf32>
    %302 = vector.extract_strided_slice %14 {offsets = [1, 0], sizes = [1, 128], strides = [1, 1]} : vector<8x128xf32> to vector<1x128xf32>
    %303 = vector.broadcast %302 : vector<1x128xf32> to vector<64x128xf32>
    %304 = arith.addf %301, %303 : vector<64x128xf32>
    %cst_105 = arith.constant 0.000000e+00 : f32
    %305 = vector.broadcast %cst_105 : f32 to vector<64x128xf32>
    %306 = arith.maximumf %304, %305 : vector<64x128xf32>
    %307 = tpu.concatenate %297, %306 in 0 : vector<64x128xf32>, vector<64x128xf32> -> vector<128x128xf32>
    %c16_106 = arith.constant 16 : index
    %c0_107 = arith.constant 0 : index
    %308 = vector.load %arg9[%c16_106, %c0_107] : memref<160x128xf32, #tpu.memory_space<vmem>>, vector<128x128xf32>
    tpu.vector_store %arg9[%c16_106, %c0_107], %307 {strides = array<i32>} : memref<160x128xf32, #tpu.memory_space<vmem>>, vector<128x128xf32>,
    %309 = tpu.iota {dimensions = array<i32: 0>} : vector<128x1xi32>
    %c7_i32_108 = arith.constant 7 : i32
    %310 = vector.broadcast %c7_i32_108 : i32 to vector<128x1xi32>
    %311 = arith.andi %309, %310 : vector<128x1xi32>
    %c3_i32_109 = arith.constant 3 : i32
    %312 = vector.broadcast %c3_i32_109 : i32 to vector<128x1xi32>
    %313 = arith.shrsi %309, %312 : vector<128x1xi32>
    %c7_i32_110 = arith.constant 7 : i32
    %314 = vector.broadcast %c7_i32_110 : i32 to vector<128x1xi32>
    %315 = arith.andi %313, %314 : vector<128x1xi32>
    %cst_111 = arith.constant 0.000000e+00 : f32
    %316 = vector.broadcast %cst_111 : f32 to vector<128x128xf32>
    %c7_112 = arith.constant 7 : index
    %c0_113 = arith.constant 0 : index
    %317 = vector.load %arg9[%c7_112, %c0_113] : memref<160x128xf32, #tpu.memory_space<vmem>>, vector<128x128xf32>
    %318 = vector.extract_strided_slice %317 {offsets = [0, 0], sizes = [128, 8], strides = [1, 1]} : vector<128x128xf32> to vector<128x8xf32>
    %c-1_i32_114 = arith.constant -1 : i32
    %319 = vector.broadcast %c-1_i32_114 : i32 to vector<128x1xi32>
    %320 = arith.addi %315, %319 : vector<128x1xi32>
    %c0_i32_115 = arith.constant 0 : i32
    %321 = vector.broadcast %c0_i32_115 : i32 to vector<128x1xi32>
    %322 = arith.cmpi sge, %320, %321 : vector<128x1xi32>
    %c-1_i32_116 = arith.constant -1 : i32
    %323 = vector.broadcast %c-1_i32_116 : i32 to vector<128x1xi32>
    %324 = arith.addi %315, %323 : vector<128x1xi32>
    %c8_i32_117 = arith.constant 8 : i32
    %325 = vector.broadcast %c8_i32_117 : i32 to vector<128x1xi32>
    %326 = arith.cmpi slt, %324, %325 : vector<128x1xi32>
    %327 = arith.andi %322, %326 : vector<128x1xi1>
    %c-1_i32_118 = arith.constant -1 : i32
    %328 = vector.broadcast %c-1_i32_118 : i32 to vector<128x1xi32>
    %329 = arith.addi %311, %328 : vector<128x1xi32>
    %c0_i32_119 = arith.constant 0 : i32
    %330 = vector.broadcast %c0_i32_119 : i32 to vector<128x1xi32>
    %331 = arith.cmpi sge, %329, %330 : vector<128x1xi32>
    %c-1_i32_120 = arith.constant -1 : i32
    %332 = vector.broadcast %c-1_i32_120 : i32 to vector<128x1xi32>
    %333 = arith.addi %311, %332 : vector<128x1xi32>
    %c8_i32_121 = arith.constant 8 : i32
    %334 = vector.broadcast %c8_i32_121 : i32 to vector<128x1xi32>
    %335 = arith.cmpi slt, %333, %334 : vector<128x1xi32>
    %336 = arith.andi %331, %335 : vector<128x1xi1>
    %337 = arith.andi %327, %336 : vector<128x1xi1>
    %338 = arith.extui %337 : vector<128x1xi1> to vector<128x1xi32>
    %339 = arith.sitofp %338 : vector<128x1xi32> to vector<128x1xf32>
    %340 = vector.broadcast %339 : vector<128x1xf32> to vector<128x8xf32>
    %341 = arith.mulf %318, %340 : vector<128x8xf32>
    %342 = arith.truncf %341 : vector<128x8xf32> to vector<128x8xbf16>
    %c0_122 = arith.constant 0 : index
    %c0_123 = arith.constant 0 : index
    %343 = vector.load %arg6[%c0_122, %c0_123] : memref<72x128xbf16, #tpu.memory_space<vmem>>, vector<8x128xbf16>
    %cst_124 = arith.constant dense<0.000000e+00> : vector<128x128xf32>
    %344 = tpu.matmul %342, %343, %cst_124 {dimension_numbers = #tpu.dot_dimension_numbers<[1], [0], [0], [1], [0, 0, 1, 1], [], []>} : vector<128x8xbf16>, vector<8x128xbf16>, vector<128x128xf32> -> vector<128x128xf32>
    %345 = arith.addf %316, %344 : vector<128x128xf32>
    %c8_125 = arith.constant 8 : index
    %c0_126 = arith.constant 0 : index
    %346 = vector.load %arg9[%c8_125, %c0_126] : memref<160x128xf32, #tpu.memory_space<vmem>>, vector<128x128xf32>
    %347 = vector.extract_strided_slice %346 {offsets = [0, 0], sizes = [128, 8], strides = [1, 1]} : vector<128x128xf32> to vector<128x8xf32>
    %c-1_i32_127 = arith.constant -1 : i32
    %348 = vector.broadcast %c-1_i32_127 : i32 to vector<128x1xi32>
    %349 = arith.addi %315, %348 : vector<128x1xi32>
    %c0_i32_128 = arith.constant 0 : i32
    %350 = vector.broadcast %c0_i32_128 : i32 to vector<128x1xi32>
    %351 = arith.cmpi sge, %349, %350 : vector<128x1xi32>
    %c-1_i32_129 = arith.constant -1 : i32
    %352 = vector.broadcast %c-1_i32_129 : i32 to vector<128x1xi32>
    %353 = arith.addi %315, %352 : vector<128x1xi32>
    %c8_i32_130 = arith.constant 8 : i32
    %354 = vector.broadcast %c8_i32_130 : i32 to vector<128x1xi32>
    %355 = arith.cmpi slt, %353, %354 : vector<128x1xi32>
    %356 = arith.andi %351, %355 : vector<128x1xi1>
    %357 = arith.extui %356 : vector<128x1xi1> to vector<128x1xi32>
    %358 = arith.sitofp %357 : vector<128x1xi32> to vector<128x1xf32>
    %359 = vector.broadcast %358 : vector<128x1xf32> to vector<128x8xf32>
    %360 = arith.mulf %347, %359 : vector<128x8xf32>
    %361 = arith.truncf %360 : vector<128x8xf32> to vector<128x8xbf16>
    %c8_131 = arith.constant 8 : index
    %c0_132 = arith.constant 0 : index
    %362 = vector.load %arg6[%c8_131, %c0_132] : memref<72x128xbf16, #tpu.memory_space<vmem>>, vector<8x128xbf16>
    %cst_133 = arith.constant dense<0.000000e+00> : vector<128x128xf32>
    %363 = tpu.matmul %361, %362, %cst_133 {dimension_numbers = #tpu.dot_dimension_numbers<[1], [0], [0], [1], [0, 0, 1, 1], [], []>} : vector<128x8xbf16>, vector<8x128xbf16>, vector<128x128xf32> -> vector<128x128xf32>
    %364 = arith.addf %345, %363 : vector<128x128xf32>
    %c9_134 = arith.constant 9 : index
    %c0_135 = arith.constant 0 : index
    %365 = vector.load %arg9[%c9_134, %c0_135] : memref<160x128xf32, #tpu.memory_space<vmem>>, vector<128x128xf32>
    %366 = vector.extract_strided_slice %365 {offsets = [0, 0], sizes = [128, 8], strides = [1, 1]} : vector<128x128xf32> to vector<128x8xf32>
    %c-1_i32_136 = arith.constant -1 : i32
    %367 = vector.broadcast %c-1_i32_136 : i32 to vector<128x1xi32>
    %368 = arith.addi %315, %367 : vector<128x1xi32>
    %c0_i32_137 = arith.constant 0 : i32
    %369 = vector.broadcast %c0_i32_137 : i32 to vector<128x1xi32>
    %370 = arith.cmpi sge, %368, %369 : vector<128x1xi32>
    %c-1_i32_138 = arith.constant -1 : i32
    %371 = vector.broadcast %c-1_i32_138 : i32 to vector<128x1xi32>
    %372 = arith.addi %315, %371 : vector<128x1xi32>
    %c8_i32_139 = arith.constant 8 : i32
    %373 = vector.broadcast %c8_i32_139 : i32 to vector<128x1xi32>
    %374 = arith.cmpi slt, %372, %373 : vector<128x1xi32>
    %375 = arith.andi %370, %374 : vector<128x1xi1>
    %c1_i32_140 = arith.constant 1 : i32
    %376 = vector.broadcast %c1_i32_140 : i32 to vector<128x1xi32>
    %377 = arith.addi %311, %376 : vector<128x1xi32>
    %c0_i32_141 = arith.constant 0 : i32
    %378 = vector.broadcast %c0_i32_141 : i32 to vector<128x1xi32>
    %379 = arith.cmpi sge, %377, %378 : vector<128x1xi32>
    %c1_i32_142 = arith.constant 1 : i32
    %380 = vector.broadcast %c1_i32_142 : i32 to vector<128x1xi32>
    %381 = arith.addi %311, %380 : vector<128x1xi32>
    %c8_i32_143 = arith.constant 8 : i32
    %382 = vector.broadcast %c8_i32_143 : i32 to vector<128x1xi32>
    %383 = arith.cmpi slt, %381, %382 : vector<128x1xi32>
    %384 = arith.andi %379, %383 : vector<128x1xi1>
    %385 = arith.andi %375, %384 : vector<128x1xi1>
    %386 = arith.extui %385 : vector<128x1xi1> to vector<128x1xi32>
    %387 = arith.sitofp %386 : vector<128x1xi32> to vector<128x1xf32>
    %388 = vector.broadcast %387 : vector<128x1xf32> to vector<128x8xf32>
    %389 = arith.mulf %366, %388 : vector<128x8xf32>
    %390 = arith.truncf %389 : vector<128x8xf32> to vector<128x8xbf16>
    %c16_144 = arith.constant 16 : index
    %c0_145 = arith.constant 0 : index
    %391 = vector.load %arg6[%c16_144, %c0_145] : memref<72x128xbf16, #tpu.memory_space<vmem>>, vector<8x128xbf16>
    %cst_146 = arith.constant dense<0.000000e+00> : vector<128x128xf32>
    %392 = tpu.matmul %390, %391, %cst_146 {dimension_numbers = #tpu.dot_dimension_numbers<[1], [0], [0], [1], [0, 0, 1, 1], [], []>} : vector<128x8xbf16>, vector<8x128xbf16>, vector<128x128xf32> -> vector<128x128xf32>
    %393 = arith.addf %364, %392 : vector<128x128xf32>
    %c15_147 = arith.constant 15 : index
    %c0_148 = arith.constant 0 : index
    %394 = vector.load %arg9[%c15_147, %c0_148] : memref<160x128xf32, #tpu.memory_space<vmem>>, vector<128x128xf32>
    %395 = vector.extract_strided_slice %394 {offsets = [0, 0], sizes = [128, 8], strides = [1, 1]} : vector<128x128xf32> to vector<128x8xf32>
    %c-1_i32_149 = arith.constant -1 : i32
    %396 = vector.broadcast %c-1_i32_149 : i32 to vector<128x1xi32>
    %397 = arith.addi %311, %396 : vector<128x1xi32>
    %c0_i32_150 = arith.constant 0 : i32
    %398 = vector.broadcast %c0_i32_150 : i32 to vector<128x1xi32>
    %399 = arith.cmpi sge, %397, %398 : vector<128x1xi32>
    %c-1_i32_151 = arith.constant -1 : i32
    %400 = vector.broadcast %c-1_i32_151 : i32 to vector<128x1xi32>
    %401 = arith.addi %311, %400 : vector<128x1xi32>
    %c8_i32_152 = arith.constant 8 : i32
    %402 = vector.broadcast %c8_i32_152 : i32 to vector<128x1xi32>
    %403 = arith.cmpi slt, %401, %402 : vector<128x1xi32>
    %404 = arith.andi %399, %403 : vector<128x1xi1>
    %405 = arith.extui %404 : vector<128x1xi1> to vector<128x1xi32>
    %406 = arith.sitofp %405 : vector<128x1xi32> to vector<128x1xf32>
    %407 = vector.broadcast %406 : vector<128x1xf32> to vector<128x8xf32>
    %408 = arith.mulf %395, %407 : vector<128x8xf32>
    %409 = arith.truncf %408 : vector<128x8xf32> to vector<128x8xbf16>
    %c24_153 = arith.constant 24 : index
    %c0_154 = arith.constant 0 : index
    %410 = vector.load %arg6[%c24_153, %c0_154] : memref<72x128xbf16, #tpu.memory_space<vmem>>, vector<8x128xbf16>
    %cst_155 = arith.constant dense<0.000000e+00> : vector<128x128xf32>
    %411 = tpu.matmul %409, %410, %cst_155 {dimension_numbers = #tpu.dot_dimension_numbers<[1], [0], [0], [1], [0, 0, 1, 1], [], []>} : vector<128x8xbf16>, vector<8x128xbf16>, vector<128x128xf32> -> vector<128x128xf32>
    %412 = arith.addf %393, %411 : vector<128x128xf32>
    %c16_156 = arith.constant 16 : index
    %c0_157 = arith.constant 0 : index
    %413 = vector.load %arg9[%c16_156, %c0_157] : memref<160x128xf32, #tpu.memory_space<vmem>>, vector<128x128xf32>
    %414 = vector.extract_strided_slice %413 {offsets = [0, 0], sizes = [128, 8], strides = [1, 1]} : vector<128x128xf32> to vector<128x8xf32>
    %415 = arith.truncf %414 : vector<128x8xf32> to vector<128x8xbf16>
    %c32_158 = arith.constant 32 : index
    %c0_159 = arith.constant 0 : index
    %416 = vector.load %arg6[%c32_158, %c0_159] : memref<72x128xbf16, #tpu.memory_space<vmem>>, vector<8x128xbf16>
    %cst_160 = arith.constant dense<0.000000e+00> : vector<128x128xf32>
    %417 = tpu.matmul %415, %416, %cst_160 {dimension_numbers = #tpu.dot_dimension_numbers<[1], [0], [0], [1], [0, 0, 1, 1], [], []>} : vector<128x8xbf16>, vector<8x128xbf16>, vector<128x128xf32> -> vector<128x128xf32>
    %418 = arith.addf %412, %417 : vector<128x128xf32>
    %c17_161 = arith.constant 17 : index
    %c0_162 = arith.constant 0 : index
    %419 = vector.load %arg9[%c17_161, %c0_162] : memref<160x128xf32, #tpu.memory_space<vmem>>, vector<128x128xf32>
    %420 = vector.extract_strided_slice %419 {offsets = [0, 0], sizes = [128, 8], strides = [1, 1]} : vector<128x128xf32> to vector<128x8xf32>
    %c1_i32_163 = arith.constant 1 : i32
    %421 = vector.broadcast %c1_i32_163 : i32 to vector<128x1xi32>
    %422 = arith.addi %311, %421 : vector<128x1xi32>
    %c0_i32_164 = arith.constant 0 : i32
    %423 = vector.broadcast %c0_i32_164 : i32 to vector<128x1xi32>
    %424 = arith.cmpi sge, %422, %423 : vector<128x1xi32>
    %c1_i32_165 = arith.constant 1 : i32
    %425 = vector.broadcast %c1_i32_165 : i32 to vector<128x1xi32>
    %426 = arith.addi %311, %425 : vector<128x1xi32>
    %c8_i32_166 = arith.constant 8 : i32
    %427 = vector.broadcast %c8_i32_166 : i32 to vector<128x1xi32>
    %428 = arith.cmpi slt, %426, %427 : vector<128x1xi32>
    %429 = arith.andi %424, %428 : vector<128x1xi1>
    %430 = arith.extui %429 : vector<128x1xi1> to vector<128x1xi32>
    %431 = arith.sitofp %430 : vector<128x1xi32> to vector<128x1xf32>
    %432 = vector.broadcast %431 : vector<128x1xf32> to vector<128x8xf32>
    %433 = arith.mulf %420, %432 : vector<128x8xf32>
    %434 = arith.truncf %433 : vector<128x8xf32> to vector<128x8xbf16>
    %c40 = arith.constant 40 : index
    %c0_167 = arith.constant 0 : index
    %435 = vector.load %arg6[%c40, %c0_167] : memref<72x128xbf16, #tpu.memory_space<vmem>>, vector<8x128xbf16>
    %cst_168 = arith.constant dense<0.000000e+00> : vector<128x128xf32>
    %436 = tpu.matmul %434, %435, %cst_168 {dimension_numbers = #tpu.dot_dimension_numbers<[1], [0], [0], [1], [0, 0, 1, 1], [], []>} : vector<128x8xbf16>, vector<8x128xbf16>, vector<128x128xf32> -> vector<128x128xf32>
    %437 = arith.addf %418, %436 : vector<128x128xf32>
    %c23_169 = arith.constant 23 : index
    %c0_170 = arith.constant 0 : index
    %438 = vector.load %arg9[%c23_169, %c0_170] : memref<160x128xf32, #tpu.memory_space<vmem>>, vector<128x128xf32>
    %439 = vector.extract_strided_slice %438 {offsets = [0, 0], sizes = [128, 8], strides = [1, 1]} : vector<128x128xf32> to vector<128x8xf32>
    %c1_i32_171 = arith.constant 1 : i32
    %440 = vector.broadcast %c1_i32_171 : i32 to vector<128x1xi32>
    %441 = arith.addi %315, %440 : vector<128x1xi32>
    %c0_i32_172 = arith.constant 0 : i32
    %442 = vector.broadcast %c0_i32_172 : i32 to vector<128x1xi32>
    %443 = arith.cmpi sge, %441, %442 : vector<128x1xi32>
    %c1_i32_173 = arith.constant 1 : i32
    %444 = vector.broadcast %c1_i32_173 : i32 to vector<128x1xi32>
    %445 = arith.addi %315, %444 : vector<128x1xi32>
    %c8_i32_174 = arith.constant 8 : i32
    %446 = vector.broadcast %c8_i32_174 : i32 to vector<128x1xi32>
    %447 = arith.cmpi slt, %445, %446 : vector<128x1xi32>
    %448 = arith.andi %443, %447 : vector<128x1xi1>
    %c-1_i32_175 = arith.constant -1 : i32
    %449 = vector.broadcast %c-1_i32_175 : i32 to vector<128x1xi32>
    %450 = arith.addi %311, %449 : vector<128x1xi32>
    %c0_i32_176 = arith.constant 0 : i32
    %451 = vector.broadcast %c0_i32_176 : i32 to vector<128x1xi32>
    %452 = arith.cmpi sge, %450, %451 : vector<128x1xi32>
    %c-1_i32_177 = arith.constant -1 : i32
    %453 = vector.broadcast %c-1_i32_177 : i32 to vector<128x1xi32>
    %454 = arith.addi %311, %453 : vector<128x1xi32>
    %c8_i32_178 = arith.constant 8 : i32
    %455 = vector.broadcast %c8_i32_178 : i32 to vector<128x1xi32>
    %456 = arith.cmpi slt, %454, %455 : vector<128x1xi32>
    %457 = arith.andi %452, %456 : vector<128x1xi1>
    %458 = arith.andi %448, %457 : vector<128x1xi1>
    %459 = arith.extui %458 : vector<128x1xi1> to vector<128x1xi32>
    %460 = arith.sitofp %459 : vector<128x1xi32> to vector<128x1xf32>
    %461 = vector.broadcast %460 : vector<128x1xf32> to vector<128x8xf32>
    %462 = arith.mulf %439, %461 : vector<128x8xf32>
    %463 = arith.truncf %462 : vector<128x8xf32> to vector<128x8xbf16>
    %c48_179 = arith.constant 48 : index
    %c0_180 = arith.constant 0 : index
    %464 = vector.load %arg6[%c48_179, %c0_180] : memref<72x128xbf16, #tpu.memory_space<vmem>>, vector<8x128xbf16>
    %cst_181 = arith.constant dense<0.000000e+00> : vector<128x128xf32>
    %465 = tpu.matmul %463, %464, %cst_181 {dimension_numbers = #tpu.dot_dimension_numbers<[1], [0], [0], [1], [0, 0, 1, 1], [], []>} : vector<128x8xbf16>, vector<8x128xbf16>, vector<128x128xf32> -> vector<128x128xf32>
    %466 = arith.addf %437, %465 : vector<128x128xf32>
    %c24_182 = arith.constant 24 : index
    %c0_183 = arith.constant 0 : index
    %467 = vector.load %arg9[%c24_182, %c0_183] : memref<160x128xf32, #tpu.memory_space<vmem>>, vector<128x128xf32>
    %468 = vector.extract_strided_slice %467 {offsets = [0, 0], sizes = [128, 8], strides = [1, 1]} : vector<128x128xf32> to vector<128x8xf32>
    %c1_i32_184 = arith.constant 1 : i32
    %469 = vector.broadcast %c1_i32_184 : i32 to vector<128x1xi32>
    %470 = arith.addi %315, %469 : vector<128x1xi32>
    %c0_i32_185 = arith.constant 0 : i32
    %471 = vector.broadcast %c0_i32_185 : i32 to vector<128x1xi32>
    %472 = arith.cmpi sge, %470, %471 : vector<128x1xi32>
    %c1_i32_186 = arith.constant 1 : i32
    %473 = vector.broadcast %c1_i32_186 : i32 to vector<128x1xi32>
    %474 = arith.addi %315, %473 : vector<128x1xi32>
    %c8_i32_187 = arith.constant 8 : i32
    %475 = vector.broadcast %c8_i32_187 : i32 to vector<128x1xi32>
    %476 = arith.cmpi slt, %474, %475 : vector<128x1xi32>
    %477 = arith.andi %472, %476 : vector<128x1xi1>
    %478 = arith.extui %477 : vector<128x1xi1> to vector<128x1xi32>
    %479 = arith.sitofp %478 : vector<128x1xi32> to vector<128x1xf32>
    %480 = vector.broadcast %479 : vector<128x1xf32> to vector<128x8xf32>
    %481 = arith.mulf %468, %480 : vector<128x8xf32>
    %482 = arith.truncf %481 : vector<128x8xf32> to vector<128x8xbf16>
    %c56 = arith.constant 56 : index
    %c0_188 = arith.constant 0 : index
    %483 = vector.load %arg6[%c56, %c0_188] : memref<72x128xbf16, #tpu.memory_space<vmem>>, vector<8x128xbf16>
    %cst_189 = arith.constant dense<0.000000e+00> : vector<128x128xf32>
    %484 = tpu.matmul %482, %483, %cst_189 {dimension_numbers = #tpu.dot_dimension_numbers<[1], [0], [0], [1], [0, 0, 1, 1], [], []>} : vector<128x8xbf16>, vector<8x128xbf16>, vector<128x128xf32> -> vector<128x128xf32>
    %485 = arith.addf %466, %484 : vector<128x128xf32>
    %c25_190 = arith.constant 25 : index
    %c0_191 = arith.constant 0 : index
    %486 = vector.load %arg9[%c25_190, %c0_191] : memref<160x128xf32, #tpu.memory_space<vmem>>, vector<128x128xf32>
    %487 = vector.extract_strided_slice %486 {offsets = [0, 0], sizes = [128, 8], strides = [1, 1]} : vector<128x128xf32> to vector<128x8xf32>
    %c1_i32_192 = arith.constant 1 : i32
    %488 = vector.broadcast %c1_i32_192 : i32 to vector<128x1xi32>
    %489 = arith.addi %315, %488 : vector<128x1xi32>
    %c0_i32_193 = arith.constant 0 : i32
    %490 = vector.broadcast %c0_i32_193 : i32 to vector<128x1xi32>
    %491 = arith.cmpi sge, %489, %490 : vector<128x1xi32>
    %c1_i32_194 = arith.constant 1 : i32
    %492 = vector.broadcast %c1_i32_194 : i32 to vector<128x1xi32>
    %493 = arith.addi %315, %492 : vector<128x1xi32>
    %c8_i32_195 = arith.constant 8 : i32
    %494 = vector.broadcast %c8_i32_195 : i32 to vector<128x1xi32>
    %495 = arith.cmpi slt, %493, %494 : vector<128x1xi32>
    %496 = arith.andi %491, %495 : vector<128x1xi1>
    %c1_i32_196 = arith.constant 1 : i32
    %497 = vector.broadcast %c1_i32_196 : i32 to vector<128x1xi32>
    %498 = arith.addi %311, %497 : vector<128x1xi32>
    %c0_i32_197 = arith.constant 0 : i32
    %499 = vector.broadcast %c0_i32_197 : i32 to vector<128x1xi32>
    %500 = arith.cmpi sge, %498, %499 : vector<128x1xi32>
    %c1_i32_198 = arith.constant 1 : i32
    %501 = vector.broadcast %c1_i32_198 : i32 to vector<128x1xi32>
    %502 = arith.addi %311, %501 : vector<128x1xi32>
    %c8_i32_199 = arith.constant 8 : i32
    %503 = vector.broadcast %c8_i32_199 : i32 to vector<128x1xi32>
    %504 = arith.cmpi slt, %502, %503 : vector<128x1xi32>
    %505 = arith.andi %500, %504 : vector<128x1xi1>
    %506 = arith.andi %496, %505 : vector<128x1xi1>
    %507 = arith.extui %506 : vector<128x1xi1> to vector<128x1xi32>
    %508 = arith.sitofp %507 : vector<128x1xi32> to vector<128x1xf32>
    %509 = vector.broadcast %508 : vector<128x1xf32> to vector<128x8xf32>
    %510 = arith.mulf %487, %509 : vector<128x8xf32>
    %511 = arith.truncf %510 : vector<128x8xf32> to vector<128x8xbf16>
    %c64_200 = arith.constant 64 : index
    %c0_201 = arith.constant 0 : index
    %512 = vector.load %arg6[%c64_200, %c0_201] : memref<72x128xbf16, #tpu.memory_space<vmem>>, vector<8x128xbf16>
    %cst_202 = arith.constant dense<0.000000e+00> : vector<128x128xf32>
    %513 = tpu.matmul %511, %512, %cst_202 {dimension_numbers = #tpu.dot_dimension_numbers<[1], [0], [0], [1], [0, 0, 1, 1], [], []>} : vector<128x8xbf16>, vector<8x128xbf16>, vector<128x128xf32> -> vector<128x128xf32>
    %514 = arith.addf %485, %513 : vector<128x128xf32>
    %c0_203 = arith.constant 0 : index
    %c0_204 = arith.constant 0 : index
    %515 = vector.load %arg7[%c0_203, %c0_204] : memref<1x128xf32, #tpu.memory_space<vmem>>, vector<1x128xf32>
    %516 = vector.broadcast %515 : vector<1x128xf32> to vector<128x128xf32>
    %517 = arith.addf %514, %516 : vector<128x128xf32>
    %518 = math.tanh %517 : vector<128x128xf32>
    %c0_205 = arith.constant 0 : index
    %c0_206 = arith.constant 0 : index
    %519 = vector.load %arg8[%c0_205, %c0_206] : memref<128x128xf32, #tpu.memory_space<vmem>>, vector<128x128xf32>
    tpu.vector_store %arg8[%c0_205, %c0_206], %518 {strides = array<i32>} : memref<128x128xf32, #tpu.memory_space<vmem>>, vector<128x128xf32>,
    return
  }
}

</mosaic_0001>

<bundles_post_ra>
// kernel: tpu_custom_call.1
= control target key start
LH: loop header
LB: loop body
LE: loop exit
PB: predicated region body
PF: predicated region fallthrough
CT: control target
= control target key end

     0   :  { %13 = vsyncpa [#allocation4], 0  ;;  %s9426_s0 = inlined_call_operand.hbm [shape: f32[8,64], index: 0, kind: input, shape index: {}]   ;;  %s9427_s1 = inlined_call_operand.hbm [shape: bf16[64,640], index: 1, kind: input, shape index: {}]   ;;  %s9428_s2 = inlined_call_operand.hbm [shape: f32[1,640], index: 2, kind: input, shape index: {}]   ;;  %s9429_s3 = inlined_call_operand.hbm [shape: f32[64,128], index: 3, kind: input, shape index: {}]   ;;  %s9430_s4 = inlined_call_operand.hbm [shape: bf16[144,128], index: 4, kind: input, shape index: {}]   ;;  %s9431_s5 = inlined_call_operand.vmem [shape: f32[1,128], index: 5, kind: input, shape index: {}]   ;;  %s9432_s6 = inlined_call_operand.hbm [shape: bf16[72,128], index: 6, kind: input, shape index: {}]   ;;  %s9433_s7 = inlined_call_operand.vmem [shape: f32[1,128], index: 7, kind: input, shape index: {}]   ;;  %s9434_s8 = inlined_call_operand.hbm [shape: f32[128,128], index: 8, kind: output, shape index: {}]  }
   0x1   :  { %14 = vsyncpa [#allocation7], 0 }
   0x2   :  { %15 = vsyncpa [#allocation10], 0 }
   0x3   :  { %16 = vsyncpa [#allocation13], 0 }
   0x4   :  { %17 = vsyncpa [#allocation5], 0  ;;  %s5779_s27 = smov [#allocation6]  }
   0x5   :  { %s33_s28 = sshll.u32 %s5779_s27, 4  ;;  %s34_s28 = int_to_ptr.vmem [resolvable:$true] %s33_s28 }
   0x6   :  { %s5637_s29 = scalar_lea.vmem %s34_s28, 2560  ;;  %p5642_p1 = scmp.lt.s32.totalorder %s34_s28, %s34_s28 }
   0x7   :  { %p5638_p0 = scmp.ne.s32.totalorder %s34_s28, %s5637_s29  ;;  %p5643_p2 = scmp.lt.s32.totalorder %s5637_s29, %s5637_s29 }
   0x9   :  { %p5644_p3 = por %p5643_p2, %p5642_p1 }
   0xb   :  { %p5645_p4 = pnand %p5644_p3, %p5638_p0 }
   0xd   :  { %5648 = shalt.err (!%p5645_p4)
}
   0xe   :  { %s5780_s30 = smov 320   ;;  %s5781_s9 = smov 20  }
   0xf   :  { %39 = dma.hbm_to_vmem [thread:$0]  %s9427_s1, 2560, %s34_s28, [#allocation7], %s5780_s30, %s5780_s30, %s5781_s9  }
  0x10   :  { %s5782_s12 = smov [#allocation9]  }
  0x11   :  { %s55_s13 = sshll.u32 %s5782_s12, 4  ;;  %s56_s13 = int_to_ptr.vmem [resolvable:$true] %s55_s13 }
  0x12   :  { %s5657_s14 = scalar_lea.vmem %s56_s13, 1024  ;;  %p5662_p6 = scmp.lt.s32.totalorder %s56_s13, %s56_s13 }
  0x13   :  { %p5658_p5 = scmp.ne.s32.totalorder %s56_s13, %s5657_s14  ;;  %p5663_p7 = scmp.lt.s32.totalorder %s5657_s14, %s5657_s14 }
  0x15   :  { %p5664_p8 = por %p5663_p7, %p5662_p6 }
  0x17   :  { %p5665_p9 = pnand %p5664_p8, %p5658_p5 }
  0x19   :  { %5668 = shalt.err (!%p5665_p9)
}
  0x1a   :  { %s5783_s15 = smov 128   ;;  %s5784_s16 = smov 8  }
  0x1b   :  { %61 = dma.hbm_to_vmem [thread:$0]  %s9429_s3, 1024, %s56_s13, [#allocation10], %s5783_s15, %s5783_s15, %s5784_s16  }
  0x1c   :  { %s5785_s1 = smov [#allocation3]   ;;  %s5786_s20 = smov [#allocation8]  }
  0x1d   :  { %s24_s19 = sshll.u32 %s5785_s1, 4  ;;  %s46_s21 = sshll.u32 %s5786_s20, 4  ;;  %s25_s19 = int_to_ptr.vmem [resolvable:$true] %s24_s19  ;;  %s47_s21 = int_to_ptr.vmem [resolvable:$true] %s46_s21 }
  0x1e   :  { %s5677_s22 = scalar_lea.vmem %s25_s19, 128  ;;  %p5682_p11 = scmp.lt.s32.totalorder %s25_s19, %s25_s19 }
  0x1f   :  { %p5678_p10 = scmp.ne.s32.totalorder %s25_s19, %s5677_s22  ;;  %p5683_p12 = scmp.lt.s32.totalorder %s5677_s22, %s5677_s22 }
  0x21   :  { %p5684_p13 = por %p5683_p12, %p5682_p11 }
  0x23   :  { %p5685_p0 = pnand %p5684_p13, %p5678_p10 }
  0x25   :  { %5688 = shalt.err (!%p5685_p0)
}
  0x26   :  { %27 = dma.hbm_to_vmem [thread:$0]  %s9426_s0, 128, %s25_s19, [#allocation4]  }
  0x27   :  { %s5697_s25 = scalar_lea.vmem %s47_s21, 80  ;;  %s5701_s3 = scalar_lea.vmem %s47_s21, 96 }
  0x28   :  { %p5698_p1 = scmp.ne.s32.totalorder %s47_s21, %s5697_s25  ;;  %p5702_p2 = scmp.lt.s32.totalorder %s47_s21, %s47_s21 }
  0x29   :  { %p5703_p3 = scmp.lt.s32.totalorder %s5701_s3, %s5697_s25 }
  0x2b   :  { %p5704_p4 = por %p5703_p3, %p5702_p2 }
  0x2d   :  { %p5705_p5 = pnand %p5704_p4, %p5698_p1 }
  0x2f   :  { %5708 = shalt.err (!%p5705_p5)
}
  0x30   :  { %49 = dma.hbm_to_vmem [thread:$0]  %s9428_s2, 80, %s47_s21, [#allocation7]  }
  0x31   :  { %s5787_s28 = smov [#allocation11]  }
  0x32   :  { %s67_s29 = sshll.u32 %s5787_s28, 4  ;;  %s68_s29 = int_to_ptr.vmem [resolvable:$true] %s67_s29 }
  0x33   :  { %s5717_s30 = scalar_lea.vmem %s68_s29, 1152  ;;  %p5722_p7 = scmp.lt.s32.totalorder %s68_s29, %s68_s29 }
  0x34   :  { %p5718_p6 = scmp.ne.s32.totalorder %s68_s29, %s5717_s30  ;;  %p5723_p8 = scmp.lt.s32.totalorder %s5717_s30, %s5717_s30 }
  0x36   :  { %p5724_p9 = por %p5723_p8, %p5722_p7 }
  0x38   :  { %p5725_p10 = pnand %p5724_p9, %p5718_p6 }
  0x3a   :  { %5728 = shalt.err (!%p5725_p10)
}
  0x3b   :  { %s5788_s0 = smov 64   ;;  %s5789_s9 = smov 4  }
  0x3c   :  { %73 = dma.hbm_to_vmem [thread:$0]  %s9430_s4, 1152, %s68_s29, [#allocation10], %s5788_s0, %s5788_s0, %s5789_s9  }
  0x3d   :  { %s5790_s12 = smov [#allocation12]  }
  0x3e   :  { %s81_s13 = sshll.u32 %s5790_s12, 4  ;;  %s82_s13 = int_to_ptr.vmem [resolvable:$true] %s81_s13 }
  0x3f   :  { %s5737_s2 = scalar_lea.vmem %s82_s13, 576  ;;  %p5742_p12 = scmp.lt.s32.totalorder %s82_s13, %s82_s13 }
  0x40   :  { %p5738_p11 = scmp.ne.s32.totalorder %s82_s13, %s5737_s2  ;;  %p5743_p13 = scmp.lt.s32.totalorder %s5737_s2, %s5737_s2 }
  0x42   :  { %p5744_p0 = por %p5743_p13, %p5742_p12 }
  0x44   :  { %p5745_p1 = pnand %p5744_p0, %p5738_p11 }
  0x46   :  { %5748 = shalt.err (!%p5745_p1)
}
  0x47   :  { %87 = dma.hbm_to_vmem [thread:$0]  %s9432_s6, 576, %s82_s13, [#allocation13], %s5788_s0, %s5788_s0, %s5789_s9  }
  0x48   :  { %5769 = dma.done.wait [#allocation4], 128  }
  0x49   :  { %5770 = vsyncadd [#allocation4], 4294967168 }
  0x4a   :  { %5771 = dma.done.wait [#allocation7], 2640  }
  0x4b   :  { %5772 = vsyncadd [#allocation7], 4294964656 }
  0x4c   :  { %5773 = dma.done.wait [#allocation10], 2176  }
  0x4d   :  { %5774 = vsyncadd [#allocation10], 4294965120 }
  0x4e   :  { %5775 = dma.done.wait [#allocation13], 576  }
  0x4f   :  { %5776 = vsyncadd [#allocation13], 4294966720  ;;  %v5791_v0 = vmov 0   ;;  %v5553_v1 = vld [vmem:[#allocation6 + $0x7c] ss:$20 sps:$4 sm:$0xff]   ;;  %vm270_vm0 = vcmask 523264   ;;  %v141_v19 = vlaneseq }
  0x50   :  { %306 = vmatprep.mubr.bf16.mxu0 %v5791_v0  ;;  %347 = vmatprep.mubr.bf16.mxu1 %v5791_v0  ;;  %v5555_v2 = vld [vmem:[#allocation6 + $0x78] ss:$20 sps:$4 sm:$0xff]   ;;  %v5556_v3 = vld [vmem:[#allocation6 + $0x54] ss:$20 sps:$4 sm:$0xff]   ;;  %v5558_v4 = vld [vmem:[#allocation6 + $0x50] ss:$20 sps:$4 sm:$0xff]  }
  0x51   :  { %282 = vmatprep.subr.bf16.mxu0 %v5553_v1  ;;  %v5559_v5 = vld [vmem:[#allocation6 + $0x2c] ss:$20 sps:$4 sm:$0xff]   ;;  %v5561_v6 = vld [vmem:[#allocation6 + $0x28] ss:$20 sps:$4 sm:$0xff]   ;;  %v5565_v7 = vld [vmem:[#allocation6 + $0x84] ss:$20 sps:$4 sm:$0xff]  }
  0x52   :  { %283 = vmatpush1.bf16.msra.mxu0 %v5555_v2  ;;  %v5567_v8 = vld [vmem:[#allocation6 + $0x80] ss:$20 sps:$4 sm:$0xff]   ;;  %v5568_v9 = vld [vmem:[#allocation6 + $0x5c] ss:$20 sps:$4 sm:$0xff]   ;;  %v5562_v10 = vld [vmem:[#allocation6 + $0x4] ss:$20 sps:$4 sm:$0xff]   ;;  %323 = vmatprep.subr.bf16.mxu1 %v5565_v7 }
  0x53   :  { %284 = vmatprep.subr.bf16.mxu0 %v5556_v3  ;;  %v5564_v11 = vld [vmem:[#allocation6] ss:$20 sps:$4 sm:$0xff]   ;;  %324 = vmatpush1.bf16.msra.mxu1 %v5567_v8  ;;  %v5570_v12 = vld [vmem:[#allocation6 + $0x58] ss:$20 sps:$4 sm:$0xff]   ;;  %v5573_v15 = vld [vmem:[#allocation6 + $0x30] ss:$20 sps:$4 sm:$0xff]  }
  0x54   :  { %v113_v13 = vld [vmem:[#allocation3] sm:$0xff]  ;;  %325 = vmatprep.subr.bf16.mxu1 %v5568_v9  ;;  %v5571_v14 = vld [vmem:[#allocation6 + $0x34] ss:$20 sps:$4 sm:$0xff]   ;;  %v5574_v16 = vld [vmem:[#allocation6 + $0xc] ss:$20 sps:$4 sm:$0xff]   ;;  %v5867_v20 = vshrl.u32 %v141_v19, 7 }
  0x55   :  { %v5861_v17 = vpack.c.bf16 %v113_v13, %v113_v13  ;;  %v5576_v18 = vld [vmem:[#allocation6 + $0x8] ss:$20 sps:$4 sm:$0xff]   ;;  %v5872_v22 = vld [vmem:[#allocation8] sm:$0x1f]  ;;  %v9447_v25 = vmov 0.0   ;;  %v5884_v29 = vld [vmem:[#allocation9 + $0x8] sm:$0xff] }
  0x56   :  { %285 = vmatpush1.bf16.msra.mxu0 %v5558_v4  ;;  %9745 = vst [vmem:[#allocation20_spill] sm:$0xff] %v5867_v20  ;;  %v5870_v21 = vsub.s32 0, %v5867_v20  ;;  %v5577_v24 = vld [vmem:[#allocation6 + $0x88] ss:$20 sps:$4 sm:$0xff]   ;;  %109 = vst [vmem:[#allocation2] sm:$0xff] %v9447_v25  ;;  %v5901_v40 = vadd.s32 16, %v5867_v20 }
  0x57   :  { %286 = vmatprep.subr.bf16.mxu0 %v5559_v5  ;;  %326 = vmatpush1.bf16.msra.mxu1 %v5570_v12  ;;  %110 = vst [vmem:[#allocation2 + $0x8] sm:$0xff] %v9447_v25  ;;  %111 = vst [vmem:[#allocation2 + $0x90] sm:$0xff] %v9447_v25  ;;  %v5882_v28 = vld [vmem:[#allocation9] sm:$0xff]  ;;  %v5578_v31 = vld [vmem:[#allocation6 + $0x60] ss:$20 sps:$4 sm:$0xff]   ;;  %v5906_v43 = vadd.s32 24, %v5867_v20 }
  0x58   :  { %327 = vmatprep.subr.bf16.mxu1 %v5571_v14  ;;  %9746 = vst [vmem:[#allocation21_spill] sm:$0xff] %v5870_v21  ;;  %v144_v23 = vrot.slane %v5872_v22, %v5870_v21  ;;  %112 = vst [vmem:[#allocation2 + $0x98] sm:$0xff] %v9447_v25  ;;  %v5896_v36 = vld [vmem:[#allocation9 + $0x10] sm:$0xff]  ;;  %v399_v41 = vld [vmem:[#allocation9 + $0x18] sm:$0xff]  ;;  %v638_v51 = vshra.s32 %v5901_v40, 3  ;;  %vm5793_vm1 = vmmov 0  }
  0x59   :  { %v5579_v39 = vld [vmem:[#allocation6 + $0x38] ss:$20 sps:$4 sm:$0xff]   ;;  %v5580_v49 = vld [vmem:[#allocation6 + $0x10] ss:$20 sps:$4 sm:$0xff]   ;;  %v639_v56 = vshra.s32 %v5906_v43, 3  ;;  %v5930_v61 = vsub.s32 1, %v5867_v20 }
  0x5a   :  { %287 = vmatpush1.bf16.msra.mxu0 %v5561_v6  ;;  %v5581_v46 = vld [vmem:[#allocation11 + $0x8] sm:$0xff]   ;;  %v400_v47 = vld [vmem:[#allocation9 + $0x20] sm:$0xff]  ;;  %v402_v59 = vld [vmem:[#allocation9 + $0x30] sm:$0xff]  ;;  %v5927_v60 = vand.u32 7, %v638_v51  ;;  %v622_v7 = vand.u32 7, %v5901_v40  ;;  %v623_v8 = vand.u32 7, %v5906_v43 }
  0x5b   :  { %288 = vmatprep.subr.bf16.mxu0 %v5562_v10  ;;  %328 = vmatpush1.bf16.msra.mxu1 %v5573_v15  ;;  %v5914_v50 = vld [vmem:[#allocation11] sm:$0xff]   ;;  %v401_v54 = vld [vmem:[#allocation9 + $0x28] sm:$0xff]  ;;  %9749 = vst [vmem:[#allocation24_spill] sm:$0xff] %v5930_v61  ;;  %v403_v0 = vld [vmem:[#allocation9 + $0x38] sm:$0xff]  ;;  %v5938_v1 = vand.u32 7, %v639_v56 }
  0x5c   :  { %329 = vmatprep.subr.bf16.mxu1 %v5574_v16  ;;  %9748 = vst [vmem:[#allocation23_spill] sm:$0xff] %v5914_v50  ;;  %v2133_v2 = vadd.s32 1, %v5927_v60  ;;  %v5957_v12 = vadd.s32 4294967295, %v623_v8 }
  0x5d   :  { %v2134_v6 = vadd.s32 1, %v5938_v1 }
  0x5e   :  { %289 = vmatpush1.bf16.msra.mxu0 %v5564_v11  ;;  %v5953_v11 = vadd.s32 4294967295, %v622_v7  ;;  %9751 = vst [vmem:[#allocation26_spill] sm:$0xff] %v5957_v12  ;;  %vm2149_vm2 = vcmp.ge.s32.totalorder %v2133_v2, 0  ;;  %vm2165_vm3 = vcmp.lt.s32.totalorder %v2133_v2, 8  ;;  %vm9438_vm8 = vcmp.ge.s32.totalorder %v5957_v12, 0 }
  0x5f   :  { %330 = vmatpush1.bf16.msra.mxu1 %v5576_v18  ;;  %5190 = vmatprep.subr.bf16.mxu0 %v9447_v25  ;;  %vm2150_vm4 = vcmp.ge.s32.totalorder %v2134_v6, 0  ;;  %vm2166_vm5 = vcmp.lt.s32.totalorder %v2134_v6, 8  ;;  %vm5968_vm7 = vmand %vm2149_vm2, %vm2165_vm3  ;;  %v6035_v2 = vadd.s32 8, %v5867_v20  ;;  %v151_v6 = vsub.s32 2, %v5867_v20 }
  0x60   :  { %5202 = vmatprep.subr.bf16.mxu1 %v5581_v46  ;;  %9750 = vst [vmem:[#allocation25_spill] sm:$0xff] %v5953_v11  ;;  %vm9458_vm6 = vcmp.ge.s32.totalorder %v5953_v11, 0  ;;  %vm5977_vm9 = vmand %vm2150_vm4, %vm2166_vm5 }
  0x61   :  { %4737 = vmatmul.mubr.msk.bf16.vlgmr.msra.gmra.mxu0 %vm270_vm0, %v5861_v17  ;;  %vm5985_vm10 = vmand %vm5968_vm7, %vm9458_vm6  ;;  %9765 = vst [vmem:[#allocation32_spill] sm:$0xff] %v6035_v2 }
  0x62   :  { %4738 = vmatmul.mubr.msk.bf16.vlgmr.msra.gmra.mxu1 %vm270_vm0, %v5861_v17  ;;  %5191 = vmatpush3.bf16.msra.mxu0 %v5577_v24  ;;  %v9758_v24 = vmov 0  ;;  %vm5996_vm11 = vmand %vm5977_vm9, %vm9438_vm8 }
  0x63   :  { %5192 = vmatprep.subr.bf16.mxu0 %v9447_v25  ;;  %5198 = vmatprep.mubr.msk.bf16.mxu0 %vm5793_vm1, %v9447_v25  ;;  %v9759_v24 = vsel %vm5985_vm10, 4294967295, %v9758_v24 }
  0x64   :  { %5203 = vmatpush3.bf16.msra.mxu1 %v5581_v46  ;;  %9760 = vst [vmem:[#allocation29_spill] sm:$0xff] %v9759_v24  ;;  %v9810_v24 = vmov 0.0  }
  0x65   :  { %5526 = vmatprep.subr.bf16.mxu1 %v5914_v50 }
  0x66   :  { %5193 = vmatpush3.bf16.msra.mxu0 %v5578_v31 }
  0x67   :  { %5194 = vmatprep.subr.bf16.mxu0 %v9447_v25 }
  0x6a   :  { %5195 = vmatpush3.bf16.msra.mxu0 %v5579_v39 }
  0x6b   :  { %5196 = vmatprep.subr.bf16.mxu0 %v9447_v25 }
  0x6e   :  { %5197 = vmatpush3.bf16.msra.mxu0 %v5580_v49 }
  0x6f   :  { %5220 = vmatprep.subr.bf16.mxu0 %v5914_v50 }
  0x71   :  { %5199 = vmatmul.mubr.msk.bf16.vlgmr.msra.gmra.mxu0 %vm270_vm0, %v5861_v17  ;;  %v9752_v17 = vmov 0 }
  0x72   :  { %5221 = vmatpush3.bf16.msra.mxu0 %v5914_v50  ;;  %v9753_v17 = vsel %vm5968_vm7, 4294967295, %v9752_v17 }
  0x73   :  { %9754 = vst [vmem:[#allocation27_spill] sm:$0xff] %v9753_v17 }
 0x121   :  { %v308_v26 = vpop.f32.mrf.mxu0 }
 0x122   :  { %v309_v27 = vadd.f32 %v308_v26, %v144_v23  ;;  %v5898_v38 = vpop.f32.mrf.mxu1  ;;  %v9755_v23 = vmov 0 }
 0x123   :  { %v5886_v30 = vpop.f32.mrf.mxu0  ;;  %v9756_v23 = vsel %vm5977_vm9, 4294967295, %v9755_v23 }
 0x124   :  { %v407_v32 = vrot.slane %v309_v27, %v5870_v21  ;;  %v5903_v42 = vpop.f32.mrf.mxu1  ;;  %v419_v4 = vrot.slane %v309_v27, %v5930_v61  ;;  %9757 = vst [vmem:[#allocation28_spill] sm:$0xff] %v9756_v23 }
 0x125   :  { %v312_v33 = vpop.f32.mrf.mxu0  ;;  %9747 = vst [vmem:[#allocation22_spill] sm:$0xff] %v5903_v42 }
 0x126   :  { %v5890_v34 = vadd.f32 %v407_v32, %v5882_v28  ;;  %v5893_v35 = vadd.f32 %v407_v32, %v5884_v29  ;;  %v5909_v44 = vadd.f32 %v407_v32, %v5896_v36  ;;  %v353_v48 = vpop.f32.mrf.mxu1  ;;  %v5917_v52 = vadd.f32 %v407_v32, %v399_v41 }
 0x127   :  { %v313_v37 = vpop.f32.mrf.mxu0  ;;  %v5922_v57 = vadd.f32 %v407_v32, %v400_v47  ;;  %v5932_v62 = vadd.f32 %v407_v32, %v401_v54  ;;  %v5941_v3 = vadd.f32 %v407_v32, %v402_v59  ;;  %v5948_v9 = vadd.f32 %v407_v32, %v403_v0 }
 0x128   :  { %v428_v45 = vadd.f32 %v5893_v35, %v5890_v34  ;;  %v354_v55 = vpop.f32.mrf.mxu1  ;;  %v5960_v13 = vadd.f32 %v419_v4, %v5882_v28  ;;  %v5964_v15 = vadd.f32 %v419_v4, %v5884_v29  ;;  %v5974_v18 = vadd.f32 %v419_v4, %v5896_v36 }
 0x129   :  { %v5989_v26 = vadd.f32 %v419_v4, %v399_v41  ;;  %v9761_v28 = vmov 0  ;;  %v6000_v29 = vadd.f32 %v419_v4, %v400_v47  ;;  %v6003_v32 = vadd.f32 %v419_v4, %v401_v54 }
 0x12a   :  { %v429_v53 = vadd.f32 %v428_v45, %v5909_v44  ;;  %v9762_v28 = vsel %vm5996_vm11, 4294967295, %v9761_v28  ;;  %v6006_v36 = vadd.f32 %v419_v4, %v402_v59  ;;  %v6009_v39 = vadd.f32 %v419_v4, %v403_v0  ;;  %v6012_v45 = vld [vmem:[#allocation11 + $0x18] sm:$0xff]  }
 0x12b   :  { %9763 = vst [vmem:[#allocation30_spill] sm:$0xff] %v9762_v28  ;;  %9764 = vst [vmem:[#allocation31_spill] sm:$0xff] %v6012_v45  ;;  %5256 = vmatprep.subr.bf16.mxu0 %v6012_v45  ;;  %v6289_v28 = vadd.s32 80, %v5867_v20 }
 0x12c   :  { %v430_v58 = vadd.f32 %v429_v53, %v5917_v52 }
 0x12e   :  { %v431_v63 = vadd.f32 %v430_v58, %v5922_v57 }
 0x130   :  { %v432_v5 = vadd.f32 %v431_v63, %v5932_v62 }
 0x132   :  { %v433_v10 = vadd.f32 %v432_v5, %v5941_v3 }
 0x134   :  { %v434_v14 = vadd.f32 %v433_v10, %v5948_v9  ;;  %v637_v10 = vshra.s32 %v6035_v2, 3 }
 0x136   :  { %v435_v16 = vadd.f32 %v434_v14, %v5960_v13 }
 0x138   :  { %v436_v19 = vadd.f32 %v435_v16, %v5964_v15 }
 0x13a   :  { %v437_v27 = vadd.f32 %v436_v19, %v5974_v18 }
 0x13c   :  { %v438_v31 = vadd.f32 %v437_v27, %v5989_v26  ;;  %v6062_v27 = vadd.s32 40, %v5867_v20 }
 0x13e   :  { %v439_v33 = vadd.f32 %v438_v31, %v6000_v29  ;;  %9768 = vst [vmem:[#allocation35_spill] sm:$0xff] %v6062_v27  ;;  %v6065_v31 = vadd.s32 48, %v5867_v20  ;;  %v9813_v17 = vand.u32 7, %v6062_v27 }
 0x140   :  { %v440_v37 = vadd.f32 %v439_v33, %v6003_v32  ;;  %9769 = vst [vmem:[#allocation36_spill] sm:$0xff] %v6065_v31 }
 0x142   :  { %v441_v41 = vadd.f32 %v440_v37, %v6006_v36 }
 0x144   :  { %v442_v46 = vadd.f32 %v441_v41, %v6009_v39  ;;  %v148_v41 = vrot.slane %v5872_v22, %v5930_v61 }
 0x146   :  { %v443_v47 = vrot.slane %v442_v46, 4 }
 0x148   :  { %v444_v48 = vadd.f32 %v443_v47, %v442_v46  ;;  %v152_v46 = vrot.slane %v5872_v22, %v151_v6  ;;  %v6076_v47 = vand.u32 7, %v637_v10  ;;  %v6101_v6 = vadd.s32 1, %v622_v7 }
 0x14a   :  { %v445_v49 = vrot.slane %v444_v48, 2  ;;  %9770 = vst [vmem:[#allocation37_spill] sm:$0xff] %v6076_v47  ;;  %9772 = vst [vmem:[#allocation39_spill] sm:$0xff] %v6101_v6  ;;  %v685_v10 = vadd.s32 4294967295, %v6076_v47  ;;  %vm9436_vm14 = vcmp.lt.s32.totalorder %v6101_v6, 8  ;;  %v9818_v47 = vmov 0 }
 0x14b   :  { %vm6150_vm4 = vmand %vm5968_vm7, %vm9436_vm14 }
 0x14c   :  { %v446_v51 = vadd.f32 %v445_v49, %v444_v48  ;;  %v9440_v49 = vand.u32 7, %v5867_v20  ;;  %vm701_vm0 = vcmp.ge.s32.totalorder %v685_v10, 0  ;;  %vm717_vm1 = vcmp.lt.s32.totalorder %v685_v10, 8 }
 0x14e   :  { %v447_v53 = vrot.slane %v446_v51, 1 }
 0x150   :  { %v448_v54 = vadd.f32 %v447_v53, %v446_v51 }
 0x152   :  { %v6016_v55 = vmul.f32 0.0078125, %v448_v54  ;;  %v6087_v54 = vadd.s32 56, %v5867_v20 }
 0x154   :  { %v6020_v56 = vsub.f32 %v5890_v34, %v6016_v55  ;;  %v6024_v58 = vsub.f32 %v5893_v35, %v6016_v55  ;;  %v6028_v59 = vsub.f32 %v5909_v44, %v6016_v55  ;;  %v636_v34 = vshra.s32 %v5867_v20, 3  ;;  %9771 = vst [vmem:[#allocation38_spill] sm:$0xff] %v6087_v54 }
 0x155   :  { %v6040_v4 = vsub.f32 %v5917_v52, %v6016_v55  ;;  %v6044_v35 = vsub.f32 %v5922_v57, %v6016_v55  ;;  %v6054_v16 = vsub.f32 %v5932_v62, %v6016_v55  ;;  %v6059_v57 = vadd.s32 32, %v5867_v20 }
 0x156   :  { %v467_v63 = vmul.f32 %v6020_v56, %v6020_v56  ;;  %v468_v0 = vmul.f32 %v6024_v58, %v6024_v58  ;;  %v469_v44 = vmul.f32 %v6028_v59, %v6028_v59  ;;  %v6050_v14 = vand.u32 7, %v636_v34 }
 0x157   :  { %v470_v52 = vmul.f32 %v6040_v4, %v6040_v4  ;;  %9767 = vst [vmem:[#allocation34_spill] sm:$0xff] %v6059_v57  ;;  %v6069_v33 = vsub.f32 %v5941_v3, %v6016_v55  ;;  %v471_v62 = vmul.f32 %v6044_v35, %v6044_v35  ;;  %v6082_v51 = vsub.f32 %v5948_v9, %v6016_v55 }
 0x158   :  { %v483_v5 = vadd.f32 %v468_v0, %v467_v63  ;;  %9766 = vst [vmem:[#allocation33_spill] sm:$0xff] %v6050_v14  ;;  %v684_v48 = vadd.s32 4294967295, %v6050_v14  ;;  %v472_v3 = vmul.f32 %v6054_v16, %v6054_v16  ;;  %v9439_v63 = vand.u32 7, %v6035_v2 }
 0x159   :  { %v640_v22 = vshra.s32 %v6059_v57, 3  ;;  %v641_v0 = vshra.s32 %v6062_v27, 3  ;;  %v473_v9 = vmul.f32 %v6069_v33, %v6069_v33  ;;  %v474_v40 = vmul.f32 %v6082_v51, %v6082_v51 }
 0x15a   :  { %v484_v19 = vadd.f32 %v483_v5, %v469_v44  ;;  %v6095_v44 = vsub.f32 %v5960_v13, %v6016_v55  ;;  %vm700_vm12 = vcmp.ge.s32.totalorder %v684_v48, 0  ;;  %v6114_v13 = vsub.f32 %v5964_v15, %v6016_v55 }
 0x15b   :  { %vm716_vm13 = vcmp.lt.s32.totalorder %v684_v48, 8  ;;  %v6127_v43 = vsub.f32 %v5974_v18, %v6016_v55  ;;  %v6141_v18 = vsub.f32 %v5989_v26, %v6016_v55  ;;  %v9779_v48 = vmov 0 }
 0x15c   :  { %v485_v37 = vadd.f32 %v484_v19, %v470_v52  ;;  %v6106_v52 = vadd.s32 4294967295, %v9440_v49  ;;  %v6110_v19 = vadd.s32 1, %v623_v8  ;;  %v475_v8 = vmul.f32 %v6095_v44, %v6095_v44  ;;  %vm6133_vm2 = vmand %vm700_vm12, %vm716_vm13 }
 0x15d   :  { %v9780_v48 = vsel %vm6150_vm4, 4294967295, %v9779_v48  ;;  %v6235_v42 = vsub.f32 %v6009_v39, %v6016_v55  ;;  %v9799_v39 = vmov 0 }
 0x15e   :  { %v486_v53 = vadd.f32 %v485_v37, %v471_v62  ;;  %9773 = vst [vmem:[#allocation40_spill] sm:$0xff] %v6106_v52  ;;  %9774 = vst [vmem:[#allocation41_spill] sm:$0xff] %v6110_v19  ;;  %v311_v62 = vadd.f32 %v5886_v30, %v148_v41  ;;  %v350_v37 = vadd.f32 %v5898_v38, %v152_v46  ;;  %vm9435_vm15 = vcmp.lt.s32.totalorder %v6110_v19, 8 }
 0x15f   :  { %v9776_v30 = vmov 0  ;;  %vm9437_vm3 = vcmp.ge.s32.totalorder %v6106_v52, 0  ;;  %v686_v38 = vadd.s32 4294967295, %v5927_v60  ;;  %v476_v41 = vmul.f32 %v6114_v13, %v6114_v13  ;;  %9781 = vst [vmem:[#allocation44_spill] sm:$0xff] %v9780_v48  ;;  %vm6167_vm12 = vmand %vm5977_vm9, %vm9435_vm15 }
 0x160   :  { %v487_v5 = vadd.f32 %v486_v53, %v472_v3  ;;  %v6122_v3 = vadd.s32 4294967295, %v9439_v63  ;;  %v9777_v30 = vsel %vm6133_vm2, 4294967295, %v9776_v30  ;;  %v687_v53 = vadd.s32 4294967295, %v5938_v1  ;;  %vm812_vm13 = vmand %vm6133_vm2, %vm9437_vm3  ;;  %v668_v63 = vld [vmem:[#allocation2 + $0x7] sm:$0xff] }
 0x161   :  { %9778 = vst [vmem:[#allocation43_spill] sm:$0xff] %v9777_v30  ;;  %v6155_v60 = vrot.slane %v311_v62, %v5870_v21  ;;  %v6158_v26 = vrot.slane %v311_v62, %v5930_v61  ;;  %v9783_v1 = vmov 0  ;;  %v6184_v62 = vrot.slane %v350_v37, %v5870_v21  ;;  %vm6191_vm15 = vmand %vm701_vm0, %vm717_vm1 }
 0x162   :  { %v488_v7 = vadd.f32 %v487_v5, %v473_v9  ;;  %9775 = vst [vmem:[#allocation42_spill] sm:$0xff] %v6122_v3  ;;  %vm9449_vm5 = vcmp.ge.s32.totalorder %v6122_v3, 0  ;;  %v6161_v9 = vand.u32 7, %v640_v22  ;;  %v9784_v1 = vsel %vm6167_vm12, 4294967295, %v9783_v1 }
 0x163   :  { %9785 = vst [vmem:[#allocation46_spill] sm:$0xff] %v9784_v1  ;;  %v6173_v5 = vsub.f32 %v6000_v29, %v6016_v55  ;;  %v6181_v22 = vand.u32 7, %v641_v0  ;;  %v9787_v29 = vmov 0  ;;  %vm702_vm14 = vcmp.ge.s32.totalorder %v686_v38, 0  ;;  %vm813_vm0 = vmand %vm6191_vm15, %vm9449_vm5 }
 0x164   :  { %v489_v15 = vadd.f32 %v488_v7, %v474_v40  ;;  %9782 = vst [vmem:[#allocation45_spill] sm:$0xff] %v6161_v9  ;;  %v477_v40 = vmul.f32 %v6127_v43, %v6127_v43  ;;  %v9788_v29 = vsel %vm6191_vm15, 4294967295, %v9787_v29  ;;  %v6202_v0 = vsub.f32 %v6003_v32, %v6016_v55 }
 0x165   :  { %9786 = vst [vmem:[#allocation47_spill] sm:$0xff] %v6181_v22  ;;  %9789 = vst [vmem:[#allocation48_spill] sm:$0xff] %v9788_v29  ;;  %vm703_vm1 = vcmp.ge.s32.totalorder %v687_v53, 0  ;;  %v6211_v10 = vsel %vm812_vm13, 1.0, %v9447_v25  ;;  %vm718_vm3 = vcmp.lt.s32.totalorder %v686_v38, 8  ;;  %vm719_vm8 = vcmp.lt.s32.totalorder %v687_v53, 8 }
 0x166   :  { %v490_v46 = vadd.f32 %v489_v15, %v475_v8  ;;  %v6187_v8 = vrot.slane %v350_v37, %v5930_v61  ;;  %v6198_v15 = vsel %vm6133_vm2, 1.0, %v9447_v25  ;;  %v478_v37 = vmul.f32 %v6141_v18, %v6141_v18  ;;  %9791 = vst [vmem:[#allocation50_spill] sm:$0xff] %v6211_v10  ;;  %vm6241_vm13 = vmand %vm702_vm14, %vm718_vm3 }
 0x167   :  { %9790 = vst [vmem:[#allocation49_spill] sm:$0xff] %v6198_v15  ;;  %v6216_v32 = vsub.f32 %v6006_v36, %v6016_v55  ;;  %v689_v49 = vadd.s32 4294967295, %v6181_v22  ;;  %v6224_v34 = vsel %vm6191_vm15, 1.0, %v9447_v25  ;;  %v6227_v61 = vmul.f32 0.0, %v6198_v15  ;;  %vm6266_vm14 = vmand %vm6241_vm13, %vm9458_vm6 }
 0x168   :  { %v491_v7 = vadd.f32 %v490_v46, %v476_v41  ;;  %v688_v46 = vadd.s32 4294967295, %v6161_v9  ;;  %9792 = vst [vmem:[#allocation51_spill] sm:$0xff] %v6224_v34  ;;  %v6230_v21 = vsel %vm813_vm0, 1.0, %v9447_v25  ;;  %v643_v36 = vshra.s32 %v6087_v54, 3  ;;  %vm6251_vm0 = vmand %vm703_vm1, %vm719_vm8 }
 0x169   :  { %9793 = vst [vmem:[#allocation52_spill] sm:$0xff] %v6227_v61  ;;  %9794 = vst [vmem:[#allocation53_spill] sm:$0xff] %v6230_v21  ;;  %v9795_v1 = vmov 0  ;;  %v6247_v25 = vmul.f32 %v6211_v10, %v668_v63  ;;  %v9800_v39 = vsel %vm6251_vm0, 4294967295, %v9799_v39  ;;  %v9802_v38 = vshra.s32 %v6065_v31, 3 }
 0x16a   :  { %v492_v41 = vadd.f32 %v491_v7, %v477_v40  ;;  %v479_v40 = vmul.f32 %v6173_v5, %v6173_v5  ;;  %v9796_v1 = vsel %vm6241_vm13, 4294967295, %v9795_v1  ;;  %9801 = vst [vmem:[#allocation56_spill] sm:$0xff] %v9800_v39  ;;  %vm705_vm8 = vcmp.ge.s32.totalorder %v689_v49, 0 }
 0x16b   :  { %9797 = vst [vmem:[#allocation54_spill] sm:$0xff] %v9796_v1  ;;  %9798 = vst [vmem:[#allocation55_spill] sm:$0xff] %v6247_v25  ;;  %vm720_vm3 = vcmp.lt.s32.totalorder %v688_v46, 8  ;;  %vm9806_vm1 = vcmp.ge.s32.totalorder %v5957_v12, 0  ;;  %vm721_vm12 = vcmp.lt.s32.totalorder %v689_v49, 8  ;;  %v6274_v53 = vand.u32 7, %v643_v36 }
 0x16c   :  { %v493_v7 = vadd.f32 %v492_v41, %v478_v37  ;;  %v480_v37 = vmul.f32 %v6202_v0, %v6202_v0  ;;  %vm815_vm5 = vmand %vm6251_vm0, %vm9806_vm1  ;;  %v9808_v10 = vand.u32 7, %v6059_v57  ;;  %v6294_v36 = vsel %vm6241_vm13, 1.0, %v9810_v24 }
 0x16d   :  { %9807 = vst [vmem:[#allocation58_spill] sm:$0xff] %v6274_v53  ;;  %9811 = vst [vmem:[#allocation60_spill] sm:$0xff] %v6294_v36  ;;  %v6299_v23 = vsel %vm6251_vm0, 1.0, %v9810_v24  ;;  %v6311_v22 = vsel %vm6266_vm14, 1.0, %v9810_v24  ;;  %v6314_v9 = vsel %vm815_vm5, 1.0, %v9810_v24  ;;  %vm9817_vm1 = vcmp.ge.s32.totalorder %v688_v46, 0 }
 0x16e   :  { %v494_v41 = vadd.f32 %v493_v7, %v479_v40  ;;  %v6258_v40 = vand.u32 7, %v9802_v38  ;;  %v481_v7 = vmul.f32 %v6216_v32, %v6216_v32  ;;  %v482_v38 = vmul.f32 %v6235_v42, %v6235_v42  ;;  %9812 = vst [vmem:[#allocation61_spill] sm:$0xff] %v6299_v23  ;;  %9815 = vst [vmem:[#allocation63_spill] sm:$0xff] %v6311_v22 }
 0x16f   :  { %v6286_v48 = vadd.s32 4294967295, %v9808_v10  ;;  %v6306_v10 = vadd.s32 88, %v5867_v20  ;;  %9816 = vst [vmem:[#allocation64_spill] sm:$0xff] %v6314_v9  ;;  %vm6318_vm6 = vmand %vm9817_vm1, %vm720_vm3  ;;  %v691_v63 = vadd.s32 4294967295, %v6274_v53  ;;  %v646_v19 = vshra.s32 %v6289_v28, 3 }
 0x170   :  { %9803 = vst [vmem:[#allocation57_spill] sm:$0xff] %v6258_v40  ;;  %v495_v15 = vadd.f32 %v494_v41, %v480_v37  ;;  %v6277_v37 = vadd.s32 64, %v5867_v20  ;;  %v6280_v41 = vadd.s32 72, %v5867_v20  ;;  %v9819_v47 = vsel %vm6318_vm6, 4294967295, %v9818_v47  ;;  %vm6325_vm4 = vmand %vm705_vm8, %vm721_vm12 }
 0x171   :  { %9809 = vst [vmem:[#allocation59_spill] sm:$0xff] %v6286_v48  ;;  %9820 = vst [vmem:[#allocation65_spill] sm:$0xff] %v9819_v47  ;;  %vm9473_vm5 = vcmp.ge.s32.totalorder %v6286_v48, 0  ;;  %v6341_v49 = vsel %vm6318_vm6, 1.0, %v9810_v24  ;;  %v647_v53 = vshra.s32 %v6306_v10, 3  ;;  %v6349_v6 = vsel %vm6325_vm4, 1.0, %v9810_v24 }
 0x172   :  { %v496_v55 = vadd.f32 %v495_v15, %v481_v7  ;;  %v6303_v15 = vadd.s32 4294967295, %v9813_v17  ;;  %v690_v17 = vadd.s32 4294967295, %v6258_v40  ;;  %v644_v14 = vshra.s32 %v6277_v37, 3  ;;  %9824 = vst [vmem:[#allocation67_spill] sm:$0xff] %v6341_v49  ;;  %9825 = vst [vmem:[#allocation68_spill] sm:$0xff] %v6349_v6 }
 0x173   :  { %v645_v46 = vshra.s32 %v6280_v41, 3  ;;  %v6336_v40 = vadd.s32 96, %v5867_v20  ;;  %vm6355_vm3 = vmand %vm6318_vm6, %vm9473_vm5  ;;  %vm707_vm1 = vcmp.ge.s32.totalorder %v691_v63, 0  ;;  %vm723_vm12 = vcmp.lt.s32.totalorder %v691_v63, 8 }
 0x174   :  { %9814 = vst [vmem:[#allocation62_spill] sm:$0xff] %v6303_v15  ;;  %v497_v7 = vadd.f32 %v496_v55, %v482_v38  ;;  %v9821_v55 = vmov 0  ;;  %vm706_vm14 = vcmp.ge.s32.totalorder %v690_v17, 0  ;;  %vm722_vm8 = vcmp.lt.s32.totalorder %v690_v17, 8 }
 0x175   :  { %v9822_v55 = vsel %vm6325_vm4, 4294967295, %v9821_v55  ;;  %v6359_v38 = vand.u32 7, %v644_v14  ;;  %vm9828_vm11 = vcmp.ge.s32.totalorder %v6303_v15, 0  ;;  %v9829_v17 = vand.u32 7, %v6065_v31  ;;  %vm6374_vm5 = vmand %vm706_vm14, %vm722_vm8 }
 0x176   :  { %9823 = vst [vmem:[#allocation66_spill] sm:$0xff] %v9822_v55  ;;  %v498_v39 = vrot.slane %v497_v7, 4  ;;  %vm817_vm10 = vmand %vm6325_vm4, %vm9828_vm11  ;;  %v6371_v47 = vand.u32 7, %v646_v19  ;;  %v648_v29 = vshra.s32 %v6336_v40, 3  ;;  %v9830_v30 = vmov 0 }
 0x177   :  { %v6369_v57 = vadd.s32 4294967295, %v9829_v17  ;;  %v9831_v30 = vsel %vm6374_vm5, 4294967295, %v9830_v30  ;;  %v9832_v14 = vand.u32 7, %v6087_v54  ;;  %v6383_v55 = vand.u32 7, %v647_v53  ;;  %vm6395_vm11 = vmand %vm707_vm1, %vm723_vm12 }
 0x178   :  { %v499_v1 = vadd.f32 %v498_v39, %v497_v7  ;;  %v6361_v39 = vand.u32 7, %v645_v46  ;;  %v6386_v31 = vadd.s32 104, %v5867_v20  ;;  %v6391_v19 = vsel %vm6355_vm3, 1.0, %v9810_v24 }
 0x179   :  { %v6380_v46 = vadd.s32 4294967295, %v9832_v14  ;;  %9834 = vst [vmem:[#allocation70_spill] sm:$0xff] %v6391_v19  ;;  %v9835_v48 = vmov 0  ;;  %v6401_v53 = vadd.s32 112, %v5867_v20  ;;  %v6404_v15 = vsel %vm817_vm10, 1.0, %v9810_v24 }
 0x17a   :  { %v500_v7 = vrot.slane %v499_v1, 2  ;;  %v9836_v48 = vsel %vm6395_vm11, 4294967295, %v9835_v48  ;;  %9838 = vst [vmem:[#allocation72_spill] sm:$0xff] %v6404_v15  ;;  %v693_v27 = vadd.s32 4294967295, %v6361_v39  ;;  %v6414_v54 = vsel %vm6374_vm5, 1.0, %v9810_v24 }
 0x17b   :  { %9833 = vst [vmem:[#allocation69_spill] sm:$0xff] %v6380_v46  ;;  %9837 = vst [vmem:[#allocation71_spill] sm:$0xff] %v9836_v48  ;;  %v694_v14 = vadd.s32 4294967295, %v6371_v47  ;;  %v664_v12 = vand.u32 7, %v648_v29  ;;  %v6420_v11 = vsel %vm6395_vm11, 1.0, %v9810_v24  ;;  %v9841_v2 = vand.u32 7, %v6277_v37 }
 0x17c   :  { %v501_v17 = vadd.f32 %v500_v7, %v499_v1  ;;  %v692_v1 = vadd.s32 4294967295, %v6359_v38  ;;  %v6409_v7 = vadd.s32 120, %v5867_v20  ;;  %9839 = vst [vmem:[#allocation73_spill] sm:$0xff] %v6414_v54  ;;  %9840 = vst [vmem:[#allocation74_spill] sm:$0xff] %v6420_v11  ;;  %v695_v20 = vadd.s32 4294967295, %v6383_v55 }
 0x17d   :  { %v6424_v3 = vadd.s32 4294967295, %v9841_v2  ;;  %v649_v52 = vshra.s32 %v6386_v31, 3  ;;  %v9843_v50 = vand.u32 7, %v6280_v41  ;;  %v630_v29 = vand.u32 7, %v6289_v28 }
 0x17e   :  { %v502_v63 = vrot.slane %v501_v17, 1  ;;  %v650_v15 = vshra.s32 %v6401_v53, 3  ;;  %vm708_vm10 = vcmp.ge.s32.totalorder %v692_v1, 0  ;;  %vm709_vm12 = vcmp.ge.s32.totalorder %v693_v27, 0 }
 0x17f   :  { %9842 = vst [vmem:[#allocation75_spill] sm:$0xff] %v6424_v3  ;;  %v6430_v25 = vadd.s32 4294967295, %v9843_v50  ;;  %vm724_vm14 = vcmp.lt.s32.totalorder %v692_v1, 8  ;;  %v651_v19 = vshra.s32 %v6409_v7, 3  ;;  %vm725_vm8 = vcmp.lt.s32.totalorder %v693_v27, 8 }
 0x180   :  { %v503_v45 = vadd.f32 %v502_v63, %v501_v17  ;;  %vm710_vm3 = vcmp.ge.s32.totalorder %v694_v14, 0  ;;  %v696_v9 = vadd.s32 4294967295, %v664_v12  ;;  %vm726_vm9 = vcmp.lt.s32.totalorder %v694_v14, 8  ;;  %vm6435_vm4 = vmand %vm708_vm10, %vm724_vm14 }
 0x181   :  { %9844 = vst [vmem:[#allocation76_spill] sm:$0xff] %v6430_v25  ;;  %v665_v17 = vand.u32 7, %v649_v52  ;;  %v9845_v50 = vmov 0  ;;  %v666_v28 = vand.u32 7, %v650_v15  ;;  %v632_v22 = vand.u32 7, %v6336_v40  ;;  %vm6444_vm1 = vmand %vm709_vm12, %vm725_vm8 }
 0x182   :  { %v504_v2 = vmul.f32 0.0078125, %v503_v45  ;;  %v9846_v50 = vsel %vm6435_vm4, 4294967295, %v9845_v50  ;;  %v2143_v21 = vadd.s32 1, %v664_v12  ;;  %v634_v1 = vand.u32 7, %v6401_v53  ;;  %vm6455_vm7 = vmand %vm710_vm3, %vm726_vm9 }
 0x183   :  { %9847 = vst [vmem:[#allocation77_spill] sm:$0xff] %v9846_v50  ;;  %v667_v61 = vand.u32 7, %v651_v19  ;;  %v633_v45 = vand.u32 7, %v6386_v31  ;;  %v2144_v48 = vadd.s32 1, %v665_v17  ;;  %v9848_v52 = vmov 0 }
 0x184   :  { %v505_v63 = vadd.f32 1e-05, %v504_v2  ;;  %v9849_v52 = vsel %vm6444_vm1, 4294967295, %v9848_v52  ;;  %vm712_vm10 = vcmp.ge.s32.totalorder %v696_v9, 0  ;;  %vm728_vm14 = vcmp.lt.s32.totalorder %v696_v9, 8 }
 0x185   :  { %9850 = vst [vmem:[#allocation78_spill] sm:$0xff] %v9849_v52  ;;  %v2145_v2 = vadd.s32 1, %v666_v28  ;;  %v6451_v12 = vsel %vm6435_vm4, 1.0, %v9810_v24  ;;  %v9852_v31 = vmov 0  ;;  %v635_v15 = vand.u32 7, %v6409_v7  ;;  %vm6476_vm3 = vmand %vm712_vm10, %vm728_vm14 }
 0x186   :  { %5590 = vrsqrt.f32 %v505_v63  ;;  %9851 = vst [vmem:[#allocation79_spill] sm:$0xff] %v6451_v12  ;;  %v9853_v31 = vsel %vm6455_vm7, 4294967295, %v9852_v31  ;;  %v2146_v19 = vadd.s32 1, %v667_v61  ;;  %vm9855_vm12 = vcmp.lt.s32.totalorder %v695_v20, 8 }
 0x187   :  { %9854 = vst [vmem:[#allocation80_spill] sm:$0xff] %v9853_v31  ;;  %vm9856_vm8 = vcmp.ge.s32.totalorder %v695_v20, 0  ;;  %v9857_v9 = vmov 0  ;;  %v6467_v53 = vadd.s32 4294967295, %v630_v29  ;;  %v6469_v27 = vadd.s32 4294967295, %v632_v22 }
 0x188   :  { %vm6463_vm6 = vmand %vm9856_vm8, %vm9855_vm12  ;;  %vm2159_vm0 = vcmp.ge.s32.totalorder %v2143_v21, 0  ;;  %vm2175_vm9 = vcmp.lt.s32.totalorder %v2143_v21, 8  ;;  %v6474_v14 = vsel %vm6444_vm1, 1.0, %v9810_v24  ;;  %v9862_v7 = vmov 0 }
 0x189   :  { %v9858_v9 = vsel %vm6463_vm6, 4294967295, %v9857_v9  ;;  %9860 = vst [vmem:[#allocation82_spill] sm:$0xff] %v6467_v53  ;;  %9861 = vst [vmem:[#allocation83_spill] sm:$0xff] %v6474_v14  ;;  %v9863_v7 = vsel %vm6476_vm3, 4294967295, %v9862_v7  ;;  %v6480_v20 = vadd.s32 4294967295, %v633_v45  ;;  %vm2176_vm8 = vcmp.lt.s32.totalorder %v2144_v48, 8 }
 0x18a   :  { %9859 = vst [vmem:[#allocation81_spill] sm:$0xff] %v9858_v9  ;;  %9864 = vst [vmem:[#allocation84_spill] sm:$0xff] %v9863_v7  ;;  %v6485_v63 = vsel %vm6455_vm7, 1.0, %v9810_v24  ;;  %v6487_v40 = vadd.s32 4294967295, %v634_v1  ;;  %v6492_v21 = vsel %vm6463_vm6, 1.0, %v9810_v24  ;;  %v6494_v53 = vadd.s32 4294967295, %v635_v15 }
 0x18b   :  { %9865 = vst [vmem:[#allocation85_spill] sm:$0xff] %v6485_v63  ;;  %9867 = vst [vmem:[#allocation87_spill] sm:$0xff] %v6492_v21  ;;  %v9869_v52 = vmov 0  ;;  %v6500_v31 = vadd.s32 4294967295, %v665_v17  ;;  %v6505_v63 = vsel %vm6476_vm3, 1.0, %v9810_v24  ;;  %v9873_v9 = vand.u32 7, %v6277_v37 }
 0x18c   :  { %9866 = vst [vmem:[#allocation86_spill] sm:$0xff] %v6487_v40  ;;  %9868 = vst [vmem:[#allocation88_spill] sm:$0xff] %v6494_v53  ;;  %vm9874_vm15 = vcmp.ge.s32.totalorder %v2144_v48, 0  ;;  %v9875_v50 = vmov 0  ;;  %v9878_v17 = vand.u32 7, %v6280_v41  ;;  %v6522_v7 = vadd.s32 1, %v630_v29 }
 0x18d   :  { %vm6496_vm10 = vmand %vm2159_vm0, %vm2175_vm9  ;;  %9872 = vst [vmem:[#allocation90_spill] sm:$0xff] %v6505_v63  ;;  %v6510_v21 = vadd.s32 1, %v9873_v9  ;;  %v9879_v63 = vand.u32 7, %v6306_v10  ;;  %vm9880_vm13 = vcmp.lt.s32.totalorder %v2145_v2, 8  ;;  %vm9881_vm14 = vcmp.ge.s32.totalorder %v2145_v2, 0 }
 0x18e   :  { %v9870_v52 = vsel %vm6496_vm10, 4294967295, %v9869_v52  ;;  %vm6513_vm0 = vmand %vm9874_vm15, %vm2176_vm8  ;;  %v6520_v14 = vadd.s32 1, %v9878_v17  ;;  %v9882_v48 = vmov 0  ;;  %v6535_v37 = vadd.s32 1, %v632_v22 }
 0x18f   :  { %9871 = vst [vmem:[#allocation89_spill] sm:$0xff] %v9870_v52  ;;  %v9876_v50 = vsel %vm6513_vm0, 4294967295, %v9875_v50  ;;  %v6526_v24 = vadd.s32 1, %v9879_v63  ;;  %vm6530_vm12 = vmand %vm9881_vm14, %vm9880_vm13  ;;  %v2139_v41 = vadd.s32 1, %v6359_v38  ;;  %v2140_v9 = vadd.s32 1, %v6361_v39  ;;  %v10054_v52 = vld [vmem:[#allocation62_spill] sm:$0xff] }
 0x190   :  { %9877 = vst [vmem:[#allocation91_spill] sm:$0xff] %v9876_v50  ;;  %v9883_v48 = vsel %vm6530_vm12, 4294967295, %v9882_v48  ;;  %vm9885_vm8 = vcmp.lt.s32.totalorder %v2146_v19, 8  ;;  %vm9886_vm9 = vcmp.ge.s32.totalorder %v2146_v19, 0  ;;  %v9887_v29 = vmov 0 }
 0x191   :  { %9884 = vst [vmem:[#allocation92_spill] sm:$0xff] %v9883_v48  ;;  %vm6541_vm2 = vmand %vm9886_vm9, %vm9885_vm8  ;;  %v6546_v2 = vadd.s32 1, %v633_v45  ;;  %v2141_v63 = vadd.s32 1, %v6371_v47  ;;  %v2142_v17 = vadd.s32 1, %v6383_v55  ;;  %vm9890_vm13 = vcmp.ge.s32.totalorder %v6469_v27, 0 }
 0x192   :  { %v9888_v29 = vsel %vm6541_vm2, 4294967295, %v9887_v29  ;;  %vm6554_vm14 = vmand %vm6496_vm10, %vm9890_vm13  ;;  %v9891_v22 = vmov 0  ;;  %v6558_v38 = vadd.s32 4294967295, %v666_v28  ;;  %v6560_v39 = vadd.s32 4294967295, %v667_v61 }
 0x193   :  { %9889 = vst [vmem:[#allocation93_spill] sm:$0xff] %v9888_v29  ;;  %v9892_v22 = vsel %vm6554_vm14, 4294967295, %v9891_v22  ;;  %v6563_v45 = vadd.s32 1, %v634_v1  ;;  %vm9894_vm8 = vcmp.ge.s32.totalorder %v6480_v20, 0  ;;  %v9895_v47 = vmov 0  ;;  %v5591_v1 = vpop.eup %5590 }
 0x194   :  { %9893 = vst [vmem:[#allocation94_spill] sm:$0xff] %v9892_v22  ;;  %vm6569_vm3 = vmand %vm6513_vm0, %vm9894_vm8  ;;  %v6576_v61 = vadd.s32 1, %v635_v15  ;;  %vm9898_vm9 = vcmp.ge.s32.totalorder %v6487_v40, 0  ;;  %v9899_v55 = vmov 0  ;;  %vm2155_vm7 = vcmp.ge.s32.totalorder %v2139_v41, 0 }
 0x195   :  { %v9896_v47 = vsel %vm6569_vm3, 4294967295, %v9895_v47  ;;  %vm6582_vm6 = vmand %vm6530_vm12, %vm9898_vm9  ;;  %vm2156_vm3 = vcmp.ge.s32.totalorder %v2140_v9, 0  ;;  %vm2171_vm1 = vcmp.lt.s32.totalorder %v2139_v41, 8  ;;  %vm2172_vm13 = vcmp.lt.s32.totalorder %v2140_v9, 8 }
 0x196   :  { %9897 = vst [vmem:[#allocation95_spill] sm:$0xff] %v9896_v47  ;;  %v9900_v55 = vsel %vm6582_vm6, 4294967295, %v9899_v55  ;;  %vm9902_vm15 = vcmp.ge.s32.totalorder %v6494_v53, 0  ;;  %v9903_v28 = vmov 0  ;;  %vm2157_vm4 = vcmp.ge.s32.totalorder %v2141_v63, 0  ;;  %vm6608_vm8 = vmand %vm2155_vm7, %vm2171_vm1 }
 0x197   :  { %9901 = vst [vmem:[#allocation96_spill] sm:$0xff] %v9900_v55  ;;  %vm6591_vm14 = vmand %vm6541_vm2, %vm9902_vm15  ;;  %vm2158_vm11 = vcmp.ge.s32.totalorder %v2142_v17, 0  ;;  %vm2173_vm6 = vcmp.lt.s32.totalorder %v2141_v63, 8  ;;  %vm2174_vm5 = vcmp.lt.s32.totalorder %v2142_v17, 8  ;;  %v507_v15 = vmul.f32 %v5591_v1, %v6020_v56 }
 0x198   :  { %v9904_v28 = vsel %vm6591_vm14, 4294967295, %v9903_v28  ;;  %v508_v19 = vmul.f32 %v5591_v1, %v6024_v58  ;;  %v509_v55 = vmul.f32 %v5591_v1, %v6028_v59  ;;  %v510_v47 = vmul.f32 %v5591_v1, %v6040_v4  ;;  %vm6618_vm15 = vmand %vm2156_vm3, %vm2172_vm13 }
 0x199   :  { %9905 = vst [vmem:[#allocation97_spill] sm:$0xff] %v9904_v28  ;;  %v511_v22 = vmul.f32 %v5591_v1, %v6044_v35  ;;  %v512_v28 = vmul.f32 %v5591_v1, %v6054_v16  ;;  %v513_v53 = vmul.f32 %v5591_v1, %v6069_v33  ;;  %v514_v40 = vmul.f32 %v5591_v1, %v6082_v51  ;;  %vm6628_vm7 = vmand %vm2157_vm4, %vm2173_vm6 }
 0x19a   :  { %v9906_v56 = vmov 0  ;;  %v515_v58 = vmul.f32 %v5591_v1, %v6095_v44  ;;  %v516_v59 = vmul.f32 %v5591_v1, %v6114_v13  ;;  %v517_v4 = vmul.f32 %v5591_v1, %v6127_v43  ;;  %vm6639_vm3 = vmand %vm2158_vm11, %vm2174_vm5 }
 0x19b   :  { %v9907_v56 = vsel %vm6608_vm8, 4294967295, %v9906_v56  ;;  %v518_v35 = vmul.f32 %v5591_v1, %v6141_v18  ;;  %v9909_v16 = vmov 0  ;;  %v519_v33 = vmul.f32 %v5591_v1, %v6173_v5 }
 0x19c   :  { %9908 = vst [vmem:[#allocation98_spill] sm:$0xff] %v9907_v56  ;;  %v9910_v16 = vsel %vm6618_vm15, 4294967295, %v9909_v16  ;;  %v520_v51 = vmul.f32 %v5591_v1, %v6202_v0  ;;  %v521_v41 = vmul.f32 %v5591_v1, %v6216_v32  ;;  %v522_v44 = vmul.f32 %v5591_v1, %v6235_v42  ;;  %v10071_v56 = vld [vmem:[#allocation35_spill] sm:$0xff] }
 0x19d   :  { %9911 = vst [vmem:[#allocation99_spill] sm:$0xff] %v9910_v16  ;;  %v9912_v13 = vmov 0  ;;  %v527_v43 = vmul.f32 %v6155_v60, %v507_v15  ;;  %v528_v18 = vmul.f32 %v6155_v60, %v508_v19  ;;  %v529_v9 = vmul.f32 %v6155_v60, %v509_v55 }
 0x19e   :  { %v9913_v13 = vsel %vm6628_vm7, 4294967295, %v9912_v13  ;;  %v530_v5 = vmul.f32 %v6155_v60, %v510_v47  ;;  %v9915_v42 = vmov 0  ;;  %v531_v0 = vmul.f32 %v6155_v60, %v511_v22 }
 0x19f   :  { %9914 = vst [vmem:[#allocation100_spill] sm:$0xff] %v9913_v13  ;;  %v9916_v42 = vsel %vm6639_vm3, 4294967295, %v9915_v42  ;;  %v532_v32 = vmul.f32 %v6155_v60, %v512_v28  ;;  %v533_v63 = vmul.f32 %v6155_v60, %v513_v53  ;;  %v534_v1 = vmul.f32 %v6155_v60, %v514_v40  ;;  %v10068_v13 = vld [vmem:[#allocation34_spill] sm:$0xff] }
 0x1a0   :  { %9917 = vst [vmem:[#allocation101_spill] sm:$0xff] %v9916_v42  ;;  %vm9918_vm13 = vcmp.lt.s32.totalorder %v6510_v21, 8  ;;  %v9919_v17 = vmov 0  ;;  %v559_v22 = vmul.f32 %v6158_v26, %v515_v58  ;;  %v560_v47 = vmul.f32 %v6158_v26, %v516_v59 }
 0x1a1   :  { %vm6653_vm5 = vmand %vm6608_vm8, %vm9918_vm13  ;;  %v561_v53 = vmul.f32 %v6158_v26, %v517_v4  ;;  %v562_v60 = vmul.f32 %v6158_v26, %v518_v35  ;;  %vm9922_vm6 = vcmp.lt.s32.totalorder %v6520_v14, 8  ;;  %v9923_v40 = vmov 0 }
 0x1a2   :  { %v9920_v17 = vsel %vm6653_vm5, 4294967295, %v9919_v17  ;;  %vm6666_vm4 = vmand %vm6618_vm15, %vm9922_vm6  ;;  %v563_v55 = vmul.f32 %v6158_v26, %v519_v33  ;;  %v564_v28 = vmul.f32 %v6158_v26, %v520_v51  ;;  %v565_v15 = vmul.f32 %v6158_v26, %v521_v41 }
 0x1a3   :  { %9921 = vst [vmem:[#allocation102_spill] sm:$0xff] %v9920_v17  ;;  %v9924_v40 = vsel %vm6666_vm4, 4294967295, %v9923_v40  ;;  %v566_v19 = vmul.f32 %v6158_v26, %v522_v44  ;;  %vm9926_vm11 = vcmp.lt.s32.totalorder %v6522_v7, 8  ;;  %v9927_v58 = vmov 0 }
 0x1a4   :  { %9925 = vst [vmem:[#allocation103_spill] sm:$0xff] %v9924_v40  ;;  %vm6679_vm1 = vmand %vm6628_vm7, %vm9926_vm11  ;;  %v539_v59 = vadd.f32 %v6184_v62, %v527_v43  ;;  %v540_v4 = vadd.f32 %v6184_v62, %v528_v18  ;;  %v541_v35 = vadd.f32 %v6184_v62, %v529_v9  ;;  %v542_v33 = vadd.f32 %v6184_v62, %v530_v5 }
 0x1a5   :  { %v9928_v58 = vsel %vm6679_vm1, 4294967295, %v9927_v58  ;;  %vm9930_vm6 = vcmp.lt.s32.totalorder %v6526_v24, 8  ;;  %v9931_v26 = vmov 0  ;;  %v543_v51 = vadd.f32 %v6184_v62, %v531_v0 }
 0x1a6   :  { %9929 = vst [vmem:[#allocation104_spill] sm:$0xff] %v9928_v58  ;;  %vm6691_vm13 = vmand %vm6639_vm3, %vm9930_vm6  ;;  %v544_v41 = vadd.f32 %v6184_v62, %v532_v32  ;;  %v545_v44 = vadd.f32 %v6184_v62, %v533_v63  ;;  %v546_v43 = vadd.f32 %v6184_v62, %v534_v1  ;;  %vm9934_vm4 = vcmp.lt.s32.totalorder %v6535_v37, 8 }
 0x1a7   :  { %v9932_v26 = vsel %vm6691_vm13, 4294967295, %v9931_v26  ;;  %vm6705_vm6 = vmand %vm6496_vm10, %vm9934_vm4  ;;  %v9935_v18 = vmov 0  ;;  %v547_v9 = vmax.f32 %v539_v59, 0.0  ;;  %v548_v5 = vmax.f32 %v540_v4, 0.0 }
 0x1a8   :  { %9933 = vst [vmem:[#allocation105_spill] sm:$0xff] %v9932_v26  ;;  %v9936_v18 = vsel %vm6705_vm6, 4294967295, %v9935_v18  ;;  %v549_v0 = vmax.f32 %v541_v35, 0.0  ;;  %v550_v32 = vmax.f32 %v542_v33, 0.0  ;;  %vm9938_vm9 = vcmp.lt.s32.totalorder %v6546_v2, 8 }
 0x1a9   :  { %9937 = vst [vmem:[#allocation106_spill] sm:$0xff] %v9936_v18  ;;  %vm6715_vm1 = vmand %vm6513_vm0, %vm9938_vm9  ;;  %v9939_v62 = vmov 0  ;;  %v551_v63 = vmax.f32 %v543_v51, 0.0  ;;  %v552_v1 = vmax.f32 %v544_v41, 0.0  ;;  %v553_v26 = vmax.f32 %v545_v44, 0.0 }
 0x1aa   :  { %v9940_v62 = vsel %vm6715_vm1, 4294967295, %v9939_v62  ;;  %v554_v18 = vmax.f32 %v546_v43, 0.0  ;;  %vm9942_vm6 = vcmp.lt.s32.totalorder %v6563_v45, 8  ;;  %v9943_v59 = vmov 0  ;;  %587 = vst [vmem:[#allocation2 + $0x10] sm:$0xff] %v547_v9  ;;  %588 = vst [vmem:[#allocation2 + $0x18] sm:$0xff] %v548_v5 }
 0x1ab   :  { %9941 = vst [vmem:[#allocation107_spill] sm:$0xff] %v9940_v62  ;;  %vm6724_vm13 = vmand %vm6530_vm12, %vm9942_vm6  ;;  %v571_v4 = vadd.f32 %v6187_v8, %v559_v22  ;;  %v572_v35 = vadd.f32 %v6187_v8, %v560_v47  ;;  %v573_v33 = vadd.f32 %v6187_v8, %v561_v53  ;;  %v6732_v51 = vadd.f32 %v6187_v8, %v562_v60 }
 0x1ac   :  { %v9944_v59 = vsel %vm6724_vm13, 4294967295, %v9943_v59  ;;  %589 = vst [vmem:[#allocation2 + $0x20] sm:$0xff] %v549_v0  ;;  %590 = vst [vmem:[#allocation2 + $0x28] sm:$0xff] %v550_v32  ;;  %vm9946_vm9 = vcmp.lt.s32.totalorder %v6576_v61, 8  ;;  %v9947_v41 = vmov 0  ;;  %v6743_v22 = vadd.f32 %v6187_v8, %v563_v55 }
 0x1ad   :  { %9945 = vst [vmem:[#allocation108_spill] sm:$0xff] %v9944_v59  ;;  %vm6738_vm6 = vmand %vm6541_vm2, %vm9946_vm9  ;;  %v6746_v47 = vadd.f32 %v6187_v8, %v564_v28  ;;  %v6749_v53 = vadd.f32 %v6187_v8, %v565_v15  ;;  %v578_v60 = vadd.f32 %v6187_v8, %v566_v19  ;;  %v579_v44 = vmax.f32 %v571_v4, 0.0 }
 0x1ae   :  { %v9948_v41 = vsel %vm6738_vm6, 4294967295, %v9947_v41  ;;  %591 = vst [vmem:[#allocation2 + $0x30] sm:$0xff] %v551_v63  ;;  %592 = vst [vmem:[#allocation2 + $0x38] sm:$0xff] %v552_v1  ;;  %v580_v43 = vmax.f32 %v572_v35, 0.0  ;;  %v581_v59 = vmax.f32 %v573_v33, 0.0  ;;  %v583_v55 = vmax.f32 %v6743_v22, 0.0 }
 0x1af   :  { %9949 = vst [vmem:[#allocation109_spill] sm:$0xff] %v9948_v41  ;;  %593 = vst [vmem:[#allocation2 + $0x40] sm:$0xff] %v553_v26  ;;  %v582_v41 = vmax.f32 %v6732_v51, 0.0  ;;  %v9554_v62 = vmax.f32 %v6746_v47, 0.0  ;;  %v9553_v28 = vmax.f32 %v6749_v53, 0.0  ;;  %v586_v58 = vmax.f32 %v578_v60, 0.0 }
 0x1b0   :  { %594 = vst [vmem:[#allocation2 + $0x48] sm:$0xff] %v554_v18  ;;  %vm9950_vm9 = vcmp.ge.s32.totalorder %v6369_v57, 0  ;;  %vm9951_vm4 = vnez %v9831_v30  ;;  %595 = vst [vmem:[#allocation2 + $0x50] sm:$0xff] %v579_v44  ;;  %v935_v15 = vmul.f32 %v6224_v34, %v547_v9  ;;  %v936_v19 = vmul.f32 %v6294_v36, %v548_v5  ;;  %v9964_v60 = vld [vmem:[#allocation83_spill] sm:$0xff] }
 0x1b1   :  { %vm6760_vm11 = vmand %vm9951_vm4, %vm9950_vm9  ;;  %596 = vst [vmem:[#allocation2 + $0x58] sm:$0xff] %v580_v43  ;;  %v937_v4 = vmul.f32 %v6299_v23, %v549_v0  ;;  %v938_v35 = vmul.f32 %v6341_v49, %v550_v32  ;;  %vm9954_vm6 = vcmp.lt.s32.totalorder %v6500_v31, 8  ;;  %vm9955_vm13 = vcmp.ge.s32.totalorder %v6500_v31, 0  ;;  %v9959_v31 = vld [vmem:[#allocation71_spill] sm:$0xff] }
 0x1b2   :  { %597 = vst [vmem:[#allocation2 + $0x60] sm:$0xff] %v581_v59  ;;  %598 = vst [vmem:[#allocation2 + $0x68] sm:$0xff] %v582_v41  ;;  %v9956_v33 = vmov 0  ;;  %v939_v9 = vmul.f32 %v6349_v6, %v551_v63  ;;  %v6782_v5 = vmul.f32 %v6414_v54, %v552_v1  ;;  %v6785_v0 = vmul.f32 %v6420_v11, %v553_v26  ;;  %v9966_v26 = vld [vmem:[#allocation77_spill] sm:$0xff]  ;;  %v9976_v49 = vld [vmem:[#allocation63_spill] sm:$0xff] }
 0x1b3   :  { %vm6772_vm9 = vmand %vm9955_vm13, %vm9954_vm6  ;;  %599 = vst [vmem:[#allocation2 + $0x70] sm:$0xff] %v583_v55  ;;  %vm9958_vm13 = vcmp.ge.s32.totalorder %v6380_v46, 0  ;;  %vm9960_vm6 = vnez %v9959_v31  ;;  %v6796_v51 = vmul.f32 %v6451_v12, %v554_v18  ;;  %v951_v63 = vpack.c.bf16 %v937_v4, %v936_v19  ;;  %v6813_v54 = vld [vmem:[#allocation11 + $0x10] sm:$0xff]   ;;  %v6815_v18 = vld [vmem:[#allocation2 + $0xf] sm:$0xff] }
 0x1b4   :  { %v9957_v33 = vsel %vm6772_vm9, 4294967295, %v9956_v33  ;;  %600 = vst [vmem:[#allocation2 + $0x78] sm:$0xff] %v9554_v62  ;;  %601 = vst [vmem:[#allocation2 + $0x80] sm:$0xff] %v9553_v28  ;;  %v6800_v1 = vmul.f32 %v9964_v60, %v579_v44  ;;  %vm9965_vm5 = vcmp.ge.s32.totalorder %v6424_v3, 0  ;;  %vm9967_vm14 = vnez %v9966_v26  ;;  %v9970_v62 = vld [vmem:[#allocation85_spill] sm:$0xff] }
 0x1b5   :  { %602 = vst [vmem:[#allocation2 + $0x88] sm:$0xff] %v586_v58  ;;  %vm6791_vm1 = vmand %vm9960_vm6, %vm9958_vm13  ;;  %v9963_v58 = vld [vmem:[#allocation52_spill] sm:$0xff]  ;;  %v6811_v11 = vmul.f32 %v9970_v62, %v580_v43  ;;  %v952_v44 = vpack.c.bf16 %v939_v9, %v938_v35  ;;  %v953_v4 = vpack.c.bf16 %v6785_v0, %v6782_v5  ;;  %v9972_v12 = vmov 0.0   ;;  %v9975_v62 = vld [vmem:[#allocation53_spill] sm:$0xff] }
 0x1b6   :  { %v950_v22 = vpack.c.bf16 %v935_v15, %v9963_v58  ;;  %vm6806_vm2 = vmand %vm9967_vm14, %vm9965_vm5  ;;  %v6817_v15 = vld [vmem:[#allocation2 + $0x17] sm:$0xff]  ;;  %v6819_v19 = vld [vmem:[#allocation2 + $0x1f] sm:$0xff]  ;;  %v6829_v43 = vsel %vm6772_vm9, 1.0, %v9972_v12  ;;  %vm9974_vm5 = vcmask 130048   ;;  %v861_v6 = vmul.f32 %v9975_v62, %v6815_v18 }
 0x1b7   :  { %v9971_v58 = vld [vmem:[#allocation87_spill] sm:$0xff]  ;;  %9973 = vst [vmem:[#allocation71_spill] sm:$0xff] %v6829_v43  ;;  %v862_v23 = vmul.f32 %v9976_v49, %v6817_v15  ;;  %v9977_v35 = vld [vmem:[#allocation64_spill] sm:$0xff]  ;;  %v6838_v5 = vld [vmem:[#allocation2 + $0x27] sm:$0xff]  ;;  %v954_v0 = vpack.c.bf16 %v6800_v1, %v6796_v51  ;;  %vm9978_vm13 = vcmp.lt.s32.totalorder %v6558_v38, 8  ;;  %v9980_v12 = vmov 0 }
 0x1b8   :  { %v6824_v60 = vmul.f32 %v9971_v58, %v581_v59  ;;  %5204 = vmatprep.mubr.msk.bf16.mxu1 %vm9974_vm5, %v950_v22  ;;  %v863_v9 = vmul.f32 %v9977_v35, %v6819_v19  ;;  %v6840_v59 = vld [vmem:[#allocation2 + $0x2f] sm:$0xff]  ;;  %vm9979_vm5 = vcmp.ge.s32.totalorder %v6558_v38, 0  ;;  %vm9982_vm0 = vcmask 130048   ;;  %v9984_v35 = vld [vmem:[#allocation72_spill] sm:$0xff] }
 0x1b9   :  { %vm6848_vm12 = vmand %vm9979_vm5, %vm9978_vm13  ;;  %5205 = vmatmul.mubr.msk.bf16.vlgmr.msra.gmra.mxu1 %vm9982_vm0, %v951_v63  ;;  %v9983_v22 = vld [vmem:[#allocation70_spill] sm:$0xff]  ;;  %v865_v49 = vmul.f32 %v9984_v35, %v6840_v59  ;;  %vm9986_vm10 = vcmp.lt.s32.totalorder %v6560_v39, 8  ;;  %vm9987_vm13 = vcmp.ge.s32.totalorder %v6560_v39, 0  ;;  %v9988_v38 = vmov 0  ;;  %v9991_v63 = vld [vmem:[#allocation55_spill] sm:$0xff] }
 0x1ba   :  { %v9981_v12 = vsel %vm6848_vm12, 4294967295, %v9980_v12  ;;  %v864_v58 = vmul.f32 %v9983_v22, %v6838_v5  ;;  %v955_v62 = vpack.c.bf16 %v6824_v60, %v6811_v11  ;;  %v9985_v51 = vld [vmem:[#allocation90_spill] sm:$0xff]  ;;  %vm6866_vm5 = vmand %vm9987_vm13, %vm9986_vm10  ;;  %v876_v36 = vpack.c.bf16 %v861_v6, %v9991_v63  ;;  %v9992_v22 = vld [vmem:[#allocation23_spill] sm:$0xff]  ;;  %5208 = vmatprep.mubr.msk.bf16.mxu1 %vm9982_vm0, %v952_v44 }
 0x1bb   :  { %v6860_v1 = vmul.f32 %v9985_v51, %v582_v41  ;;  %v9989_v38 = vsel %vm6866_vm5, 4294967295, %v9988_v38  ;;  %5527 = vmatpush3.bf16.msra.mxu1 %v9992_v22  ;;  %v877_v34 = vpack.c.bf16 %v863_v9, %v862_v23  ;;  %vm9993_vm3 = vcmp.ge.s32.totalorder %v6430_v25, 0  ;;  %v9994_v11 = vld [vmem:[#allocation78_spill] sm:$0xff]  ;;  %v6886_v6 = vld [vmem:[#allocation2] sm:$0xff]  ;;  %v6894_v44 = vld [vmem:[#allocation11 + $0x28] sm:$0xff]  }
 0x1bc   :  { %9990 = vst [vmem:[#allocation52_spill] sm:$0xff] %v9989_v38  ;;  %vm9995_vm7 = vnez %v9994_v11  ;;  %v9998_v39 = vand.u32 7, %v6306_v10  ;;  %v947_v51 = vmul.f32 %v6829_v43, %v583_v55  ;;  %v6891_v23 = vsel %vm6848_vm12, 1.0, %v6886_v6  ;;  %5238 = vmatprep.subr.bf16.mxu1 %v6813_v54  ;;  %vm10000_vm10 = vmmov %vm9982_vm0  ;;  %v6897_v22 = vld [vmem:[#allocation2 + $0x37] sm:$0xff]  ;;  %v6899_v10 = vld [vmem:[#allocation2 + $0x3f] sm:$0xff] }
 0x1bd   :  { %vm6877_vm15 = vmand %vm9995_vm7, %vm9993_vm3  ;;  %9999 = vst [vmem:[#allocation77_spill] sm:$0xff] %v6891_v23  ;;  %5222 = vmatprep.mubr.msk.bf16.mxu0 %vm10000_vm10, %v876_v36  ;;  %v878_v9 = vpack.c.bf16 %v865_v49, %v864_v58  ;;  %v6904_v55 = vsel %vm6760_vm11, 1.0, %v6886_v6  ;;  %v6909_v63 = vsel %vm6791_vm1, 1.0, %v6886_v6  ;;  %v6917_v36 = vld [vmem:[#allocation2 + $0x47] sm:$0xff]  ;;  %v6919_v49 = vld [vmem:[#allocation2 + $0x4f] sm:$0xff]  ;;  %v6924_v8 = vsel %vm6806_vm2, 1.0, %v6886_v6 }
 0x1be   :  { %v6883_v60 = vadd.s32 4294967295, %v9998_v39  ;;  %10001 = vst [vmem:[#allocation55_spill] sm:$0xff] %v6904_v55  ;;  %10002 = vst [vmem:[#allocation23_spill] sm:$0xff] %v6909_v63  ;;  %v6914_v39 = vsel %vm6866_vm5, 1.0, %v6886_v6  ;;  %v6929_v32 = vsel %vm6877_vm15, 1.0, %v6886_v6  ;;  %v10007_v58 = vld [vmem:[#allocation82_spill] sm:$0xff]  ;;  %v956_v43 = vpack.c.bf16 %v947_v51, %v6860_v1 }
 0x1bf   :  { %10003 = vst [vmem:[#allocation78_spill] sm:$0xff] %v6914_v39  ;;  %vm10004_vm3 = vmmov %vm9982_vm0  ;;  %vm9580_vm1 = vcmp.ge.s32.totalorder %v10007_v58, 0  ;;  %v10010_v35 = vmax.f32 %v6746_v47, 0.0  ;;  %v866_v41 = vmul.f32 %v6904_v55, %v6897_v22  ;;  %v867_v40 = vmul.f32 %v6909_v63, %v6899_v10  ;;  %v10032_v55 = vld [vmem:[#allocation32_spill] sm:$0xff] }
 0x1c0   :  { %5223 = vmatmul.mubr.msk.bf16.vlgmr.msra.gmra.mxu0 %vm10004_vm3, %v877_v34  ;;  %10005 = vst [vmem:[#allocation110_spill] sm:$0xff] %v6924_v8  ;;  %10006 = vst [vmem:[#allocation111_spill] sm:$0xff] %v6929_v32  ;;  %vm9579_vm13 = vcmp.ge.s32.totalorder %v6883_v60, 0  ;;  %v10009_v34 = vld [vmem:[#allocation31_spill] sm:$0xff]  ;;  %v10011_v17 = vmax.f32 %v6749_v53, 0.0  ;;  %v868_v1 = vmul.f32 %v6924_v8, %v6917_v36  ;;  %v869_v47 = vmul.f32 %v6929_v32, %v6919_v49  ;;  %v10014_v53 = vld [vmem:[#allocation81_spill] sm:$0xff] }
 0x1c1   :  { %vm10008_vm11 = vmmov %vm9982_vm0  ;;  %5257 = vmatpush3.bf16.msra.mxu0 %v10009_v34  ;;  %v6939_v28 = vmul.f32 %v6891_v23, %v10010_v35  ;;  %v10012_v35 = vld [vmem:[#allocation80_spill] sm:$0xff]  ;;  %5209 = vmatmul.mubr.msk.bf16.gmra.mxu1 %vm9982_vm0, %v953_v4  ;;  %vm10015_vm10 = vnez %v10014_v53  ;;  %v10033_v29 = vand.u32 7, %v10032_v55 }
 0x1c2   :  { %5226 = vmatprep.mubr.msk.bf16.mxu0 %vm10008_vm11, %v878_v9  ;;  %v949_v51 = vmul.f32 %v6914_v39, %v10011_v17  ;;  %5292 = vmatprep.subr.bf16.mxu0 %v6894_v44  ;;  %vm10013_vm2 = vnez %v10012_v35  ;;  %vm823_vm3 = vmand %vm10015_vm10, %vm9579_vm13  ;;  %v879_v9 = vpack.c.bf16 %v867_v40, %v866_v41  ;;  %v880_v34 = vpack.c.bf16 %v869_v47, %v868_v1  ;;  %v6964_v39 = vld [vmem:[#allocation2 + $0x57] sm:$0xff]  ;;  %v6966_v32 = vld [vmem:[#allocation2 + $0x5f] sm:$0xff] }
 0x1c3   :  { %vm822_vm15 = vmand %vm10013_vm2, %vm9580_vm1  ;;  %v6972_v4 = vsel %vm823_vm3, 1.0, %v6886_v6  ;;  %v10019_v23 = vld [vmem:[#allocation40_spill] sm:$0xff]  ;;  %v10022_v40 = vld [vmem:[#allocation42_spill] sm:$0xff]  ;;  %vm10025_vm1 = vcmp.ge.s32.totalorder %v6469_v27, 0  ;;  %vm10029_vm3 = vcmp.ge.s32.totalorder %v6480_v20, 0  ;;  %v7004_v48 = vadd.s32 1, %v10033_v29 }
 0x1c4   :  { %v957_v17 = vpack.c.bf16 %v949_v51, %v6939_v28  ;;  %vm10016_vm11 = vmmov %vm9982_vm0  ;;  %v6969_v8 = vsel %vm822_vm15, 1.0, %v6886_v6  ;;  %10018 = vst [vmem:[#allocation31_spill] sm:$0xff] %v6972_v4  ;;  %vm10020_vm13 = vcmp.ge.s32.totalorder %v10019_v23, 0  ;;  %v10026_v41 = vld [vmem:[#allocation84_spill] sm:$0xff]  ;;  %v871_v63 = vmul.f32 %v6972_v4, %v6966_v32 }
 0x1c5   :  { %5212 = vmatprep.mubr.msk.bf16.mxu1 %vm10016_vm11, %v954_v0  ;;  %10017 = vst [vmem:[#allocation82_spill] sm:$0xff] %v6969_v8  ;;  %v6978_v28 = vsel %vm10020_vm13, 1.0, %v6886_v6  ;;  %vm10023_vm11 = vcmp.ge.s32.totalorder %v10022_v40, 0  ;;  %vm10027_vm15 = vnez %v10026_v41  ;;  %vm10028_vm10 = vmmov %vm9982_vm0  ;;  %v10030_v51 = vld [vmem:[#allocation20_spill] sm:$0xff]  ;;  %v10072_v40 = vand.u32 7, %v10071_v56  ;;  %v1215_v56 = vld [vmem:[#allocation2 + $0x9] sm:$0xff] }
 0x1c6   :  { %10021 = vst [vmem:[#allocation80_spill] sm:$0xff] %v6978_v28  ;;  %v6983_v0 = vsel %vm10023_vm11, 1.0, %v6886_v6  ;;  %vm824_vm8 = vmand %vm10027_vm15, %vm10025_vm1  ;;  %v10031_v1 = vand.u32 7, %v10030_v51  ;;  %v7013_v51 = vld [vmem:[#allocation2 + $0x6f] sm:$0xff]  ;;  %v7093_v23 = vld [vmem:[#allocation2 + $0x77] sm:$0xff] }
 0x1c7   :  { %10024 = vst [vmem:[#allocation81_spill] sm:$0xff] %v6983_v0  ;;  %v1561_v50 = vmul.f32 %v6983_v0, %v6817_v15  ;;  %vm10034_vm1 = vmmov %vm10028_vm10  ;;  %v10043_v0 = vld [vmem:[#allocation88_spill] sm:$0xff] }
 0x1c8   :  { %5227 = vmatmul.mubr.msk.bf16.gmra.mxu0 %vm9982_vm0, %v879_v9  ;;  %vm825_vm0 = vmand %vm6772_vm9, %vm10029_vm3  ;;  %v6996_v47 = vadd.s32 1, %v10031_v1  ;;  %v870_v9 = vmul.f32 %v6969_v8, %v6964_v39  ;;  %v7011_v1 = vld [vmem:[#allocation2 + $0x67] sm:$0xff]  ;;  %v7016_v8 = vsel %vm824_vm8, 1.0, %v6886_v6  ;;  %v7095_v38 = vld [vmem:[#allocation2 + $0x7f] sm:$0xff] }
 0x1c9   :  { %5230 = vmatprep.mubr.msk.bf16.mxu0 %vm10028_vm10, %v880_v34  ;;  %v1560_v34 = vmul.f32 %v6978_v28, %v6815_v18  ;;  %5213 = vmatmul.mubr.msk.bf16.gmra.mxu1 %vm10034_vm1, %v955_v62  ;;  %10035 = vst [vmem:[#allocation84_spill] sm:$0xff] %v7016_v8  ;;  %v7019_v4 = vsel %vm825_vm0, 1.0, %v6886_v6  ;;  %vm10037_vm13 = vmmov %vm10034_vm1  ;;  %v10038_v18 = vld [vmem:[#allocation86_spill] sm:$0xff]  ;;  %v10040_v62 = vld [vmem:[#allocation25_spill] sm:$0xff]  ;;  %vm10044_vm0 = vcmp.ge.s32.totalorder %v10043_v0, 0 }
 0x1ca   :  { %10036 = vst [vmem:[#allocation32_spill] sm:$0xff] %v7019_v4  ;;  %5216 = vmatprep.mubr.msk.bf16.mxu1 %vm10037_vm13, %v956_v43  ;;  %v881_v29 = vpack.c.bf16 %v871_v63, %v870_v9  ;;  %vm10039_vm11 = vcmp.ge.s32.totalorder %v10038_v18, 0  ;;  %vm10041_vm1 = vcmp.ge.s32.totalorder %v10040_v62, 0  ;;  %vm7037_vm13 = vmand %vm6866_vm5, %vm10044_vm0  ;;  %v10047_v63 = vld [vmem:[#allocation26_spill] sm:$0xff]  ;;  %v872_v62 = vmul.f32 %v7016_v8, %v7011_v1  ;;  %v10081_v43 = vld [vmem:[#allocation39_spill] sm:$0xff] }
 0x1cb   :  { %vm826_vm3 = vmand %vm6848_vm12, %vm10039_vm11  ;;  %v7030_v15 = vsel %vm10041_vm1, 1.0, %v6886_v6  ;;  %v1576_v55 = vpack.c.bf16 %v1561_v50, %v1560_v34  ;;  %vm10048_vm10 = vcmp.ge.s32.totalorder %v10047_v63, 0  ;;  %v873_v28 = vmul.f32 %v7019_v4, %v7013_v51  ;;  %v10051_v50 = vld [vmem:[#allocation59_spill] sm:$0xff] }
 0x1cc   :  { %10042 = vst [vmem:[#allocation86_spill] sm:$0xff] %v7030_v15  ;;  %v7044_v9 = vsel %vm10048_vm10, 1.0, %v6886_v6  ;;  %vm10050_vm11 = vcmask 130048   ;;  %vm10052_vm1 = vcmp.ge.s32.totalorder %v10051_v50, 0  ;;  %vm10055_vm0 = vcmp.ge.s32.totalorder %v10054_v52, 0  ;;  %v10058_v63 = vld [vmem:[#allocation43_spill] sm:$0xff] }
 0x1cd   :  { %10049 = vst [vmem:[#allocation25_spill] sm:$0xff] %v7044_v9  ;;  %v7054_v34 = vsel %vm10052_vm1, 1.0, %v6886_v6  ;;  %v7059_v42 = vsel %vm10055_vm0, 1.0, %v6886_v6  ;;  %vm10057_vm10 = vcmp.lt.s32.totalorder %v6996_v47, 8  ;;  %vm10059_vm8 = vnez %v10058_v63  ;;  %vm10062_vm12 = vmmov %vm10050_vm11 }
 0x1ce   :  { %10053 = vst [vmem:[#allocation88_spill] sm:$0xff] %v7054_v34  ;;  %10056 = vst [vmem:[#allocation26_spill] sm:$0xff] %v7059_v42  ;;  %v10069_v52 = vand.u32 7, %v10068_v13  ;;  %v7083_v63 = vsel %vm826_vm3, 1.0, %v6886_v6  ;;  %v1562_v16 = vmul.f32 %v7030_v15, %v6819_v19  ;;  %v882_v13 = vpack.c.bf16 %v873_v28, %v872_v62  ;;  %v10083_v62 = vld [vmem:[#allocation54_spill] sm:$0xff] }
 0x1cf   :  { %vm7065_vm5 = vmand %vm10059_vm8, %vm10057_vm10  ;;  %10070 = vst [vmem:[#allocation43_spill] sm:$0xff] %v7083_v63  ;;  %v1564_v19 = vmul.f32 %v7054_v34, %v6840_v59  ;;  %vm10077_vm8 = vcmp.ge.s32.totalorder %v6369_v57, 0  ;;  %v874_v8 = vmul.f32 %v7083_v63, %v7093_v23  ;;  %vm10084_vm0 = vnez %v10083_v62  ;;  %v10085_v63 = vld [vmem:[#allocation41_spill] sm:$0xff]  ;;  %v10100_v62 = vld [vmem:[#allocation38_spill] sm:$0xff] }
 0x1d0   :  { %5231 = vmatmul.mubr.msk.bf16.gmra.mxu0 %vm10050_vm11, %v881_v29  ;;  %vm10063_vm11 = vcmp.lt.s32.totalorder %v7004_v48, 8  ;;  %v10064_v29 = vld [vmem:[#allocation48_spill] sm:$0xff]  ;;  %v7080_v50 = vadd.s32 1, %v10069_v52  ;;  %v7100_v52 = vsel %vm7037_vm13, 1.0, %v6886_v6  ;;  %vm10076_vm3 = vmmov %vm10062_vm12  ;;  %v7123_v59 = vsel %vm10077_vm8, 1.0, %v6886_v6 }
 0x1d1   :  { %5258 = vmatprep.mubr.msk.bf16.mxu0 %vm10062_vm12, %v1576_v55  ;;  %vm10065_vm1 = vnez %v10064_v29  ;;  %v1563_v55 = vmul.f32 %v7044_v9, %v6838_v5  ;;  %v7091_v29 = vadd.s32 1, %v10072_v40  ;;  %10073 = vst [vmem:[#allocation48_spill] sm:$0xff] %v7100_v52  ;;  %v1565_v5 = vmul.f32 %v7059_v42, %v6897_v22  ;;  %5217 = vmatmul.mubr.msk.bf16.gmra.mxu1 %vm10062_vm12, %v957_v17  ;;  %v7107_v40 = vld [vmem:[#allocation2 + $0x11] sm:$0xff] }
 0x1d2   :  { %vm7074_vm9 = vmand %vm10065_vm1, %vm10063_vm11  ;;  %v7112_v9 = vsel %vm7065_vm5, 1.0, %v6886_v6  ;;  %5234 = vmatprep.mubr.msk.bf16.mxu1 %vm10076_vm3, %v882_v13  ;;  %10078 = vst [vmem:[#allocation112_spill] sm:$0xff] %v7123_v59  ;;  %vm10079_vm13 = vcmp.ge.s32.totalorder %v6380_v46, 0  ;;  %vm9671_vm5 = vcmp.lt.s32.totalorder %v7080_v50, 8  ;;  %v875_v17 = vmul.f32 %v7100_v52, %v7095_v38  ;;  %v7140_v13 = vld [vmem:[#allocation11 + $0x38] sm:$0xff]   ;;  %v10087_v46 = vld [vmem:[#allocation56_spill] sm:$0xff] }
 0x1d3   :  { %10074 = vst [vmem:[#allocation34_spill] sm:$0xff] %v7112_v9  ;;  %v7117_v28 = vsel %vm7074_vm9, 1.0, %v6886_v6  ;;  %v7128_v22 = vsel %vm10079_vm13, 1.0, %v6886_v6  ;;  %v1577_v4 = vpack.c.bf16 %v1563_v55, %v1562_v16  ;;  %vm10082_vm9 = vcmp.lt.s32.totalorder %v10081_v43, 8  ;;  %v10089_v16 = vld [vmem:[#allocation36_spill] sm:$0xff] }
 0x1d4   :  { %10075 = vst [vmem:[#allocation35_spill] sm:$0xff] %v7117_v28  ;;  %10080 = vst [vmem:[#allocation113_spill] sm:$0xff] %v7128_v22  ;;  %vm9670_vm11 = vcmp.lt.s32.totalorder %v7091_v29, 8  ;;  %v1578_v42 = vpack.c.bf16 %v1565_v5, %v1564_v19  ;;  %v1343_v34 = vmul.f32 %v7112_v9, %v1215_v56  ;;  %v1344_v15 = vmul.f32 %v7117_v28, %v7107_v40  ;;  %v10104_v28 = vld [vmem:[#allocation66_spill] sm:$0xff] }
 0x1d5   :  { %vm1297_vm10 = vmand %vm10084_vm0, %vm10082_vm9  ;;  %vm10086_vm1 = vcmp.lt.s32.totalorder %v10085_v63, 8  ;;  %vm10088_vm12 = vnez %v10087_v46  ;;  %v10090_v55 = vand.u32 7, %v10089_v16  ;;  %vm10091_vm8 = vcmask 130048   ;;  %v10096_v46 = vld [vmem:[#allocation65_spill] sm:$0xff] }
 0x1d6   :  { %vm1298_vm3 = vmand %vm10088_vm12, %vm10086_vm1  ;;  %vm10092_vm13 = vcmp.ge.s32.totalorder %v6424_v3, 0  ;;  %vm10094_vm9 = vcmp.ge.s32.totalorder %v6430_v25, 0  ;;  %vm10097_vm0 = vnez %v10096_v46  ;;  %v883_v46 = vpack.c.bf16 %v875_v17, %v874_v8  ;;  %v7201_v8 = vld [vmem:[#allocation2 + $0x19] sm:$0xff]  ;;  %v7203_v17 = vld [vmem:[#allocation2 + $0x21] sm:$0xff] }
 0x1d7   :  { %v7151_v52 = vadd.s32 1, %v10090_v55  ;;  %v7157_v19 = vsel %vm10092_vm13, 1.0, %v6886_v6  ;;  %v7162_v5 = vsel %vm10094_vm9, 1.0, %v6886_v6  ;;  %vm7168_vm1 = vmand %vm10097_vm0, %vm9671_vm5  ;;  %v7178_v55 = vsel %vm1297_vm10, 1.0, %v6886_v6 }
 0x1d8   :  { %5259 = vmatmul.mubr.msk.bf16.vlgmr.msra.gmra.mxu0 %vm10091_vm8, %v1577_v4  ;;  %10093 = vst [vmem:[#allocation39_spill] sm:$0xff] %v7157_v19  ;;  %10095 = vst [vmem:[#allocation54_spill] sm:$0xff] %v7162_v5  ;;  %v10101_v4 = vand.u32 7, %v10100_v62  ;;  %v1566_v62 = vmul.f32 %v7123_v59, %v6899_v10  ;;  %v7194_v25 = vsel %vm1298_vm3, 1.0, %v6886_v6  ;;  %v1568_v3 = vmul.f32 %v7157_v19, %v6919_v49  ;;  %v7207_v10 = vld [vmem:[#allocation2 + $0x29] sm:$0xff] }
 0x1d9   :  { %vm10102_vm12 = vmmov %vm10091_vm8  ;;  %10103 = vst [vmem:[#allocation41_spill] sm:$0xff] %v7178_v55  ;;  %vm10105_vm8 = vnez %v10104_v28  ;;  %5293 = vmatpush3.bf16.msra.mxu0 %v6894_v44  ;;  %v1359_v28 = vpack.c.bf16 %v1344_v15, %v1343_v34  ;;  %v1569_v44 = vmul.f32 %v7162_v5, %v6964_v39  ;;  %vm9669_vm10 = vcmp.lt.s32.totalorder %v7151_v52, 8  ;;  %v7289_v5 = vld [vmem:[#allocation11 + $0x30] sm:$0xff]  }
 0x1da   :  { %v7174_v16 = vadd.s32 1, %v10101_v4  ;;  %5262 = vmatprep.mubr.msk.bf16.mxu0 %vm10102_vm12, %v1578_v42  ;;  %vm7184_vm13 = vmand %vm10105_vm8, %vm9670_vm11  ;;  %v1567_v42 = vmul.f32 %v7128_v22, %v6917_v36  ;;  %v5585_v4 = vld [vmem:[#allocation11 + $0x20] sm:$0xff]   ;;  %10108 = vst [vmem:[#allocation56_spill] sm:$0xff] %v7194_v25  ;;  %5328 = vmatprep.subr.bf16.mxu0 %v7140_v13  ;;  %v7214_v15 = vsel %vm7168_vm1, 1.0, %v6886_v6  ;;  %v1345_v34 = vmul.f32 %v7178_v55, %v7201_v8  ;;  %v7295_v22 = vld [vmem:[#allocation2 + $0x39] sm:$0xff] }
 0x1db   :  { %vm10109_vm9 = vmmov %vm10102_vm12  ;;  %v7209_v36 = vld [vmem:[#allocation2 + $0x31] sm:$0xff]  ;;  %10110 = vst [vmem:[#allocation36_spill] sm:$0xff] %v7214_v15  ;;  %v7219_v39 = vsel %vm7184_vm13, 1.0, %v6886_v6  ;;  %v1346_v56 = vmul.f32 %v7194_v25, %v7203_v17  ;;  %vm10113_vm1 = vcmp.ge.s32.totalorder %v10007_v58, 0  ;;  %vm10115_vm8 = vcmp.ge.s32.totalorder %v6883_v60, 0  ;;  %v2117_v25 = vld [vmem:[#allocation2 + $0x27] sm:$0xff] }
 0x1dc   :  { %5235 = vmatmul.mubr.msk.bf16.vlgmr.msra.gmra.mxu1 %vm10109_vm9, %v883_v46  ;;  %10111 = vst [vmem:[#allocation65_spill] sm:$0xff] %v7219_v39  ;;  %vm9653_vm3 = vcmp.lt.s32.totalorder %v7174_v16, 8  ;;  %vm10112_vm0 = vmmov %vm10109_vm9  ;;  %v1579_v49 = vpack.c.bf16 %v1567_v42, %v1566_v62  ;;  %v7231_v9 = vsel %vm10113_vm1, 1.0, %v6886_v6  ;;  %v7240_v46 = vsel %vm10115_vm8, 1.0, %v6886_v6  ;;  %v2118_v55 = vld [vmem:[#allocation2 + $0x2f] sm:$0xff] }
 0x1dd   :  { %5239 = vmatpush3.bf16.msra.mxu1 %v6813_v54  ;;  %5240 = vmatprep.mubr.msk.bf16.mxu1 %vm10112_vm0, %v1359_v28  ;;  %10114 = vst [vmem:[#allocation38_spill] sm:$0xff] %v7231_v9  ;;  %vm1301_vm12 = vmand %vm9951_vm4, %vm9669_vm10  ;;  %v1580_v54 = vpack.c.bf16 %v1569_v44, %v1568_v3  ;;  %v1347_v62 = vmul.f32 %v7214_v15, %v7207_v10  ;;  %vm10120_vm9 = vcmp.ge.s32.totalorder %v6469_v27, 0  ;;  %vm10124_vm1 = vcmp.lt.s32.totalorder %v6510_v21, 8 }
 0x1de   :  { %5274 = vmatprep.subr.bf16.mxu1 %v5585_v4  ;;  %10116 = vst [vmem:[#allocation66_spill] sm:$0xff] %v7240_v46  ;;  %v1348_v42 = vmul.f32 %v7219_v39, %v7209_v36  ;;  %vm7250_vm13 = vmand %vm9960_vm6, %vm9653_vm3  ;;  %v7258_v3 = vsel %vm10120_vm9, 1.0, %v6886_v6  ;;  %v1570_v44 = vmul.f32 %v7231_v9, %v6966_v32  ;;  %v1571_v26 = vmul.f32 %v7240_v46, %v7011_v1  ;;  %v7394_v9 = vld [vmem:[#allocation2 + $0x59] sm:$0xff] }
 0x1df   :  { %vm10119_vm4 = vmmov %vm10112_vm0  ;;  %10121 = vst [vmem:[#allocation114_spill] sm:$0xff] %v7258_v3  ;;  %vm10122_vm0 = vcmp.ge.s32.totalorder %v6480_v20, 0  ;;  %v1360_v20 = vpack.c.bf16 %v1346_v56, %v1345_v34  ;;  %v1572_v11 = vmul.f32 %v7258_v3, %v7013_v51  ;;  %v7297_v34 = vld [vmem:[#allocation2 + $0x41] sm:$0xff]  ;;  %v7302_v32 = vsel %vm7250_vm13, 1.0, %v6886_v6  ;;  %v7305_v56 = vld [vmem:[#allocation2 + $0x49] sm:$0xff] }
 0x1e0   :  { %5263 = vmatmul.mubr.msk.bf16.gmra.mxu0 %vm10119_vm4, %v1579_v49  ;;  %v7263_v30 = vsel %vm10122_vm0, 1.0, %v6886_v6  ;;  %vm7269_vm6 = vmand %vm9967_vm14, %vm10124_vm1  ;;  %v7287_v49 = vsel %vm1301_vm12, 1.0, %v6886_v6  ;;  %10132 = vst [vmem:[#allocation117_spill] sm:$0xff] %v7302_v32  ;;  %v1581_v28 = vpack.c.bf16 %v1571_v26, %v1570_v44  ;;  %vm10137_vm12 = vcmp.ge.s32.totalorder %v10038_v18, 0  ;;  %v7338_v44 = vld [vmem:[#allocation2 + $0x87] sm:$0xff] }
 0x1e1   :  { %10123 = vst [vmem:[#allocation115_spill] sm:$0xff] %v7263_v30  ;;  %vm10127_vm8 = vmmov %vm10119_vm4  ;;  %vm10128_vm4 = vcmp.lt.s32.totalorder %v6520_v14, 8  ;;  %v1573_v19 = vmul.f32 %v7263_v30, %v7093_v23  ;;  %v1350_v30 = vmul.f32 %v7302_v32, %v7297_v34  ;;  %v7327_v31 = vsel %vm10137_vm12, 1.0, %v6886_v6 }
 0x1e2   :  { %5266 = vmatprep.mubr.msk.bf16.mxu0 %vm10127_vm8, %v1580_v54  ;;  %vm7278_vm9 = vmand %vm9995_vm7, %vm10128_vm4  ;;  %10131 = vst [vmem:[#allocation116_spill] sm:$0xff] %v7287_v49  ;;  %v1361_v54 = vpack.c.bf16 %v1348_v42, %v1347_v62  ;;  %v7307_v62 = vld [vmem:[#allocation2 + $0x51] sm:$0xff]  ;;  %v7312_v42 = vsel %vm7269_vm6, 1.0, %v6886_v6  ;;  %vm10139_vm13 = vcmp.lt.s32.totalorder %v6522_v7, 8  ;;  %vm10142_vm1 = vcmp.ge.s32.totalorder %v10043_v0, 0 }
 0x1e3   :  { %vm10133_vm14 = vmmov %vm10127_vm8  ;;  %10134 = vst [vmem:[#allocation118_spill] sm:$0xff] %v7312_v42  ;;  %v7317_v23 = vsel %vm7278_vm9, 1.0, %v6886_v6  ;;  %v1582_v27 = vpack.c.bf16 %v1573_v19, %v1572_v11  ;;  %v7343_v26 = vsel %vm10142_vm1, 1.0, %v6886_v6  ;;  %v1351_v18 = vmul.f32 %v7312_v42, %v7305_v56  ;;  %v7640_v42 = vld [vmem:[#allocation2 + $0x70] sm:$0xff] }
 0x1e4   :  { %5241 = vmatmul.mubr.msk.bf16.vlgmr.msra.gmra.mxu1 %vm10133_vm14, %v1360_v20  ;;  %10135 = vst [vmem:[#allocation119_spill] sm:$0xff] %v7317_v23  ;;  %vm10136_vm7 = vmmov %vm10127_vm8  ;;  %v1349_v20 = vmul.f32 %v7287_v49, %v7295_v22  ;;  %v1352_v35 = vmul.f32 %v7317_v23, %v7307_v62  ;;  %vm10145_vm6 = vnez %v10014_v53  ;;  %vm10149_vm9 = vcmp.lt.s32.totalorder %v6996_v47, 8 }
 0x1e5   :  { %5275 = vmatpush3.bf16.msra.mxu1 %v5585_v4  ;;  %5244 = vmatprep.mubr.msk.bf16.mxu1 %vm10136_vm7, %v1361_v54  ;;  %10138 = vst [vmem:[#allocation120_spill] sm:$0xff] %v7327_v31  ;;  %vm7333_vm0 = vmand %vm10013_vm2, %vm10139_vm13  ;;  %vm10144_vm2 = vcmp.lt.s32.totalorder %v6526_v24, 8  ;;  %v7361_v0 = vsel %vm10149_vm9, 1.0, %v6886_v6  ;;  %vm10151_vm14 = vcmp.lt.s32.totalorder %v7004_v48, 8  ;;  %vm10157_vm1 = vcmp.lt.s32.totalorder %v6546_v2, 8  ;;  %v7406_v4 = vld [vmem:[#allocation2 + $0x71] sm:$0xff] }
 0x1e6   :  { %5310 = vmatprep.subr.bf16.mxu1 %v7289_v5  ;;  %10143 = vst [vmem:[#allocation121_spill] sm:$0xff] %v7343_v26  ;;  %vm7353_vm8 = vmand %vm10145_vm6, %vm10144_vm2  ;;  %v7366_v19 = vsel %vm10151_vm14, 1.0, %v6886_v6  ;;  %vm10158_vm2 = vnez %v9957_v33  ;;  %v1362_v11 = vpack.c.bf16 %v1350_v30, %v1349_v20  ;;  %v1575_v3 = vmul.f32 %v7343_v26, %v7338_v44  ;;  %v7396_v30 = vld [vmem:[#allocation2 + $0x61] sm:$0xff]  ;;  %v7404_v20 = vld [vmem:[#allocation2 + $0x69] sm:$0xff] }
 0x1e7   :  { %vm10148_vm4 = vmmov %vm10136_vm7  ;;  %10150 = vst [vmem:[#allocation122_spill] sm:$0xff] %v7361_v0  ;;  %vm10153_vm7 = vcmp.lt.s32.totalorder %v6535_v37, 8  ;;  %v7388_v41 = vsel %vm7333_vm0, 1.0, %v6886_v6  ;;  %v1363_v46 = vpack.c.bf16 %v1352_v35, %v1351_v18  ;;  %v1947_v33 = vmul.f32 %v7366_v19, %v7201_v8 }
 0x1e8   :  { %5267 = vmatmul.mubr.msk.bf16.gmra.mxu0 %vm10148_vm4, %v1581_v28  ;;  %10152 = vst [vmem:[#allocation123_spill] sm:$0xff] %v7366_v19  ;;  %vm7372_vm12 = vmand %vm10027_vm15, %vm10153_vm7  ;;  %v1574_v28 = vmul.f32 %v7327_v31, %v7095_v38  ;;  %v7401_v38 = vsel %vm7353_vm8, 1.0, %v6886_v6  ;;  %v1353_v54 = vmul.f32 %v7388_v41, %v7394_v9  ;;  %vm10165_vm8 = vcmp.lt.s32.totalorder %v10081_v43, 8 }
 0x1e9   :  { %vm10156_vm13 = vmmov %vm10148_vm4  ;;  %10159 = vst [vmem:[#allocation124_spill] sm:$0xff] %v7388_v41  ;;  %v7424_v19 = vsel %vm10165_vm8, 1.0, %v6886_v6  ;;  %vm10169_vm9 = vcmp.lt.s32.totalorder %v6563_v45, 8  ;;  %vm10170_vm14 = vnez %v9981_v12  ;;  %v7443_v43 = vsel %vm9671_vm5, 1.0, %v6886_v6 }
 0x1ea   :  { %5270 = vmatprep.mubr.msk.bf16.mxu0 %vm10156_vm13, %v1582_v27  ;;  %vm1308_vm6 = vmand %vm10158_vm2, %vm10157_vm1  ;;  %v1946_v27 = vmul.f32 %v7361_v0, %v7107_v40  ;;  %10160 = vst [vmem:[#allocation125_spill] sm:$0xff] %v7401_v38  ;;  %v7411_v40 = vsel %vm7372_vm12, 1.0, %v6886_v6  ;;  %v1583_v35 = vpack.c.bf16 %v1575_v3, %v1574_v28  ;;  %vm10174_vm13 = vcmp.lt.s32.totalorder %v6576_v61, 8  ;;  %v10175_v28 = vld [vmem:[#allocation52_spill] sm:$0xff] }
 0x1eb   :  { %vm10161_vm15 = vmmov %vm10148_vm4  ;;  %10162 = vst [vmem:[#allocation126_spill] sm:$0xff] %v7411_v40  ;;  %v7414_v18 = vsel %vm1308_vm6, 1.0, %v6886_v6  ;;  %vm10176_vm1 = vnez %v10175_v28  ;;  %v1950_v31 = vmul.f32 %v7443_v43, %v7209_v36  ;;  %v10243_v59 = vmov 0 }
 0x1ec   :  { %5245 = vmatmul.mubr.msk.bf16.gmra.mxu1 %vm10161_vm15, %v1362_v11  ;;  %10163 = vst [vmem:[#allocation127_spill] sm:$0xff] %v7414_v18  ;;  %vm10164_vm0 = vmmov %vm10148_vm4  ;;  %v1354_v11 = vmul.f32 %v7401_v38, %v7396_v30  ;;  %v1962_v53 = vpack.c.bf16 %v1947_v33, %v1946_v27  ;;  %vm10167_vm4 = vcmp.lt.s32.totalorder %v10085_v63, 8  ;;  %v1356_v3 = vmul.f32 %v7414_v18, %v7406_v4  ;;  %v7466_v18 = vld [vmem:[#allocation2 + $0x79] sm:$0xff]  ;;  %v7577_v38 = vld [vmem:[#allocation2 + $0x89] sm:$0xff] }
 0x1ed   :  { %5248 = vmatprep.mubr.msk.bf16.mxu1 %vm10164_vm0, %v1363_v46  ;;  %10166 = vst [vmem:[#allocation128_spill] sm:$0xff] %v7424_v19  ;;  %v7429_v0 = vsel %vm10167_vm4, 1.0, %v6886_v6  ;;  %v1355_v46 = vmul.f32 %v7411_v40, %v7404_v20  ;;  %vm1309_vm7 = vmand %vm10170_vm14, %vm10169_vm9  ;;  %v7448_v63 = vsel %vm9670_vm11, 1.0, %v6886_v6  ;;  %v1948_v27 = vmul.f32 %v7424_v19, %v7203_v17  ;;  %v7575_v40 = vld [vmem:[#allocation2 + $0x48] sm:$0xff] }
 0x1ee   :  { %10168 = vst [vmem:[#allocation129_spill] sm:$0xff] %v7429_v0  ;;  %vm10171_vm12 = vmmov %vm10164_vm0  ;;  %v1364_v12 = vpack.c.bf16 %v1354_v11, %v1353_v54  ;;  %v1949_v33 = vmul.f32 %v7429_v0, %v7207_v10  ;;  %v1951_v28 = vmul.f32 %v7448_v63, %v7295_v22  ;;  %v7487_v0 = vsel %vm9653_vm3, 1.0, %v6886_v6 }
 0x1ef   :  { %10172 = vst [vmem:[#allocation130_spill] sm:$0xff] %v7443_v43  ;;  %10173 = vst [vmem:[#allocation131_spill] sm:$0xff] %v7448_v63  ;;  %v1365_v26 = vpack.c.bf16 %v1356_v3, %v1355_v46  ;;  %v7482_v63 = vsel %vm9669_vm10, 1.0, %v6886_v6  ;;  %vm10184_vm4 = vcmp.lt.s32.totalorder %v6510_v21, 8  ;;  %vm10186_vm9 = vcmp.lt.s32.totalorder %v6520_v14, 8 }
 0x1f0   :  { %5271 = vmatmul.mubr.msk.bf16.gmra.mxu0 %vm10171_vm12, %v1583_v35  ;;  %vm1310_vm2 = vmand %vm10176_vm1, %vm10174_vm13  ;;  %v7460_v35 = vsel %vm1309_vm7, 1.0, %v6886_v6  ;;  %v1963_v11 = vpack.c.bf16 %v1949_v33, %v1948_v27  ;;  %v1964_v43 = vpack.c.bf16 %v1951_v28, %v1950_v31  ;;  %10181 = vst [vmem:[#allocation133_spill] sm:$0xff] %v7482_v63  ;;  %v7495_v27 = vsel %vm10184_vm4, 1.0, %v6886_v6 }
 0x1f1   :  { %vm10177_vm6 = vmmov %vm10164_vm0  ;;  %10178 = vst [vmem:[#allocation52_spill] sm:$0xff] %v7460_v35  ;;  %v7471_v54 = vsel %vm1310_vm2, 1.0, %v6886_v6  ;;  %v1357_v46 = vmul.f32 %v7460_v35, %v7466_v18  ;;  %v7500_v31 = vsel %vm10186_vm9, 1.0, %v6886_v6  ;;  %v1952_v28 = vmul.f32 %v7482_v63, %v7297_v34  ;;  %v7517_v63 = vpop.f32.mrf.mxu0  ;;  %v1731_v35 = vld [vmem:[#allocation2 + $0x20] sm:$0xff] }
 0x1f2   :  { %5294 = vmatprep.mubr.msk.bf16.mxu0 %vm10177_vm6, %v1962_v53  ;;  %v7468_v53 = vld [vmem:[#allocation2 + $0x81] sm:$0xff]  ;;  %10179 = vst [vmem:[#allocation132_spill] sm:$0xff] %v7471_v54  ;;  %vm10180_vm15 = vmmov %vm10164_vm0  ;;  %v1954_v19 = vmul.f32 %v7495_v27, %v7307_v62  ;;  %v1955_v14 = vmul.f32 %v7500_v31, %v7394_v9  ;;  %vm10194_vm13 = vcmp.lt.s32.totalorder %v6522_v7, 8  ;;  %vm10196_vm1 = vcmp.lt.s32.totalorder %v6526_v24, 8 }
 0x1f3   :  { %v1358_v3 = vmul.f32 %v7471_v54, %v7468_v53  ;;  %10182 = vst [vmem:[#allocation134_spill] sm:$0xff] %v7487_v0  ;;  %vm10183_vm8 = vmmov %vm10164_vm0  ;;  %vm10199_vm6 = vcmp.lt.s32.totalorder %v6535_v37, 8  ;;  %vm10284_vm11 = vcmask 130048  }
 0x1f4   :  { %5249 = vmatmul.mubr.msk.bf16.gmra.mxu1 %vm10180_vm15, %v1364_v12  ;;  %v7490_v12 = vld [vmem:[#allocation2 + $0x18] sm:$0xff]  ;;  %10185 = vst [vmem:[#allocation135_spill] sm:$0xff] %v7495_v27  ;;  %10187 = vst [vmem:[#allocation136_spill] sm:$0xff] %v7500_v31  ;;  %v7524_v27 = vsel %vm10194_vm13, 1.0, %v6886_v6  ;;  %vm10201_vm15 = vcmp.lt.s32.totalorder %v6546_v2, 8  ;;  %v1735_v31 = vld [vmem:[#allocation2 + $0x40] sm:$0xff] }
 0x1f5   :  { %5252 = vmatprep.mubr.msk.bf16.mxu1 %vm10164_vm0, %v1365_v26  ;;  %v1729_v26 = vld [vmem:[#allocation2 + $0x10] sm:$0xff]  ;;  %vm10188_vm14 = vmmov %vm10164_vm0  ;;  %v1366_v33 = vpack.c.bf16 %v1358_v3, %v1357_v46  ;;  %v10192_v46 = vld [vmem:[#allocation37_spill] sm:$0xff]  ;;  %v7544_v7 = vsel %vm10201_vm15, 1.0, %v6886_v6 }
 0x1f6   :  { %v1745_v21 = vpack.c.bf16 %v7490_v12, %v1729_v26  ;;  %vm10189_vm7 = vmmov %vm10164_vm0  ;;  %v2132_v3 = vadd.s32 1, %v10192_v46  ;;  %v7519_v26 = vld [vmem:[#allocation2 + $0x28] sm:$0xff]  ;;  %10195 = vst [vmem:[#allocation37_spill] sm:$0xff] %v7524_v27 }
 0x1f7   :  { %vm10190_vm12 = vmmov %vm10164_vm0  ;;  %10202 = vst [vmem:[#allocation139_spill] sm:$0xff] %v7544_v7 }
 0x1f8   :  { %5295 = vmatmul.mubr.msk.bf16.vlgmr.msra.gmra.mxu0 %vm10183_vm8, %v1963_v11  ;;  %v1953_v11 = vmul.f32 %v7487_v0, %v7305_v56  ;;  %v1966_v0 = vpack.c.bf16 %v1955_v14, %v1954_v19  ;;  %vm10198_vm2 = vmmov %vm10164_vm0  ;;  %v7539_v19 = vsel %vm10199_vm6, 1.0, %v6886_v6  ;;  %vm2148_vm4 = vcmp.ge.s32.totalorder %v2132_v3, 0  ;;  %v7552_v14 = vld [vmem:[#allocation11 + $0x40] sm:$0xff]  }
 0x1f9   :  { %5298 = vmatprep.mubr.msk.bf16.mxu0 %vm10188_vm14, %v1964_v43  ;;  %5329 = vmatpush3.bf16.msra.mxu0 %v7140_v13  ;;  %v10191_v13 = vld [vmem:[#allocation33_spill] sm:$0xff]  ;;  %10200 = vst [vmem:[#allocation138_spill] sm:$0xff] %v7539_v19  ;;  %vm2164_vm14 = vcmp.lt.s32.totalorder %v2132_v3, 8  ;;  %vm10206_vm13 = vmmov %vm10164_vm0  ;;  %vm10213_vm6 = vcmp.lt.s32.totalorder %v6576_v61, 8  ;;  %v1748_v61 = vpack.c.bf16 %v7575_v40, %v1735_v31 }
 0x1fa   :  { %v2131_v43 = vadd.s32 1, %v10191_v13  ;;  %10193 = vst [vmem:[#allocation33_spill] sm:$0xff] %v7517_v63  ;;  %v1965_v54 = vpack.c.bf16 %v1953_v11, %v1952_v28  ;;  %v7532_v13 = vld [vmem:[#allocation2 + $0x30] sm:$0xff]  ;;  %v7534_v28 = vld [vmem:[#allocation2 + $0x38] sm:$0xff]  ;;  %v1956_v11 = vmul.f32 %v7524_v27, %v7396_v30  ;;  %v7587_v3 = vsel %vm10213_vm6, 1.0, %v6886_v6  ;;  %vm10215_vm15 = vmmov %vm10164_vm0 }
 0x1fb   :  { %v1747_v2 = vpack.c.bf16 %v7534_v28, %v7532_v13  ;;  %v10210_v27 = vld [vmem:[#allocation47_spill] sm:$0xff]  ;;  %v10266_v63 = vld [vmem:[#allocation30_spill] sm:$0xff] }
 0x1fc   :  { %5253 = vmatmul.mubr.msk.bf16.gmra.mxu1 %vm10189_vm7, %v1366_v33  ;;  %v7529_v33 = vsel %vm10196_vm1, 1.0, %v6886_v6  ;;  %vm2147_vm8 = vcmp.ge.s32.totalorder %v2131_v43, 0  ;;  %vm2163_vm9 = vcmp.lt.s32.totalorder %v2131_v43, 8  ;;  %v1959_v43 = vmul.f32 %v7544_v7, %v7466_v18  ;;  %vm10203_vm7 = vmmov %vm10164_vm0  ;;  %10214 = vst [vmem:[#allocation47_spill] sm:$0xff] %v7587_v3 }
 0x1fd   :  { %5276 = vmatprep.mubr.msk.bf16.mxu1 %vm10190_vm12, %v1745_v21  ;;  %10197 = vst [vmem:[#allocation137_spill] sm:$0xff] %v7529_v33  ;;  %v5200_v21 = vpop.f32.mrf.mxu0  ;;  %v1957_v37 = vmul.f32 %v7529_v33, %v7404_v20  ;;  %vm7561_vm12 = vmand %vm2147_vm8, %vm2163_vm9  ;;  %v2136_v7 = vadd.s32 1, %v10210_v27  ;;  %v7590_v27 = vld [vmem:[#allocation2 + $0x50] sm:$0xff] }
 0x1fe   :  { %vm7568_vm1 = vmand %vm2148_vm4, %vm2164_vm14 }
 0x1ff   :  { %v393_v24 = vpop.f32.mrf.mxu0  ;;  %vm2152_vm4 = vcmp.ge.s32.totalorder %v2136_v7, 0  ;;  %vm2168_vm14 = vcmp.lt.s32.totalorder %v2136_v7, 8 }
 0x200   :  { %5299 = vmatmul.mubr.msk.bf16.gmra.mxu0 %vm10198_vm2, %v1965_v54  ;;  %v1746_v54 = vpack.c.bf16 %v7519_v26, %v1731_v35  ;;  %vm10211_vm2 = vcmp.lt.s32.totalorder %v6563_v45, 8  ;;  %v7602_v45 = vsel %vm7568_vm1, 1.0, %v6886_v6  ;;  %vm7622_vm6 = vmand %vm2152_vm4, %vm2168_vm14 }
 0x201   :  { %5302 = vmatprep.mubr.msk.bf16.mxu0 %vm10164_vm0, %v1966_v0  ;;  %v1958_v0 = vmul.f32 %v7539_v19, %v7406_v4  ;;  %v5201_v46 = vpop.f32.mrf.mxu0  ;;  %v10209_v19 = vld [vmem:[#allocation45_spill] sm:$0xff]  ;;  %10217 = vst [vmem:[#allocation141_spill] sm:$0xff] %v7602_v45 }
 0x202   :  { %v2135_v33 = vadd.s32 1, %v10209_v19  ;;  %v1967_v46 = vpack.c.bf16 %v1957_v37, %v1956_v11  ;;  %v7592_v19 = vld [vmem:[#allocation2 + $0x58] sm:$0xff]  ;;  %v7597_v11 = vsel %vm7561_vm12, 1.0, %v6886_v6 }
 0x203   :  { %10216 = vst [vmem:[#allocation140_spill] sm:$0xff] %v7597_v11 }
 0x204   :  { %5277 = vmatmul.mubr.msk.bf16.vlgmr.msra.gmra.mxu1 %vm10203_vm7, %v1746_v54  ;;  %v1968_v54 = vpack.c.bf16 %v1959_v43, %v1958_v0  ;;  %vm2151_vm8 = vcmp.ge.s32.totalorder %v2135_v33, 0  ;;  %vm2167_vm9 = vcmp.lt.s32.totalorder %v2135_v33, 8  ;;  %v1749_v0 = vpack.c.bf16 %v7592_v19, %v7590_v27  ;;  %vm10218_vm7 = vmmov %vm10164_vm0 }
 0x205   :  { %5311 = vmatpush3.bf16.msra.mxu1 %v7289_v5  ;;  %5280 = vmatprep.mubr.msk.bf16.mxu1 %vm10206_vm13, %v1747_v2  ;;  %v7582_v5 = vsel %vm10211_vm2, 1.0, %v6886_v6  ;;  %v1961_v2 = vmul.f32 %v7587_v3, %v7577_v38  ;;  %v2460_v43 = vmul.f32 %v7597_v11, %v7490_v12  ;;  %vm7616_vm13 = vmand %vm2151_vm8, %vm2167_vm9  ;;  %v10225_v3 = vld [vmem:[#allocation58_spill] sm:$0xff]  ;;  %v1739_v11 = vld [vmem:[#allocation2 + $0x60] sm:$0xff] }
 0x206   :  { %5346 = vmatprep.subr.bf16.mxu1 %v7552_v14  ;;  %10212 = vst [vmem:[#allocation45_spill] sm:$0xff] %v7582_v5  ;;  %v1960_v37 = vmul.f32 %v7582_v5, %v7468_v53  ;;  %vm10222_vm2 = vmmov %vm10164_vm0  ;;  %v2138_v41 = vadd.s32 1, %v10225_v3  ;;  %v7642_v3 = vld [vmem:[#allocation2 + $0x78] sm:$0xff] }
 0x207   :  { %vm10232_vm8 = vmmov %vm10222_vm2 }
 0x208   :  { %5303 = vmatmul.mubr.msk.bf16.gmra.mxu0 %vm10215_vm15, %v1967_v46  ;;  %v2461_v46 = vmul.f32 %v7602_v45, %v1731_v35  ;;  %v1969_v23 = vpack.c.bf16 %v1961_v2, %v1960_v37  ;;  %v7627_v35 = vld [vmem:[#allocation2 + $0x68] sm:$0xff]  ;;  %v7647_v37 = vsel %vm7616_vm13, 1.0, %v6886_v6  ;;  %v7652_v2 = vsel %vm7622_vm6, 1.0, %v6886_v6 }
 0x209   :  { %5306 = vmatprep.mubr.msk.bf16.mxu0 %vm10164_vm0, %v1968_v54  ;;  %v10221_v54 = vld [vmem:[#allocation57_spill] sm:$0xff] }
 0x20a   :  { %v2137_v5 = vadd.s32 1, %v10221_v54  ;;  %v2476_v12 = vpack.c.bf16 %v2461_v46, %v2460_v43  ;;  %v10229_v54 = vld [vmem:[#allocation28_spill] sm:$0xff]  ;;  %v10239_v46 = vld [vmem:[#allocation42_spill] sm:$0xff] }
 0x20b   :  { %vm10230_vm0 = vnez %v10229_v54  ;;  %10234 = vst [vmem:[#allocation28_spill] sm:$0xff] %v7652_v2  ;;  %v10235_v43 = vld [vmem:[#allocation40_spill] sm:$0xff] }
 0x20c   :  { %5281 = vmatmul.mubr.msk.bf16.gmra.mxu1 %vm10218_vm7, %v1748_v61  ;;  %v10226_v61 = vld [vmem:[#allocation27_spill] sm:$0xff]  ;;  %vm2153_vm4 = vcmp.ge.s32.totalorder %v2137_v5, 0  ;;  %vm2169_vm9 = vcmp.lt.s32.totalorder %v2137_v5, 8  ;;  %vm10236_vm14 = vcmp.ge.s32.totalorder %v10235_v43, 0  ;;  %v1751_v43 = vpack.c.bf16 %v7642_v3, %v7640_v42 }
 0x20d   :  { %5284 = vmatprep.mubr.msk.bf16.mxu1 %vm10222_vm2, %v1749_v0  ;;  %vm10227_vm15 = vnez %v10226_v61  ;;  %v7637_v0 = vsel %vm10230_vm0, 1.0, %v6886_v6  ;;  %10233 = vst [vmem:[#allocation27_spill] sm:$0xff] %v7647_v37  ;;  %vm7658_vm7 = vmand %vm7561_vm12, %vm10236_vm14  ;;  %vm2170_vm0 = vcmp.lt.s32.totalorder %v2138_v41, 8  ;;  %v1750_v61 = vpack.c.bf16 %v7627_v35, %v1739_v11 }
 0x20e   :  { %v7632_v45 = vsel %vm10227_vm15, 1.0, %v6886_v6  ;;  %10231 = vst [vmem:[#allocation58_spill] sm:$0xff] %v7637_v0  ;;  %vm2154_vm15 = vcmp.ge.s32.totalorder %v2138_v41, 0  ;;  %v2463_v54 = vmul.f32 %v7637_v0, %v7532_v13  ;;  %v2465_v41 = vmul.f32 %v7652_v2, %v1735_v31  ;;  %vm7677_vm14 = vmand %vm2153_vm4, %vm2169_vm9  ;;  %v2116_v13 = vld [vmem:[#allocation2 + $0x1f] sm:$0xff] }
 0x20f   :  { %10228 = vst [vmem:[#allocation57_spill] sm:$0xff] %v7632_v45  ;;  %v2462_v5 = vmul.f32 %v7632_v45, %v7519_v26  ;;  %v2115_v26 = vld [vmem:[#allocation2 + $0x17] sm:$0xff]  ;;  %v7689_v0 = vsel %vm7658_vm7, 1.0, %v6886_v6  ;;  %vm10247_vm4 = vmmov %vm10222_vm2  ;;  %v7700_v45 = vld [vmem:[#allocation2 + $0x88] sm:$0xff] }
 0x210   :  { %5307 = vmatmul.mubr.msk.bf16.gmra.mxu0 %vm10232_vm8, %v1969_v23  ;;  %vm10240_vm8 = vcmp.ge.s32.totalorder %v10239_v46, 0  ;;  %v10241_v46 = vmov 0  ;;  %10245 = vst [vmem:[#allocation40_spill] sm:$0xff] %v7689_v0  ;;  %v2243_v32 = vmul.f32 %v7689_v0, %v2115_v26  ;;  %v10263_v0 = vld [vmem:[#allocation29_spill] sm:$0xff] }
 0x211   :  { %5330 = vmatprep.mubr.msk.bf16.mxu0 %vm10222_vm2, %v2476_v12  ;;  %vm2196_vm3 = vmand %vm7568_vm1, %vm10240_vm8  ;;  %v2464_v12 = vmul.f32 %v7647_v37, %v7534_v28  ;;  %v10242_v46 = vsel %vm7677_vm14, 4294967295, %v10241_v46  ;;  %v2477_v31 = vpack.c.bf16 %v2463_v54, %v2462_v5  ;;  %v1743_v37 = vld [vmem:[#allocation2 + $0x80] sm:$0xff]  ;;  %v10251_v5 = vld [vmem:[#allocation98_spill] sm:$0xff] }
 0x212   :  { %vm7682_vm8 = vmand %vm2154_vm15, %vm2170_vm0  ;;  %v7692_v28 = vsel %vm2196_vm3, 1.0, %v6886_v6  ;;  %vm10252_vm9 = vnez %v10251_v5 }
 0x213   :  { %v10244_v59 = vsel %vm7682_vm8, 4294967295, %v10243_v59  ;;  %10246 = vst [vmem:[#allocation42_spill] sm:$0xff] %v7692_v28  ;;  %v2478_v2 = vpack.c.bf16 %v2465_v41, %v2464_v12  ;;  %v7705_v23 = vsel %vm7682_vm8, 1.0, %v6886_v6  ;;  %v2244_v49 = vmul.f32 %v7692_v28, %v2116_v13  ;;  %vm10250_vm3 = vmmov %vm10222_vm2  ;;  %v10257_v41 = vld [vmem:[#allocation59_spill] sm:$0xff]  ;;  %v10261_v13 = vld [vmem:[#allocation62_spill] sm:$0xff] }
 0x214   :  { %5285 = vmatmul.mubr.msk.bf16.gmra.mxu1 %vm10222_vm2, %v1750_v61  ;;  %v7698_v61 = vsel %vm7677_vm14, 1.0, %v6886_v6  ;;  %10249 = vst [vmem:[#allocation143_spill] sm:$0xff] %v7705_v23  ;;  %v7713_v54 = vsel %vm10252_vm9, 1.0, %v6886_v6  ;;  %vm10258_vm15 = vcmp.ge.s32.totalorder %v10257_v41, 0  ;;  %v2467_v41 = vmul.f32 %v7705_v23, %v7590_v27  ;;  %v2119_v27 = vld [vmem:[#allocation2 + $0x37] sm:$0xff]  ;;  %v2120_v23 = vld [vmem:[#allocation2 + $0x3f] sm:$0xff] }
 0x215   :  { %5288 = vmatprep.mubr.msk.bf16.mxu1 %vm10247_vm4, %v1751_v43  ;;  %10248 = vst [vmem:[#allocation142_spill] sm:$0xff] %v7698_v61  ;;  %10253 = vst [vmem:[#allocation98_spill] sm:$0xff] %v7713_v54  ;;  %v10254_v43 = vld [vmem:[#allocation99_spill] sm:$0xff]  ;;  %vm10262_vm4 = vcmp.ge.s32.totalorder %v10261_v13, 0  ;;  %v2466_v28 = vmul.f32 %v7698_v61, %v7575_v40  ;;  %v2259_v15 = vpack.c.bf16 %v2244_v49, %v2243_v32 }
 0x216   :  { %vm10255_vm7 = vnez %v10254_v43  ;;  %vm7724_vm0 = vmand %vm7616_vm13, %vm10258_vm15  ;;  %vm10264_vm15 = vnez %v10263_v0  ;;  %v10273_v0 = vld [vmem:[#allocation100_spill] sm:$0xff] }
 0x217   :  { %v7718_v12 = vsel %vm10255_vm7, 1.0, %v6886_v6  ;;  %v7741_v39 = vsel %vm10264_vm15, 1.0, %v6886_v6  ;;  %v7755_v49 = vsel %vm7724_vm0, 1.0, %v6886_v6 }
 0x218   :  { %5331 = vmatmul.mubr.msk.bf16.vlgmr.msra.gmra.mxu0 %vm10250_vm3, %v2477_v31  ;;  %10256 = vst [vmem:[#allocation99_spill] sm:$0xff] %v7718_v12  ;;  %vm2200_vm3 = vmand %vm7622_vm6, %vm10262_vm4  ;;  %v1752_v31 = vpack.c.bf16 %v7700_v45, %v1743_v37  ;;  %v2469_v13 = vmul.f32 %v7718_v12, %v1739_v11  ;;  %vm10269_vm4 = vcmask 130048   ;;  %v2245_v11 = vmul.f32 %v7741_v39, %v2117_v25  ;;  %v10277_v12 = vld [vmem:[#allocation101_spill] sm:$0xff] }
 0x219   :  { %5334 = vmatprep.mubr.msk.bf16.mxu0 %vm10222_vm2, %v2478_v2  ;;  %10265 = vst [vmem:[#allocation59_spill] sm:$0xff] %v7741_v39  ;;  %v2468_v2 = vmul.f32 %v7713_v54, %v7592_v19  ;;  %vm10267_vm2 = vnez %v10266_v63  ;;  %10270 = vst [vmem:[#allocation29_spill] sm:$0xff] %v7755_v49  ;;  %v7758_v32 = vsel %vm2200_vm3, 1.0, %v6886_v6  ;;  %v2479_v19 = vpack.c.bf16 %v2467_v41, %v2466_v28  ;;  %v10280_v28 = vld [vmem:[#allocation69_spill] sm:$0xff] }
 0x21a   :  { %v7749_v40 = vsel %vm10267_vm2, 1.0, %v6886_v6  ;;  %10271 = vst [vmem:[#allocation30_spill] sm:$0xff] %v7758_v32  ;;  %vm10272_vm15 = vmmov %vm10269_vm4  ;;  %vm10274_vm2 = vnez %v10273_v0  ;;  %vm10278_vm3 = vnez %v10277_v12  ;;  %v2247_v25 = vmul.f32 %v7755_v49, %v2119_v27  ;;  %v2128_v12 = vld [vmem:[#allocation2 + $0x7f] sm:$0xff] }
 0x21b   :  { %10268 = vst [vmem:[#allocation62_spill] sm:$0xff] %v7749_v40  ;;  %v2246_v63 = vmul.f32 %v7749_v40, %v2118_v55  ;;  %v2480_v26 = vpack.c.bf16 %v2469_v13, %v2468_v2  ;;  %v2248_v55 = vmul.f32 %v7758_v32, %v2120_v23  ;;  %v10288_v13 = vld [vmem:[#allocation91_spill] sm:$0xff] }
 0x21c   :  { %5289 = vmatmul.mubr.msk.bf16.gmra.mxu1 %vm10269_vm4, %v1752_v31  ;;  %v7766_v31 = vsel %vm10274_vm2, 1.0, %v6886_v6  ;;  %vm10276_vm4 = vcmp.ge.s32.totalorder %v6369_v57, 0  ;;  %v10285_v57 = vld [vmem:[#allocation89_spill] sm:$0xff]  ;;  %vm10289_vm5 = vnez %v10288_v13  ;;  %v10291_v23 = vld [vmem:[#allocation75_spill] sm:$0xff] }
 0x21d   :  { %5312 = vmatprep.mubr.msk.bf16.mxu1 %vm10272_vm15, %v2259_v15  ;;  %10275 = vst [vmem:[#allocation100_spill] sm:$0xff] %v7766_v31  ;;  %vm2201_vm0 = vmand %vm7677_vm14, %vm10276_vm4  ;;  %v7775_v15 = vsel %vm10278_vm3, 1.0, %v6886_v6  ;;  %vm10281_vm15 = vcmp.ge.s32.totalorder %v10280_v28, 0  ;;  %vm10286_vm4 = vnez %v10285_v57  ;;  %v7796_v27 = vsel %vm10289_vm5, 1.0, %v6886_v6  ;;  %v2122_v32 = vld [vmem:[#allocation2 + $0x4f] sm:$0xff] }
 0x21e   :  { %10279 = vst [vmem:[#allocation101_spill] sm:$0xff] %v7775_v15  ;;  %vm7783_vm10 = vmand %vm7682_vm8, %vm10281_vm15  ;;  %v7791_v2 = vsel %vm10286_vm4, 1.0, %v6886_v6  ;;  %vm10292_vm14 = vcmp.ge.s32.totalorder %v10291_v23, 0  ;;  %v2260_v57 = vpack.c.bf16 %v2246_v63, %v2245_v11  ;;  %v2470_v13 = vmul.f32 %v7766_v31, %v7627_v35  ;;  %v2123_v35 = vld [vmem:[#allocation2 + $0x57] sm:$0xff] }
 0x21f   :  { %10287 = vst [vmem:[#allocation69_spill] sm:$0xff] %v7791_v2  ;;  %10290 = vst [vmem:[#allocation89_spill] sm:$0xff] %v7796_v27  ;;  %v2471_v23 = vmul.f32 %v7775_v15, %v7640_v42  ;;  %v7816_v5 = vsel %vm2201_vm0, 1.0, %v6886_v6  ;;  %v2261_v54 = vpack.c.bf16 %v2248_v55, %v2247_v25  ;;  %v2472_v61 = vmul.f32 %v7791_v2, %v7642_v3  ;;  %v2124_v42 = vld [vmem:[#allocation2 + $0x5f] sm:$0xff] }
 0x220   :  { %5335 = vmatmul.mubr.msk.bf16.gmra.mxu0 %vm10284_vm11, %v2479_v19  ;;  %vm7802_vm15 = vmand %vm10252_vm9, %vm10292_vm14  ;;  %v10296_v19 = vld [vmem:[#allocation76_spill] sm:$0xff]  ;;  %10298 = vst [vmem:[#allocation91_spill] sm:$0xff] %v7816_v5  ;;  %v7824_v43 = vsel %vm7783_vm10, 1.0, %v6886_v6  ;;  %vm10309_vm9 = vcmp.ge.s32.totalorder %v10007_v58, 0 }
 0x221   :  { %vm10295_vm8 = vmmov %vm10284_vm11  ;;  %vm10297_vm11 = vcmp.ge.s32.totalorder %v10296_v19, 0  ;;  %v2121_v19 = vld [vmem:[#allocation2 + $0x47] sm:$0xff]  ;;  %10299 = vst [vmem:[#allocation75_spill] sm:$0xff] %v7824_v43  ;;  %v7830_v11 = vsel %vm7802_vm15, 1.0, %v6886_v6  ;;  %v2250_v25 = vmul.f32 %v7824_v43, %v2122_v32  ;;  %v10304_v55 = vld [vmem:[#allocation92_spill] sm:$0xff]  ;;  %vm10311_vm15 = vcmp.ge.s32.totalorder %v6883_v60, 0 }
 0x222   :  { %5338 = vmatprep.mubr.msk.bf16.mxu0 %vm10295_vm8, %v2480_v26  ;;  %vm2204_vm4 = vmand %vm10255_vm7, %vm10297_vm11  ;;  %v2473_v26 = vmul.f32 %v7796_v27, %v1743_v37  ;;  %10301 = vst [vmem:[#allocation76_spill] sm:$0xff] %v7830_v11  ;;  %v2481_v37 = vpack.c.bf16 %v2471_v23, %v2470_v13  ;;  %v2249_v63 = vmul.f32 %v7816_v5, %v2121_v19  ;;  %v2127_v60 = vld [vmem:[#allocation2 + $0x77] sm:$0xff]  ;;  %v10317_v23 = vld [vmem:[#allocation94_spill] sm:$0xff] }
 0x223   :  { %vm10300_vm5 = vmmov %vm10295_vm8  ;;  %v7833_v3 = vsel %vm2204_vm4, 1.0, %v6886_v6  ;;  %vm10305_vm10 = vnez %v10304_v55  ;;  %v2251_v2 = vmul.f32 %v7830_v11, %v2123_v35 }
 0x224   :  { %5313 = vmatmul.mubr.msk.bf16.vlgmr.msra.gmra.mxu1 %vm10300_vm5, %v2260_v57  ;;  %10302 = vst [vmem:[#allocation144_spill] sm:$0xff] %v7833_v3  ;;  %vm10303_vm14 = vmmov %vm10300_vm5  ;;  %v7842_v41 = vsel %vm10305_vm10, 1.0, %v6886_v6  ;;  %v2482_v28 = vpack.c.bf16 %v2473_v26, %v2472_v61  ;;  %v10307_v57 = vld [vmem:[#allocation93_spill] sm:$0xff]  ;;  %v2262_v61 = vpack.c.bf16 %v2250_v25, %v2249_v63  ;;  %v2130_v25 = vld [vmem:[#allocation2 + $0x8f] sm:$0xff] }
 0x225   :  { %5347 = vmatpush3.bf16.msra.mxu1 %v7552_v14  ;;  %5316 = vmatprep.mubr.msk.bf16.mxu1 %vm10303_vm14, %v2261_v54  ;;  %10306 = vst [vmem:[#allocation92_spill] sm:$0xff] %v7842_v41  ;;  %vm10308_vm8 = vnez %v10307_v57  ;;  %v2252_v14 = vmul.f32 %v7833_v3, %v2124_v42  ;;  %vm2205_vm7 = vmand %vm10274_vm2, %vm10309_vm9  ;;  %v2474_v54 = vmul.f32 %v7842_v41, %v7700_v45  ;;  %v10320_v45 = vld [vmem:[#allocation95_spill] sm:$0xff] }
 0x226   :  { %v4914_v27 = vsel %vm10308_vm8, 1.0, %v6886_v6  ;;  %vm10310_vm0 = vmmov %vm10300_vm5  ;;  %v7865_v0 = vsel %vm2205_vm7, 1.0, %v6886_v6  ;;  %vm10321_vm5 = vnez %v10320_v45  ;;  %vm10325_vm8 = vcmp.lt.s32.totalorder %v6996_v47, 8 }
 0x227   :  { %vm2206_vm11 = vmand %vm10278_vm3, %vm10311_vm15  ;;  %v7862_v32 = vmul.f32 %v6886_v6, %v4914_v27  ;;  %v2263_v58 = vpack.c.bf16 %v2252_v14, %v2251_v2  ;;  %10314 = vst [vmem:[#allocation145_spill] sm:$0xff] %v7865_v0  ;;  %vm10318_vm3 = vnez %v10317_v23  ;;  %v7879_v27 = vsel %vm10321_vm5, 1.0, %v6886_v6 }
 0x228   :  { %5339 = vmatmul.mubr.msk.bf16.gmra.mxu0 %vm10310_vm0, %v2481_v37  ;;  %vm10312_vm4 = vmmov %vm10310_vm0  ;;  %v7868_v13 = vsel %vm2206_vm11, 1.0, %v6886_v6  ;;  %v7874_v26 = vsel %vm10318_vm3, 1.0, %v6886_v6  ;;  %10322 = vst [vmem:[#allocation95_spill] sm:$0xff] %v7879_v27  ;;  %v2253_v19 = vmul.f32 %v7865_v0, %v7011_v1  ;;  %v2256_v37 = vmul.f32 %v7879_v27, %v2128_v12 }
 0x229   :  { %5342 = vmatprep.mubr.msk.bf16.mxu0 %vm10312_vm4, %v2482_v28  ;;  %10313 = vst [vmem:[#allocation93_spill] sm:$0xff] %v7862_v32  ;;  %10315 = vst [vmem:[#allocation146_spill] sm:$0xff] %v7868_v13  ;;  %v2483_v2 = vpack.c.bf16 %v7862_v32, %v2474_v54  ;;  %v2254_v35 = vmul.f32 %v7868_v13, %v7013_v51  ;;  %v2255_v42 = vmul.f32 %v7874_v26, %v2127_v60  ;;  %v10327_v51 = vld [vmem:[#allocation96_spill] sm:$0xff]  ;;  %v10330_v28 = vld [vmem:[#allocation97_spill] sm:$0xff] }
 0x22a   :  { %vm10316_vm2 = vmmov %vm10310_vm0  ;;  %10319 = vst [vmem:[#allocation94_spill] sm:$0xff] %v7874_v26  ;;  %vm10326_vm7 = vcmp.lt.s32.totalorder %v7004_v48, 8  ;;  %vm10328_vm15 = vnez %v10327_v51  ;;  %vm10331_vm11 = vnez %v10330_v28  ;;  %vm10338_vm3 = vcmp.lt.s32.totalorder %v7091_v29, 8 }
 0x22b   :  { %vm10323_vm14 = vmmov %vm10310_vm0  ;;  %v2264_v1 = vpack.c.bf16 %v2254_v35, %v2253_v19  ;;  %v2265_v63 = vpack.c.bf16 %v2256_v37, %v2255_v42  ;;  %v7901_v55 = vsel %vm10328_vm15, 1.0, %v6886_v6  ;;  %v7906_v47 = vsel %vm10331_vm11, 1.0, %v6886_v6 }
 0x22c   :  { %5317 = vmatmul.mubr.msk.bf16.gmra.mxu1 %vm10316_vm2, %v2262_v61  ;;  %vm10324_vm10 = vmmov %vm10310_vm0  ;;  %10329 = vst [vmem:[#allocation96_spill] sm:$0xff] %v7901_v55  ;;  %v2257_v24 = vmul.f32 %v7901_v55, %v7338_v44  ;;  %v2258_v57 = vmul.f32 %v7906_v47, %v2130_v25  ;;  %vm10352_vm15 = vnez %v10244_v59  ;;  %v10365_v25 = vld [vmem:[#allocation105_spill] sm:$0xff] }
 0x22d   :  { %5320 = vmatprep.mubr.msk.bf16.mxu1 %vm10323_vm14, %v2263_v58  ;;  %vm2645_vm9 = vmand %vm7561_vm12, %vm10325_vm8  ;;  %10332 = vst [vmem:[#allocation97_spill] sm:$0xff] %v7906_v47  ;;  %v10339_v58 = vld [vmem:[#allocation44_spill] sm:$0xff] }
 0x22e   :  { %vm2646_vm0 = vmand %vm7568_vm1, %vm10326_vm7  ;;  %v7910_v48 = vsel %vm2645_vm9, 1.0, %v6886_v6  ;;  %vm10337_vm1 = vcmp.lt.s32.totalorder %v7080_v50, 8  ;;  %v2266_v54 = vpack.c.bf16 %v2258_v57, %v2257_v24  ;;  %vm10340_vm14 = vnez %v10339_v58  ;;  %v10376_v58 = vld [vmem:[#allocation108_spill] sm:$0xff] }
 0x22f   :  { %vm10333_vm4 = vmmov %vm10316_vm2  ;;  %10334 = vst [vmem:[#allocation147_spill] sm:$0xff] %v7910_v48  ;;  %v7913_v21 = vsel %vm2646_vm0, 1.0, %v6886_v6  ;;  %v2693_v14 = vmul.f32 %v7910_v48, %v7201_v8  ;;  %v7934_v60 = vsel %vm10340_vm14, 1.0, %v6886_v6  ;;  %v10342_v8 = vld [vmem:[#allocation46_spill] sm:$0xff]  ;;  %vm10350_vm9 = vnez %v10242_v46 }
 0x230   :  { %5343 = vmatmul.mubr.msk.bf16.gmra.mxu0 %vm10324_vm10, %v2483_v2  ;;  %10335 = vst [vmem:[#allocation148_spill] sm:$0xff] %v7913_v21  ;;  %vm10336_vm12 = vmmov %vm10316_vm2  ;;  %v2694_v61 = vmul.f32 %v7913_v21, %v7203_v17  ;;  %vm10343_vm10 = vnez %v10342_v8  ;;  %v2695_v33 = vmul.f32 %v7934_v60, %v7207_v10  ;;  %vm10351_vm0 = vcmp.lt.s32.totalorder %v7174_v16, 8  ;;  %v10358_v16 = vld [vmem:[#allocation103_spill] sm:$0xff] }
 0x231   :  { %vm2649_vm2 = vmand %vm7616_vm13, %vm10337_vm1  ;;  %10341 = vst [vmem:[#allocation44_spill] sm:$0xff] %v7934_v60  ;;  %v7939_v17 = vsel %vm10343_vm10, 1.0, %v6886_v6  ;;  %vm10359_vm1 = vnez %v10358_v16 }
 0x232   :  { %vm2650_vm5 = vmand %vm7622_vm6, %vm10338_vm3  ;;  %v2709_v44 = vpack.c.bf16 %v2694_v61, %v2693_v14  ;;  %10344 = vst [vmem:[#allocation46_spill] sm:$0xff] %v7939_v17  ;;  %v7943_v50 = vsel %vm2649_vm2, 1.0, %v6886_v6  ;;  %v2696_v7 = vmul.f32 %v7939_v17, %v7209_v36  ;;  %vm10349_vm6 = vcmp.lt.s32.totalorder %v7151_v52, 8  ;;  %v10355_v52 = vld [vmem:[#allocation102_spill] sm:$0xff] }
 0x233   :  { %vm10345_vm8 = vmmov %vm10333_vm4  ;;  %10346 = vst [vmem:[#allocation149_spill] sm:$0xff] %v7943_v50  ;;  %v7946_v29 = vsel %vm2650_vm5, 1.0, %v6886_v6  ;;  %v2697_v12 = vmul.f32 %v7943_v50, %v7295_v22  ;;  %v7980_v59 = vsel %vm10359_vm1, 1.0, %v6886_v6  ;;  %vm10366_vm5 = vnez %v10365_v25 }
 0x234   :  { %5321 = vmatmul.mubr.msk.bf16.gmra.mxu1 %vm10333_vm4, %v2264_v1  ;;  %10347 = vst [vmem:[#allocation150_spill] sm:$0xff] %v7946_v29  ;;  %vm10348_vm13 = vmmov %vm10333_vm4  ;;  %v2698_v23 = vmul.f32 %v7946_v29, %v7297_v34  ;;  %v2710_v10 = vpack.c.bf16 %v2696_v7, %v2695_v33  ;;  %v2702_v35 = vmul.f32 %v7980_v59, %v7396_v30  ;;  %v10362_v1 = vld [vmem:[#allocation104_spill] sm:$0xff]  ;;  %v10372_v30 = vld [vmem:[#allocation107_spill] sm:$0xff] }
 0x235   :  { %5324 = vmatprep.mubr.msk.bf16.mxu1 %vm10336_vm12, %v2265_v63  ;;  %vm2651_vm7 = vmand %vm10350_vm9, %vm10349_vm6  ;;  %vm10356_vm12 = vnez %v10355_v52  ;;  %10360 = vst [vmem:[#allocation103_spill] sm:$0xff] %v7980_v59  ;;  %vm10363_vm3 = vnez %v10362_v1  ;;  %vm10377_vm6 = vnez %v10376_v58  ;;  %v10379_v33 = vld [vmem:[#allocation109_spill] sm:$0xff] }
 0x236   :  { %vm2652_vm11 = vmand %vm10352_vm15, %vm10351_vm0  ;;  %v2711_v45 = vpack.c.bf16 %v2698_v23, %v2697_v12  ;;  %v7966_v36 = vsel %vm2651_vm7, 1.0, %v6886_v6  ;;  %v7975_v34 = vsel %vm10356_vm12, 1.0, %v6886_v6  ;;  %v7994_v63 = vsel %vm10363_vm3, 1.0, %v6886_v6 }
 0x237   :  { %10353 = vst [vmem:[#allocation151_spill] sm:$0xff] %v7966_v36  ;;  %v7969_v22 = vsel %vm2652_vm11, 1.0, %v6886_v6  ;;  %10357 = vst [vmem:[#allocation102_spill] sm:$0xff] %v7975_v34  ;;  %v2699_v46 = vmul.f32 %v7966_v36, %v7305_v56  ;;  %v2701_v19 = vmul.f32 %v7975_v34, %v7394_v9  ;;  %v7999_v56 = vsel %vm10366_vm5, 1.0, %v6886_v6 }
 0x238   :  { %10354 = vst [vmem:[#allocation152_spill] sm:$0xff] %v7969_v22  ;;  %vm10361_vm2 = vmmov %vm10333_vm4  ;;  %v2700_v2 = vmul.f32 %v7969_v22, %v7307_v62  ;;  %v10369_v62 = vld [vmem:[#allocation106_spill] sm:$0xff]  ;;  %v2703_v28 = vmul.f32 %v7994_v63, %v7404_v20  ;;  %v2704_v24 = vmul.f32 %v7999_v56, %v7406_v4  ;;  %v8024_v8 = vsel %vm10377_vm6, 1.0, %v6886_v6 }
 0x239   :  { %v2713_v37 = vpack.c.bf16 %v2702_v35, %v2701_v19  ;;  %10364 = vst [vmem:[#allocation104_spill] sm:$0xff] %v7994_v63  ;;  %10367 = vst [vmem:[#allocation105_spill] sm:$0xff] %v7999_v56  ;;  %vm10370_vm10 = vnez %v10369_v62  ;;  %vm10380_vm9 = vnez %v10379_v33  ;;  %v2707_v4 = vmul.f32 %v8024_v8, %v7577_v38 }
 0x23a   :  { %v2712_v42 = vpack.c.bf16 %v2700_v2, %v2699_v46  ;;  %vm10368_vm14 = vmmov %vm10361_vm2  ;;  %v8005_v9 = vsel %vm10370_vm10, 1.0, %v6886_v6  ;;  %v2714_v61 = vpack.c.bf16 %v2704_v24, %v2703_v28  ;;  %10378 = vst [vmem:[#allocation108_spill] sm:$0xff] %v8024_v8  ;;  %v4939_v20 = vsel %vm10380_vm9, 1.0, %v6886_v6 }
 0x23b   :  { %10371 = vst [vmem:[#allocation106_spill] sm:$0xff] %v8005_v9  ;;  %v2705_v57 = vmul.f32 %v8005_v9, %v7466_v18  ;;  %vm10381_vm7 = vmmov %vm10361_vm2  ;;  %vm3166_vm11 = vcmask 1043456  }
 0x23c   :  { %5325 = vmatmul.mubr.msk.bf16.gmra.mxu1 %vm10345_vm8, %v2266_v54  ;;  %vm10373_vm8 = vnez %v10372_v30  ;;  %vm10382_vm0 = vmmov %vm10361_vm2 }
 0x23d   :  { %5348 = vmatprep.mubr.msk.bf16.mxu1 %vm10348_vm13, %v2709_v44  ;;  %v8010_v51 = vsel %vm10373_vm8, 1.0, %v6886_v6  ;;  %vm10375_vm13 = vmmov %vm10361_vm2  ;;  %v2644_v44 = vld [vmem:[#allocation2 + $0x91] sm:$0xff] }
 0x23e   :  { %10374 = vst [vmem:[#allocation107_spill] sm:$0xff] %v8010_v51  ;;  %v2706_v14 = vmul.f32 %v8010_v51, %v7468_v53  ;;  %v8033_v18 = vmul.f32 %v4939_v20, %v2644_v44  ;;  %vm10384_vm15 = vmmov %vm10382_vm0 }
 0x240   :  { %v2715_v54 = vpack.c.bf16 %v2706_v14, %v2705_v57  ;;  %10383 = vst [vmem:[#allocation109_spill] sm:$0xff] %v8033_v18  ;;  %v2716_v53 = vpack.c.bf16 %v8033_v18, %v2707_v4 }
 0x244   :  { %5349 = vmatmul.mubr.msk.bf16.vlgmr.msra.gmra.mxu1 %vm10333_vm4, %v2710_v10  ;;  %vm3141_vm4 = vcmask 64512  }
 0x245   :  { %5352 = vmatprep.mubr.msk.bf16.mxu1 %vm10361_vm2, %v2711_v45 }
 0x24c   :  { %5353 = vmatmul.mubr.msk.bf16.gmra.mxu1 %vm10368_vm14, %v2712_v42 }
 0x24d   :  { %5356 = vmatprep.mubr.msk.bf16.mxu1 %vm10375_vm13, %v2713_v37 }
 0x254   :  { %5357 = vmatmul.mubr.msk.bf16.gmra.mxu1 %vm10381_vm7, %v2714_v61 }
 0x255   :  { %5360 = vmatprep.mubr.msk.bf16.mxu1 %vm10382_vm0, %v2715_v54 }
 0x25c   :  { %5361 = vmatmul.mubr.msk.bf16.gmra.mxu1 %vm10384_vm15, %v2716_v53 }
 0x279   :  { %v5206_v7 = vpop.f32.mrf.mxu1 }
 0x27b   :  { %v1025_v12 = vpop.f32.mrf.mxu1 }
 0x27d   :  { %v5207_v10 = vpop.f32.mrf.mxu1 }
 0x27f   :  { %v8037_v6 = vpop.f32.mrf.mxu1 }
 0x280   :  { %v5224_v23 = vpop.f32.mrf.mxu0 }
 0x281   :  { %v1161_v45 = vadd.f32 %v5224_v23, %v5206_v7  ;;  %v5210_v2 = vpop.f32.mrf.mxu1 }
 0x282   :  { %v1152_v52 = vpop.f32.mrf.mxu0 }
 0x283   :  { %v1153_v16 = vadd.f32 %v1152_v52, %v1025_v12  ;;  %v1041_v38 = vpop.f32.mrf.mxu1 }
 0x284   :  { %v5225_v46 = vpop.f32.mrf.mxu0 }
 0x285   :  { %v1164_v19 = vadd.f32 %v5225_v46, %v5207_v10  ;;  %v5211_v37 = vpop.f32.mrf.mxu1 }
 0x286   :  { %v8039_v35 = vpop.f32.mrf.mxu0 }
 0x287   :  { %v8041_v62 = vpop.f32.mrf.mxu1 }
 0x288   :  { %v5228_v42 = vpop.f32.mrf.mxu0 }
 0x289   :  { %v1177_v1 = vadd.f32 %v5228_v42, %v5210_v2  ;;  %v5214_v24 = vpop.f32.mrf.mxu1 }
 0x28a   :  { %v1168_v25 = vpop.f32.mrf.mxu0 }
 0x28b   :  { %v1169_v30 = vadd.f32 %v1168_v25, %v1041_v38  ;;  %v1057_v61 = vpop.f32.mrf.mxu1 }
 0x28c   :  { %v5229_v28 = vpop.f32.mrf.mxu0 }
 0x28d   :  { %v1180_v57 = vadd.f32 %v5229_v28, %v5211_v37  ;;  %v5215_v44 = vpop.f32.mrf.mxu1 }
 0x28e   :  { %v8043_v14 = vpop.f32.mrf.mxu0 }
 0x28f   :  { %v8045_v20 = vpop.f32.mrf.mxu1 }
 0x290   :  { %v5232_v54 = vpop.f32.mrf.mxu0 }
 0x291   :  { %v1193_v58 = vadd.f32 %v5232_v54, %v5214_v24  ;;  %v5218_v7 = vpop.f32.mrf.mxu1 }
 0x292   :  { %v1184_v33 = vpop.f32.mrf.mxu0 }
 0x293   :  { %v1185_v4 = vadd.f32 %v1184_v33, %v1057_v61  ;;  %v1073_v10 = vpop.f32.mrf.mxu1 }
 0x294   :  { %v5233_v53 = vpop.f32.mrf.mxu0 }
 0x295   :  { %v1196_v12 = vadd.f32 %v5233_v53, %v5215_v44  ;;  %v5219_v46 = vpop.f32.mrf.mxu1 }
 0x296   :  { %v8047_v23 = vpop.f32.mrf.mxu0 }
 0x297   :  { %v8051_v38 = vpop.f32.mrf.mxu1 }
 0x298   :  { %v5260_v52 = vpop.f32.mrf.mxu0 }
 0x29a   :  { %v8049_v2 = vpop.f32.mrf.mxu0 }
 0x29c   :  { %v8053_v42 = vpop.f32.mrf.mxu0  ;;  %v5236_v37 = vpop.f32.mrf.mxu1 }
 0x29d   :  { %v1209_v25 = vadd.f32 %v5236_v37, %v5218_v7 }
 0x29e   :  { %v8055_v28 = vpop.f32.mrf.mxu0  ;;  %v1200_v24 = vpop.f32.mrf.mxu1 }
 0x29f   :  { %v1201_v61 = vadd.f32 %v1200_v24, %v1073_v10 }
 0x2a0   :  { %v5264_v54 = vpop.f32.mrf.mxu0  ;;  %v5237_v33 = vpop.f32.mrf.mxu1 }
 0x2a1   :  { %v1212_v44 = vadd.f32 %v5237_v33, %v5219_v46 }
 0x2a2   :  { %v8057_v53 = vpop.f32.mrf.mxu0  ;;  %v8059_v18 = vpop.f32.mrf.mxu1 }
 0x2a4   :  { %v8061_v8 = vpop.f32.mrf.mxu0  ;;  %v5242_v32 = vpop.f32.mrf.mxu1 }
 0x2a5   :  { %v1498_v41 = vadd.f32 %v5242_v32, %v1161_v45 }
 0x2a6   :  { %v8063_v47 = vpop.f32.mrf.mxu0  ;;  %v1433_v55 = vpop.f32.mrf.mxu1 }
 0x2a7   :  { %v8065_v51 = vadd.f32 %v1433_v55, %v1153_v16  ;;  %v1715_v7 = vadd.f32 %v5260_v52, %v1498_v41 }
 0x2a8   :  { %v5268_v37 = vpop.f32.mrf.mxu0  ;;  %v5243_v9 = vpop.f32.mrf.mxu1 }
 0x2a9   :  { %v8067_v10 = vadd.f32 %v5243_v9, %v1164_v19 }
 0x2aa   :  { %v8069_v24 = vpop.f32.mrf.mxu0  ;;  %v8071_v46 = vpop.f32.mrf.mxu1 }
 0x2ac   :  { %v8073_v33 = vpop.f32.mrf.mxu0  ;;  %v5246_v56 = vpop.f32.mrf.mxu1 }
 0x2ad   :  { %v1502_v63 = vadd.f32 %v5246_v56, %v1177_v1 }
 0x2ae   :  { %v8075_v59 = vpop.f32.mrf.mxu0  ;;  %v1449_v32 = vpop.f32.mrf.mxu1 }
 0x2af   :  { %v8077_v45 = vadd.f32 %v1449_v32, %v1169_v30  ;;  %v1719_v55 = vadd.f32 %v5264_v54, %v1502_v63 }
 0x2b0   :  { %v5272_v16 = vpop.f32.mrf.mxu0  ;;  %v5247_v41 = vpop.f32.mrf.mxu1 }
 0x2b1   :  { %v8079_v52 = vadd.f32 %v5247_v41, %v1180_v57 }
 0x2b2   :  { %v8081_v9 = vpop.f32.mrf.mxu0  ;;  %v8083_v19 = vpop.f32.mrf.mxu1 }
 0x2b4   :  { %v8085_v34 = vpop.f32.mrf.mxu0  ;;  %v5250_v22 = vpop.f32.mrf.mxu1 }
 0x2b5   :  { %10385 = vst [vmem:[#allocation153_spill] sm:$0xff] %v8085_v34  ;;  %v1506_v36 = vadd.f32 %v5250_v22, %v1193_v58 }
 0x2b6   :  { %v8087_v29 = vpop.f32.mrf.mxu0  ;;  %v1465_v56 = vpop.f32.mrf.mxu1 }
 0x2b7   :  { %10386 = vst [vmem:[#allocation154_spill] sm:$0xff] %v8087_v29  ;;  %v8089_v1 = vadd.f32 %v1465_v56, %v1185_v4  ;;  %v1723_v30 = vadd.f32 %v5268_v37, %v1506_v36 }
 0x2b8   :  { %v8091_v32 = vpop.f32.mrf.mxu0  ;;  %v5251_v63 = vpop.f32.mrf.mxu1 }
 0x2b9   :  { %v8093_v54 = vadd.f32 %v5251_v63, %v1196_v12 }
 0x2ba   :  { %v8095_v57 = vpop.f32.mrf.mxu0  ;;  %v8097_v41 = vpop.f32.mrf.mxu1 }
 0x2bc   :  { %v8099_v50 = vpop.f32.mrf.mxu0  ;;  %v5254_v17 = vpop.f32.mrf.mxu1 }
 0x2bd   :  { %v1510_v60 = vadd.f32 %v5254_v17, %v1209_v25 }
 0x2be   :  { %v8101_v22 = vpop.f32.mrf.mxu0  ;;  %v1481_v58 = vpop.f32.mrf.mxu1 }
 0x2bf   :  { %v8103_v21 = vadd.f32 %v1481_v58, %v1201_v61  ;;  %v1727_v4 = vadd.f32 %v5272_v16, %v1510_v60 }
 0x2c0   :  { %v8105_v36 = vpop.f32.mrf.mxu0  ;;  %v5255_v37 = vpop.f32.mrf.mxu1 }
 0x2c1   :  { %v8107_v56 = vadd.f32 %v5255_v37, %v1212_v44 }
 0x2c2   :  { %v8109_v12 = vpop.f32.mrf.mxu0  ;;  %v8111_v63 = vpop.f32.mrf.mxu1 }
 0x2c3   :  { %10387 = vst [vmem:[#allocation155_spill] sm:$0xff] %v8107_v56  ;;  %10388 = vst [vmem:[#allocation156_spill] sm:$0xff] %v8111_v63 }
 0x2c4   :  { %v8113_v48 = vpop.f32.mrf.mxu0  ;;  %v5278_v27 = vpop.f32.mrf.mxu1 }
 0x2c5   :  { %10389 = vst [vmem:[#allocation157_spill] sm:$0xff] %v8113_v48  ;;  %v8115_v26 = vadd.f32 %v5278_v27, %v1715_v7 }
 0x2c6   :  { %v8117_v17 = vpop.f32.mrf.mxu0  ;;  %v1819_v25 = vpop.f32.mrf.mxu1 }
 0x2c8   :  { %v8119_v61 = vpop.f32.mrf.mxu0  ;;  %v5279_v60 = vpop.f32.mrf.mxu1 }
 0x2c9   :  { %10390 = vst [vmem:[#allocation158_spill] sm:$0xff] %v8119_v61 }
 0x2ca   :  { %v8121_v16 = vpop.f32.mrf.mxu0  ;;  %v1822_v58 = vpop.f32.mrf.mxu1 }
 0x2cb   :  { %10391 = vst [vmem:[#allocation159_spill] sm:$0xff] %v8121_v16 }
 0x2cc   :  { %v8123_v44 = vpop.f32.mrf.mxu0  ;;  %v5282_v37 = vpop.f32.mrf.mxu1 }
 0x2cd   :  { %10392 = vst [vmem:[#allocation160_spill] sm:$0xff] %v8123_v44  ;;  %v8125_v15 = vadd.f32 %v5282_v37, %v1719_v55 }
 0x2ce   :  { %v1835_v31 = vpop.f32.mrf.mxu1  ;;  %v8127_v13 = vpop.f32.mrf.mxu0 }
 0x2cf   :  { %10393 = vst [vmem:[#allocation161_spill] sm:$0xff] %v8127_v13 }
 0x2d0   :  { %v8129_v0 = vpop.f32.mrf.mxu1  ;;  %v8133_v7 = vpop.f32.mrf.mxu0 }
 0x2d1   :  { %10394 = vst [vmem:[#allocation162_spill] sm:$0xff] %v8133_v7 }
 0x2d2   :  { %v8131_v27 = vpop.f32.mrf.mxu1  ;;  %v8139_v5 = vpop.f32.mrf.mxu0 }
 0x2d3   :  { %10396 = vst [vmem:[#allocation164_spill] sm:$0xff] %v8139_v5 }
 0x2d4   :  { %v5286_v3 = vpop.f32.mrf.mxu1  ;;  %v8145_v37 = vpop.f32.mrf.mxu0 }
 0x2d5   :  { %v8135_v11 = vadd.f32 %v5286_v3, %v1723_v30  ;;  %10399 = vst [vmem:[#allocation167_spill] sm:$0xff] %v8145_v37 }
 0x2d6   :  { %v8137_v43 = vpop.f32.mrf.mxu1  ;;  %v8151_v56 = vpop.f32.mrf.mxu0 }
 0x2d7   :  { %10395 = vst [vmem:[#allocation163_spill] sm:$0xff] %v8135_v11  ;;  %10402 = vst [vmem:[#allocation170_spill] sm:$0xff] %v8151_v56  ;;  %v1156_v11 = vadd.f32 %v8039_v35, %v8037_v6  ;;  %v1172_v6 = vadd.f32 %v8043_v14, %v8041_v62  ;;  %v2101_v62 = vadd.f32 %v8091_v32, %v8115_v26 }
 0x2d8   :  { %v8141_v49 = vpop.f32.mrf.mxu1  ;;  %v5332_v30 = vpop.f32.mrf.mxu0  ;;  %v1720_v26 = vadd.f32 %v8061_v8, %v8079_v52 }
 0x2d9   :  { %10397 = vst [vmem:[#allocation165_spill] sm:$0xff] %v8141_v49  ;;  %v1497_v63 = vadd.f32 %v8071_v46, %v1156_v11  ;;  %v1716_v11 = vadd.f32 %v8053_v42, %v8067_v10  ;;  %v1717_v46 = vadd.f32 %v8057_v53, %v8077_v45  ;;  %v1188_v53 = vadd.f32 %v8047_v23, %v8045_v20 }
 0x2da   :  { %v8143_v55 = vpop.f32.mrf.mxu1  ;;  %v2550_v29 = vpop.f32.mrf.mxu0 }
 0x2db   :  { %10398 = vst [vmem:[#allocation166_spill] sm:$0xff] %v8143_v55 }
 0x2dc   :  { %v5290_v40 = vpop.f32.mrf.mxu1  ;;  %v8157_v61 = vpop.f32.mrf.mxu0 }
 0x2dd   :  { %v8147_v39 = vadd.f32 %v5290_v40, %v1727_v4 }
 0x2de   :  { %v8149_v34 = vpop.f32.mrf.mxu1  ;;  %v2553_v4 = vpop.f32.mrf.mxu0 }
 0x2df   :  { %10400 = vst [vmem:[#allocation168_spill] sm:$0xff] %v8147_v39  ;;  %10401 = vst [vmem:[#allocation169_spill] sm:$0xff] %v8149_v34 }
 0x2e0   :  { %v8153_v7 = vpop.f32.mrf.mxu1  ;;  %v8165_v56 = vpop.f32.mrf.mxu0 }
 0x2e1   :  { %10403 = vst [vmem:[#allocation171_spill] sm:$0xff] %v8153_v7  ;;  %10408 = vst [vmem:[#allocation176_spill] sm:$0xff] %v8165_v56 }
 0x2e2   :  { %v8155_v3 = vpop.f32.mrf.mxu1  ;;  %v2566_v16 = vpop.f32.mrf.mxu0 }
 0x2e3   :  { %10404 = vst [vmem:[#allocation172_spill] sm:$0xff] %v8155_v3 }
 0x2e4   :  { %v5314_v44 = vpop.f32.mrf.mxu1 }
 0x2e6   :  { %v2333_v5 = vpop.f32.mrf.mxu1 }
 0x2e8   :  { %v5315_v13 = vpop.f32.mrf.mxu1 }
 0x2ea   :  { %v2336_v49 = vpop.f32.mrf.mxu1 }
 0x2ec   :  { %v8159_v37 = vpop.f32.mrf.mxu1 }
 0x2ed   :  { %10405 = vst [vmem:[#allocation173_spill] sm:$0xff] %v8159_v37 }
 0x2ee   :  { %v2349_v40 = vpop.f32.mrf.mxu1 }
 0x2f0   :  { %v8161_v39 = vpop.f32.mrf.mxu1 }
 0x2f1   :  { %10406 = vst [vmem:[#allocation174_spill] sm:$0xff] %v8161_v39  ;;  %v1713_v39 = vadd.f32 %v8049_v2, %v8065_v51 }
 0x2f2   :  { %v8163_v34 = vpop.f32.mrf.mxu1 }
 0x2f3   :  { %10407 = vst [vmem:[#allocation175_spill] sm:$0xff] %v8163_v34  ;;  %v8180_v34 = vpop.f32.mrf.mxu0 }
 0x2f4   :  { %v8167_v7 = vpop.f32.mrf.mxu1 }
 0x2f5   :  { %10409 = vst [vmem:[#allocation177_spill] sm:$0xff] %v8167_v7  ;;  %v1882_v7 = vadd.f32 %v1819_v25, %v1713_v39  ;;  %v8193_v51 = vpop.f32.mrf.mxu0  ;;  %v1501_v39 = vadd.f32 %v8083_v19, %v1172_v6  ;;  %v1885_v25 = vadd.f32 %v5279_v60, %v1716_v11  ;;  %v2398_v60 = vadd.f32 %v5314_v44, %v2101_v62 }
 0x2f6   :  { %v8169_v3 = vpop.f32.mrf.mxu1 }
 0x2f7   :  { %10410 = vst [vmem:[#allocation178_spill] sm:$0xff] %v8169_v3  ;;  %v1714_v3 = vadd.f32 %v8055_v28, %v1497_v63  ;;  %v2099_v28 = vadd.f32 %v8095_v57, %v1882_v7  ;;  %v1886_v63 = vadd.f32 %v1835_v31, %v1717_v46  ;;  %v8206_v10 = vpop.f32.mrf.mxu0  ;;  %v1718_v19 = vadd.f32 %v8063_v47, %v1501_v39  ;;  %v10416_v46 = vld [vmem:[#allocation166_spill] sm:$0xff] }
 0x2f8   :  { %v8173_v55 = vpop.f32.mrf.mxu1  ;;  %v2102_v57 = vadd.f32 %v8099_v50, %v1885_v25  ;;  %v1889_v7 = vadd.f32 %v8129_v0, %v1720_v26  ;;  %v1721_v47 = vadd.f32 %v8069_v24, %v8089_v1  ;;  %v2615_v8 = vadd.f32 %v5332_v30, %v2398_v60  ;;  %v10417_v25 = vld [vmem:[#allocation174_spill] sm:$0xff] }
 0x2f9   :  { %v1883_v35 = vadd.f32 %v1822_v58, %v1714_v3  ;;  %v2396_v14 = vadd.f32 %v2333_v5, %v2099_v28  ;;  %v1505_v58 = vadd.f32 %v8097_v41, %v1188_v53  ;;  %v2103_v5 = vadd.f32 %v8109_v12, %v1886_v63  ;;  %v8218_v44 = vpop.f32.mrf.mxu0  ;;  %v10418_v63 = vld [vmem:[#allocation159_spill] sm:$0xff] }
 0x2fa   :  { %v8176_v48 = vpop.f32.mrf.mxu1  ;;  %v2399_v20 = vadd.f32 %v5315_v13, %v2102_v57  ;;  %v1204_v41 = vadd.f32 %v8059_v18, %v8051_v38  ;;  %v1890_v3 = vadd.f32 %v8137_v43, %v1721_v47  ;;  %v1724_v13 = vadd.f32 %v8073_v33, %v8093_v54  ;;  %v10412_v43 = vld [vmem:[#allocation173_spill] sm:$0xff] }
 0x2fb   :  { %v2100_v42 = vadd.f32 %v8101_v22, %v1883_v35  ;;  %v1887_v22 = vadd.f32 %v8131_v27, %v1718_v19  ;;  %v2613_v23 = vadd.f32 %v2550_v29, %v2396_v14  ;;  %v1722_v0 = vadd.f32 %v8075_v59, %v1505_v58  ;;  %v8232_v30 = vpop.f32.mrf.mxu0  ;;  %v10413_v33 = vld [vmem:[#allocation157_spill] sm:$0xff] }
 0x2fc   :  { %v8182_v56 = vpop.f32.mrf.mxu1  ;;  %v2105_v29 = vadd.f32 %v8105_v36, %v8125_v15  ;;  %v1725_v38 = vadd.f32 %v8081_v9, %v8103_v21  ;;  %v2106_v54 = vadd.f32 %v10413_v33, %v1889_v7  ;;  %v8239_v15 = vld [vmem:[%s9431_s5] ss:$0 sm:$0xff]  ;;  %v2107_v62 = vadd.f32 %v10418_v63, %v1890_v3  ;;  %v10421_v57 = vld [vmem:[#allocation165_spill] sm:$0xff]  ;;  %v3099_v7 = vld [vmem:[#allocation12] sm:$0xf] }
 0x2fd   :  { %10411 = vst [vmem:[#allocation179_spill] sm:$0xff] %v8182_v56  ;;  %v2397_v31 = vadd.f32 %v2336_v49, %v2100_v42  ;;  %v2400_v49 = vadd.f32 %v2349_v40, %v2103_v5  ;;  %v2104_v1 = vadd.f32 %v8117_v17, %v1887_v22  ;;  %v2616_v40 = vadd.f32 %v8157_v61, %v2399_v20  ;;  %v10414_v17 = vld [vmem:[#allocation175_spill] sm:$0xff]  ;;  %v10415_v9 = vld [vmem:[#allocation156_spill] sm:$0xff]  ;;  %v2585_v58 = vpop.f32.mrf.mxu0 }
 0x2fe   :  { %v8185_v37 = vpop.f32.mrf.mxu1  ;;  %v1509_v35 = vadd.f32 %v10415_v9, %v1204_v41  ;;  %v1891_v39 = vadd.f32 %v10416_v46, %v1722_v0  ;;  %v2403_v28 = vadd.f32 %v10417_v25, %v2106_v54  ;;  %v10419_v42 = vld [vmem:[#allocation163_spill] sm:$0xff]  ;;  %v10422_v26 = vld [vmem:[#allocation178_spill] sm:$0xff]  ;;  %5529 = vmatprep.subr.msk.bf16.mxu1 %vm3166_vm11, %v3099_v7  ;;  %v10428_v33 = vld [vmem:[#allocation160_spill] sm:$0xff] }
 0x2ff   :  { %v2614_v12 = vadd.f32 %v2553_v4, %v2397_v31  ;;  %v2402_v4 = vadd.f32 %v10412_v43, %v2105_v29  ;;  %v2617_v36 = vadd.f32 %v2566_v16, %v2400_v49  ;;  %v2401_v6 = vadd.f32 %v10414_v17, %v2104_v1  ;;  %v10420_v16 = vld [vmem:[#allocation158_spill] sm:$0xff]  ;;  %v5344_v43 = vpop.f32.mrf.mxu0  ;;  %v8287_v9 = vld [vmem:[#allocation12 + $0x8] sm:$0xf]  ;;  %v10429_v46 = vld [vmem:[#allocation155_spill] sm:$0xff] }
 0x300   :  { %v8195_v2 = vpop.f32.mrf.mxu1  ;;  %v2109_v53 = vadd.f32 %v10420_v16, %v10419_v42  ;;  %v1893_v31 = vadd.f32 %v10421_v57, %v1724_v13  ;;  %v2404_v5 = vadd.f32 %v10422_v26, %v2107_v62  ;;  %v2620_v13 = vadd.f32 %v8180_v34, %v2403_v28  ;;  %v10431_v25 = vld [vmem:[#allocation172_spill] sm:$0xff] }
 0x301   :  { %v3292_v29 = vsel %vm3166_vm11, %v3099_v7, 0  ;;  %v10432_v62 = vld [vmem:[#allocation164_spill] sm:$0xff]  ;;  %v10436_v7 = vld [vmem:[#allocation170_spill] sm:$0xff] }
 0x302   :  { %v8199_v56 = vpop.f32.mrf.mxu1  ;;  %5383 = vmatpush3.bf16.msra.mxu1 %v3292_v29  ;;  %v2110_v54 = vadd.f32 %v10428_v33, %v1893_v31  ;;  %v10438_v29 = vld [vmem:[#allocation167_spill] sm:$0xff] }
 0x304   :  { %v5350_v45 = vpop.f32.mrf.mxu1  ;;  %v2407_v63 = vadd.f32 %v8173_v55, %v2110_v54 }
 0x305   :  { %v2848_v27 = vadd.f32 %v5350_v45, %v2615_v8  ;;  %v10424_v8 = vld [vmem:[#allocation169_spill] sm:$0xff] }
 0x306   :  { %v2783_v32 = vpop.f32.mrf.mxu1 }
 0x307   :  { %v2846_v52 = vadd.f32 %v2783_v32, %v2613_v23  ;;  %v8255_v45 = vadd.f32 %v8239_v15, %v2848_v27  ;;  %v10423_v32 = vld [vmem:[#allocation176_spill] sm:$0xff] }
 0x308   :  { %v5351_v50 = vpop.f32.mrf.mxu1  ;;  %v2619_v22 = vadd.f32 %v10423_v32, %v2402_v4  ;;  %v3140_v23 = vld [vmem:[#allocation12 + $0x4] sm:$0xf] }
 0x309   :  { %v8243_v61 = vadd.f32 %v8239_v15, %v2846_v52  ;;  %v2849_v11 = vadd.f32 %v5351_v50, %v2616_v40  ;;  %v2618_v50 = vadd.f32 %v8193_v51, %v2401_v6  ;;  %5528 = vmatprep.subr.msk.bf16.mxu0 %vm3166_vm11, %v3140_v23  ;;  %v3168_v41 = vsel %vm3166_vm11, %v3140_v23, 0  ;;  %v10426_v40 = vld [vmem:[#allocation154_spill] sm:$0xff] }
 0x30a   :  { %v2786_v24 = vpop.f32.mrf.mxu1  ;;  %v1894_v52 = vadd.f32 %v10424_v8, %v1725_v38  ;;  %5365 = vmatpush3.bf16.msra.mxu0 %v3168_v41  ;;  %v10427_v38 = vld [vmem:[#allocation177_spill] sm:$0xff] }
 0x30b   :  { %v2847_v18 = vadd.f32 %v2786_v24, %v2614_v12  ;;  %v8263_v47 = vadd.f32 %v8239_v15, %v2849_v11  ;;  %v10425_v12 = vld [vmem:[#allocation161_spill] sm:$0xff]  ;;  %v2406_v4 = vadd.f32 %v10427_v38, %v2109_v53  ;;  %5530 = vmatprep.subr.msk.bf16.mxu0 %vm3166_vm11, %v8287_v9  ;;  %v10433_v53 = vld [vmem:[#allocation171_spill] sm:$0xff] }
 0x30c   :  { %v5354_v59 = vpop.f32.mrf.mxu1  ;;  %v2108_v3 = vadd.f32 %v10425_v12, %v1891_v39 }
 0x30d   :  { %v8246_v21 = vadd.f32 %v8239_v15, %v2847_v18  ;;  %v2852_v24 = vadd.f32 %v5354_v59, %v2619_v22  ;;  %v1726_v18 = vadd.f32 %v10426_v40, %v1509_v35  ;;  %v10430_v35 = vld [vmem:[#allocation153_spill] sm:$0xff]  ;;  %v10434_v22 = vld [vmem:[#allocation168_spill] sm:$0xff] }
 0x30e   :  { %v2799_v14 = vpop.f32.mrf.mxu1  ;;  %v2405_v17 = vadd.f32 %v8176_v48, %v2108_v3  ;;  %v1728_v39 = vadd.f32 %v10430_v35, %v10429_v46 }
 0x30f   :  { %v2885_v19 = vadd.f32 %v8246_v21, %v8243_v61  ;;  %v2850_v60 = vadd.f32 %v2799_v14, %v2617_v36  ;;  %v2621_v36 = vadd.f32 %v8218_v44, %v2404_v5  ;;  %v1895_v28 = vadd.f32 %v10431_v25, %v1726_v18 }
 0x310   :  { %v5355_v20 = vpop.f32.mrf.mxu1  ;;  %v2111_v14 = vadd.f32 %v10432_v62, %v1894_v52  ;;  %v8297_v48 = vadd.f32 %v8239_v15, %v2852_v24  ;;  %v2623_v5 = vadd.f32 %v8206_v10, %v2406_v4  ;;  %v2622_v32 = vadd.f32 %v2585_v58, %v2405_v17 }
 0x311   :  { %v2886_v49 = vadd.f32 %v2885_v19, %v8255_v45  ;;  %v8275_v1 = vadd.f32 %v8239_v15, %v2850_v60  ;;  %v2853_v6 = vadd.f32 %v5355_v20, %v2620_v13  ;;  %v1897_v19 = vadd.f32 %v10433_v53, %v1728_v39  ;;  %v2598_v60 = vpop.f32.mrf.mxu0  ;;  %v10435_v20 = vld [vmem:[#allocation162_spill] sm:$0xff]  ;;  %v10437_v13 = vld [vmem:[#allocation179_spill] sm:$0xff] }
 0x312   :  { %v2802_v0 = vpop.f32.mrf.mxu1  ;;  %v2408_v57 = vadd.f32 %v8185_v37, %v2111_v14  ;;  %v2113_v23 = vadd.f32 %v10435_v20, %v10434_v22 }
 0x313   :  { %v2887_v51 = vadd.f32 %v2886_v49, %v8263_v47  ;;  %v2851_v27 = vadd.f32 %v2802_v0, %v2618_v50  ;;  %v2876_v55 = vadd.f32 %v8239_v15, %v2853_v6  ;;  %v2112_v49 = vadd.f32 %v10436_v7, %v1895_v28  ;;  %v5345_v3 = vpop.f32.mrf.mxu0 }
 0x314   :  { %v5358_v34 = vpop.f32.mrf.mxu1  ;;  %v2624_v50 = vadd.f32 %v8232_v30, %v2407_v63  ;;  %v2410_v0 = vadd.f32 %v10437_v13, %v2113_v23  ;;  %v2114_v24 = vadd.f32 %v10438_v29, %v1897_v19  ;;  %v2625_v58 = vadd.f32 %v2598_v60, %v2408_v57  ;;  %v8321_v57 = vld [vmem:[#allocation12 + $0xc] sm:$0xf] }
 0x315   :  { %v2888_v59 = vadd.f32 %v2887_v51, %v8275_v1  ;;  %v8285_v11 = vadd.f32 %v8239_v15, %v2851_v27  ;;  %v2856_v8 = vadd.f32 %v5358_v34, %v2623_v5  ;;  %v2409_v51 = vadd.f32 %v8199_v56, %v2112_v49  ;;  %v2601_v34 = vpop.f32.mrf.mxu0  ;;  %5531 = vmatprep.subr.msk.bf16.mxu1 %vm3166_vm11, %v8321_v57 }
 0x316   :  { %v2815_v44 = vpop.f32.mrf.mxu1  ;;  %v2411_v30 = vadd.f32 %v8195_v2, %v2114_v24  ;;  %v2627_v6 = vadd.f32 %v5344_v43, %v2410_v0 }
 0x317   :  { %v2889_v42 = vadd.f32 %v2888_v59, %v8285_v11  ;;  %v2854_v16 = vadd.f32 %v2815_v44, %v2621_v36  ;;  %v2879_v4 = vadd.f32 %v8239_v15, %v2856_v8  ;;  %v2626_v46 = vadd.f32 %v2601_v34, %v2409_v51 }
 0x318   :  { %v5359_v31 = vpop.f32.mrf.mxu1  ;;  %v2628_v35 = vadd.f32 %v5345_v3, %v2411_v30 }
 0x319   :  { %v2890_v26 = vadd.f32 %v2889_v42, %v8297_v48  ;;  %v2877_v52 = vadd.f32 %v8239_v15, %v2854_v16  ;;  %v2857_v40 = vadd.f32 %v5359_v31, %v2624_v50 }
 0x31a   :  { %v2818_v41 = vpop.f32.mrf.mxu1 }
 0x31b   :  { %v2891_v37 = vadd.f32 %v2890_v26, %v2876_v55  ;;  %v2855_v12 = vadd.f32 %v2818_v41, %v2622_v32  ;;  %v2880_v17 = vadd.f32 %v8239_v15, %v2857_v40 }
 0x31c   :  { %v5362_v10 = vpop.f32.mrf.mxu1 }
 0x31d   :  { %v2892_v27 = vadd.f32 %v2891_v37, %v2877_v52  ;;  %v2878_v18 = vadd.f32 %v8239_v15, %v2855_v12  ;;  %v2860_v39 = vadd.f32 %v5362_v10, %v2627_v6 }
 0x31e   :  { %v2831_v38 = vpop.f32.mrf.mxu1 }
 0x31f   :  { %v2893_v33 = vadd.f32 %v2892_v27, %v2878_v18  ;;  %v2858_v54 = vadd.f32 %v2831_v38, %v2625_v58  ;;  %v2883_v44 = vadd.f32 %v8239_v15, %v2860_v39 }
 0x320   :  { %v5363_v36 = vpop.f32.mrf.mxu1 }
 0x321   :  { %v2894_v59 = vadd.f32 %v2893_v33, %v2879_v4  ;;  %v2881_v25 = vadd.f32 %v8239_v15, %v2858_v54  ;;  %v2861_v62 = vadd.f32 %v5363_v36, %v2628_v35 }
 0x322   :  { %v2834_v56 = vpop.f32.mrf.mxu1 }
 0x323   :  { %v2895_v28 = vadd.f32 %v2894_v59, %v2880_v17  ;;  %v2859_v63 = vadd.f32 %v2834_v56, %v2626_v46  ;;  %v2884_v16 = vadd.f32 %v8239_v15, %v2861_v62 }
 0x325   :  { %v2896_v2 = vadd.f32 %v2895_v28, %v2881_v25  ;;  %v2882_v14 = vadd.f32 %v8239_v15, %v2859_v63 }
 0x327   :  { %v2897_v42 = vadd.f32 %v2896_v2, %v2882_v14 }
 0x329   :  { %v2898_v53 = vadd.f32 %v2897_v42, %v2883_v44 }
 0x32b   :  { %v2899_v19 = vadd.f32 %v2898_v53, %v2884_v16 }
 0x32d   :  { %v2900_v43 = vrot.slane %v2899_v19, 4 }
 0x32f   :  { %v2901_v60 = vadd.f32 %v2900_v43, %v2899_v19  ;;  %v10439_v43 = vld [vmem:[#allocation20_spill] sm:$0xff] }
 0x331   :  { %v2902_v31 = vrot.slane %v2901_v60, 2 }
 0x333   :  { %v2903_v26 = vadd.f32 %v2902_v31, %v2901_v60  ;;  %v155_v60 = vsub.s32 3, %v10439_v43  ;;  %v159_v31 = vsub.s32 4, %v10439_v43 }
 0x335   :  { %v2904_v5 = vrot.slane %v2903_v26, 1 }
 0x337   :  { %v2905_v32 = vadd.f32 %v2904_v5, %v2903_v26  ;;  %v5627_v26 = vld [vmem:[#allocation8] sm:$0x1f] }
 0x338   :  { %v156_v5 = vrot.slane %v5627_v26, %v155_v60 }
 0x339   :  { %v2906_v22 = vmul.f32 0.0078125, %v2905_v32  ;;  %v160_v32 = vrot.slane %v5627_v26, %v159_v31 }
 0x33b   :  { %v8326_v20 = vsub.f32 %v8243_v61, %v2906_v22  ;;  %v8329_v23 = vsub.f32 %v8246_v21, %v2906_v22  ;;  %v8332_v15 = vsub.f32 %v8255_v45, %v2906_v22  ;;  %v8335_v7 = vsub.f32 %v8263_v47, %v2906_v22 }
 0x33c   :  { %v8338_v49 = vsub.f32 %v8275_v1, %v2906_v22  ;;  %v8341_v50 = vsub.f32 %v8297_v48, %v2906_v22  ;;  %v8343_v41 = vsub.f32 %v2876_v55, %v2906_v22  ;;  %v8345_v8 = vsub.f32 %v2877_v52, %v2906_v22 }
 0x33d   :  { %v8347_v61 = vsub.f32 %v2879_v4, %v2906_v22  ;;  %v8349_v21 = vsub.f32 %v2880_v17, %v2906_v22  ;;  %v8351_v37 = vsub.f32 %v2881_v25, %v2906_v22  ;;  %v8353_v45 = vsub.f32 %v2883_v44, %v2906_v22 }
 0x33e   :  { %v8355_v47 = vsub.f32 %v2884_v16, %v2906_v22  ;;  %v2923_v1 = vmul.f32 %v8326_v20, %v8326_v20  ;;  %v2924_v48 = vmul.f32 %v8329_v23, %v8329_v23  ;;  %v2925_v55 = vmul.f32 %v8332_v15, %v8332_v15 }
 0x33f   :  { %v2912_v12 = vsub.f32 %v8285_v11, %v2906_v22  ;;  %v2926_v3 = vmul.f32 %v8335_v7, %v8335_v7  ;;  %v2927_v0 = vmul.f32 %v8338_v49, %v8338_v49  ;;  %v2929_v58 = vmul.f32 %v8341_v50, %v8341_v50 }
 0x340   :  { %v2939_v52 = vadd.f32 %v2924_v48, %v2923_v1  ;;  %v2916_v27 = vsub.f32 %v2878_v18, %v2906_v22  ;;  %v2930_v40 = vmul.f32 %v8343_v41, %v8343_v41  ;;  %v2931_v11 = vmul.f32 %v8345_v8, %v8345_v8  ;;  %v10441_v48 = vld [vmem:[#allocation33_spill] sm:$0xff] }
 0x341   :  { %v2928_v24 = vmul.f32 %v2912_v12, %v2912_v12  ;;  %v2933_v54 = vmul.f32 %v8347_v61, %v8347_v61  ;;  %v2920_v36 = vsub.f32 %v2882_v14, %v2906_v22  ;;  %v2934_v17 = vmul.f32 %v8349_v21, %v8349_v21  ;;  %v10440_v22 = vld [vmem:[#allocation22_spill] sm:$0xff] }
 0x342   :  { %v2940_v13 = vadd.f32 %v2939_v52, %v2925_v55  ;;  %v2932_v4 = vmul.f32 %v2916_v27, %v2916_v27  ;;  %v2935_v18 = vmul.f32 %v8351_v37, %v8351_v37  ;;  %v2937_v56 = vmul.f32 %v8353_v45, %v8353_v45  ;;  %v3059_v52 = vld [vmem:[#allocation2 + $0x7] sm:$0xff] }
 0x343   :  { %v2936_v46 = vmul.f32 %v2920_v36, %v2920_v36  ;;  %v2938_v25 = vmul.f32 %v8355_v47, %v8355_v47  ;;  %v352_v1 = vadd.f32 %v10440_v22, %v156_v5  ;;  %v391_v55 = vadd.f32 %v10441_v48, %v160_v32 }
 0x344   :  { %v2941_v29 = vadd.f32 %v2940_v13, %v2926_v3  ;;  %v10442_v3 = vld [vmem:[#allocation21_spill] sm:$0xff] }
 0x345   :  { %v2982_v13 = vrot.slane %v352_v1, %v10442_v3 }
 0x346   :  { %v2942_v10 = vadd.f32 %v2941_v29, %v2927_v0  ;;  %v10443_v0 = vld [vmem:[#allocation24_spill] sm:$0xff] }
 0x347   :  { %v3014_v29 = vrot.slane %v352_v1, %v10443_v0 }
 0x348   :  { %v2943_v51 = vadd.f32 %v2942_v10, %v2928_v24  ;;  %v2994_v24 = vrot.slane %v391_v55, %v10442_v3 }
 0x34a   :  { %v2944_v30 = vadd.f32 %v2943_v51, %v2929_v58  ;;  %v8392_v58 = vrot.slane %v391_v55, %v10443_v0  ;;  %v5628_v51 = vld [vmem:[#allocation2] sm:$0xff] }
 0x34c   :  { %v2945_v38 = vadd.f32 %v2944_v30, %v2930_v40  ;;  %v10444_v40 = vld [vmem:[#allocation49_spill] sm:$0xff] }
 0x34d   :  { %v8395_v30 = vmul.f32 %v5628_v51, %v10444_v40 }
 0x34e   :  { %v2946_v33 = vadd.f32 %v2945_v38, %v2931_v11  ;;  %v10445_v11 = vld [vmem:[#allocation50_spill] sm:$0xff] }
 0x34f   :  { %v8398_v38 = vmul.f32 %v10445_v11, %v3059_v52 }
 0x350   :  { %v2947_v34 = vadd.f32 %v2946_v33, %v2932_v4  ;;  %v8402_v4 = vsel %vm3166_vm11, %v8287_v9, 0 }
 0x352   :  { %v2948_v59 = vadd.f32 %v2947_v34, %v2933_v54 }
 0x354   :  { %v2949_v6 = vadd.f32 %v2948_v59, %v2934_v17 }
 0x356   :  { %v2950_v35 = vadd.f32 %v2949_v6, %v2935_v18 }
 0x358   :  { %v2951_v39 = vadd.f32 %v2950_v35, %v2936_v46 }
 0x35a   :  { %v2952_v28 = vadd.f32 %v2951_v39, %v2937_v56 }
 0x35c   :  { %v2953_v63 = vadd.f32 %v2952_v28, %v2938_v25 }
 0x35e   :  { %v2954_v2 = vrot.slane %v2953_v63, 4 }
 0x360   :  { %v2955_v62 = vadd.f32 %v2954_v2, %v2953_v63 }
 0x362   :  { %v2956_v14 = vrot.slane %v2955_v62, 2 }
 0x364   :  { %v2957_v44 = vadd.f32 %v2956_v14, %v2955_v62 }
 0x366   :  { %v2958_v42 = vrot.slane %v2957_v44, 1 }
 0x368   :  { %v2959_v16 = vadd.f32 %v2958_v42, %v2957_v44 }
 0x36a   :  { %v2960_v53 = vmul.f32 0.0078125, %v2959_v16 }
 0x36c   :  { %v2961_v19 = vadd.f32 1e-05, %v2960_v53 }
 0x36e   :  { %5592 = vrsqrt.f32 %v2961_v19 }
 0x37b   :  { %v5593_v10 = vpop.eup %5592 }
 0x37c   :  { %v2963_v33 = vmul.f32 %v5593_v10, %v8326_v20  ;;  %v2964_v54 = vmul.f32 %v5593_v10, %v8329_v23  ;;  %v2965_v34 = vmul.f32 %v5593_v10, %v8332_v15  ;;  %v2966_v17 = vmul.f32 %v5593_v10, %v8335_v7 }
 0x37d   :  { %v2967_v59 = vmul.f32 %v5593_v10, %v8338_v49  ;;  %v2968_v18 = vmul.f32 %v5593_v10, %v2912_v12  ;;  %v2969_v6 = vmul.f32 %v5593_v10, %v8341_v50  ;;  %v2970_v46 = vmul.f32 %v5593_v10, %v8343_v41 }
 0x37e   :  { %v2971_v35 = vmul.f32 %v5593_v10, %v8345_v8  ;;  %v2972_v56 = vmul.f32 %v5593_v10, %v2916_v27  ;;  %v2973_v9 = vmul.f32 %v5593_v10, %v8347_v61  ;;  %v2974_v20 = vmul.f32 %v5593_v10, %v8349_v21 }
 0x37f   :  { %v2975_v23 = vmul.f32 %v5593_v10, %v8351_v37  ;;  %v2976_v39 = vmul.f32 %v5593_v10, %v2920_v36  ;;  %v2977_v15 = vmul.f32 %v5593_v10, %v8353_v45  ;;  %v2978_v7 = vmul.f32 %v5593_v10, %v8355_v47 }
 0x380   :  { %v2983_v49 = vmul.f32 %v2982_v13, %v2963_v33  ;;  %v2984_v12 = vmul.f32 %v2982_v13, %v2964_v54  ;;  %v2985_v25 = vmul.f32 %v2982_v13, %v2965_v34  ;;  %v2986_v50 = vmul.f32 %v2982_v13, %v2966_v17 }
 0x381   :  { %v2987_v28 = vmul.f32 %v2982_v13, %v2967_v59  ;;  %v2988_v41 = vmul.f32 %v2982_v13, %v2968_v18  ;;  %v2989_v63 = vmul.f32 %v2982_v13, %v2969_v6  ;;  %v2990_v8 = vmul.f32 %v2982_v13, %v2970_v46  ;;  %v10448_v6 = vld [vmem:[#allocation60_spill] sm:$0xff] }
 0x382   :  { %v2995_v27 = vadd.f32 %v2994_v24, %v2983_v49  ;;  %v2996_v2 = vadd.f32 %v2994_v24, %v2984_v12  ;;  %v2997_v61 = vadd.f32 %v2994_v24, %v2985_v25  ;;  %v2998_v62 = vadd.f32 %v2994_v24, %v2986_v50  ;;  %v10452_v12 = vld [vmem:[#allocation73_spill] sm:$0xff]  ;;  %v10453_v50 = vld [vmem:[#allocation74_spill] sm:$0xff] }
 0x383   :  { %v2999_v21 = vadd.f32 %v2994_v24, %v2987_v28  ;;  %v3000_v14 = vadd.f32 %v2994_v24, %v2988_v41  ;;  %v3001_v37 = vadd.f32 %v2994_v24, %v2989_v63  ;;  %v3002_v36 = vadd.f32 %v2994_v24, %v2990_v8  ;;  %v10454_v41 = vld [vmem:[#allocation79_spill] sm:$0xff] }
 0x384   :  { %v8417_v44 = vmax.f32 %v2995_v27, 0.0  ;;  %v8419_v45 = vmax.f32 %v2996_v2, 0.0  ;;  %v8421_v47 = vmax.f32 %v2997_v61, 0.0  ;;  %v8423_v42 = vmax.f32 %v2998_v62, 0.0  ;;  %v10455_v27 = vld [vmem:[#allocation53_spill] sm:$0xff]  ;;  %v10456_v62 = vld [vmem:[#allocation63_spill] sm:$0xff] }
 0x385   :  { %v8425_v16 = vmax.f32 %v2999_v21, 0.0  ;;  %v8427_v53 = vmax.f32 %v3000_v14, 0.0  ;;  %v8429_v19 = vmax.f32 %v3001_v37, 0.0  ;;  %v8431_v43 = vmax.f32 %v3002_v36, 0.0  ;;  %v10457_v36 = vld [vmem:[#allocation64_spill] sm:$0xff] }
 0x386   :  { %10446 = vst [vmem:[#allocation173_spill] sm:$0xff] %v8417_v44  ;;  %v3015_v60 = vmul.f32 %v3014_v29, %v2971_v35  ;;  %v3016_v31 = vmul.f32 %v3014_v29, %v2972_v56  ;;  %v3017_v26 = vmul.f32 %v3014_v29, %v2973_v9  ;;  %v3018_v5 = vmul.f32 %v3014_v29, %v2974_v20  ;;  %v10449_v35 = vld [vmem:[#allocation61_spill] sm:$0xff]  ;;  %v10450_v9 = vld [vmem:[#allocation67_spill] sm:$0xff] }
 0x387   :  { %3043 = vst [vmem:[#allocation2 + $0x10] sm:$0xff] %v8417_v44  ;;  %3044 = vst [vmem:[#allocation2 + $0x18] sm:$0xff] %v8419_v45  ;;  %v3019_v32 = vmul.f32 %v3014_v29, %v2975_v23  ;;  %v3020_v22 = vmul.f32 %v3014_v29, %v2976_v39  ;;  %v3021_v1 = vmul.f32 %v3014_v29, %v2977_v15 }
 0x388   :  { %3045 = vst [vmem:[#allocation2 + $0x20] sm:$0xff] %v8421_v47  ;;  %3046 = vst [vmem:[#allocation2 + $0x28] sm:$0xff] %v8423_v42  ;;  %v3022_v48 = vmul.f32 %v3014_v29, %v2978_v7  ;;  %v3027_v55 = vadd.f32 %v8392_v58, %v3015_v60  ;;  %v3028_v52 = vadd.f32 %v8392_v58, %v3016_v31  ;;  %v10451_v7 = vld [vmem:[#allocation68_spill] sm:$0xff] }
 0x389   :  { %3047 = vst [vmem:[#allocation2 + $0x30] sm:$0xff] %v8425_v16  ;;  %3048 = vst [vmem:[#allocation2 + $0x38] sm:$0xff] %v8427_v53  ;;  %v3029_v3 = vadd.f32 %v8392_v58, %v3017_v26  ;;  %v3030_v13 = vadd.f32 %v8392_v58, %v3018_v5  ;;  %v3031_v0 = vadd.f32 %v8392_v58, %v3019_v32  ;;  %v10458_v26 = vld [vmem:[#allocation70_spill] sm:$0xff] }
 0x38a   :  { %3049 = vst [vmem:[#allocation2 + $0x40] sm:$0xff] %v8429_v19  ;;  %3050 = vst [vmem:[#allocation2 + $0x48] sm:$0xff] %v8431_v43  ;;  %v3032_v29 = vadd.f32 %v8392_v58, %v3020_v22  ;;  %v3033_v24 = vadd.f32 %v8392_v58, %v3021_v1  ;;  %v3034_v10 = vadd.f32 %v8392_v58, %v3022_v48  ;;  %v8449_v51 = vmax.f32 %v3027_v55, 0.0  ;;  %v10447_v58 = vld [vmem:[#allocation51_spill] sm:$0xff] }
 0x38b   :  { %v8451_v40 = vmax.f32 %v3028_v52, 0.0  ;;  %v8453_v11 = vmax.f32 %v3029_v3, 0.0  ;;  %v8455_v33 = vmax.f32 %v3030_v13, 0.0  ;;  %v8457_v54 = vmax.f32 %v3031_v0, 0.0  ;;  %v10460_v55 = vld [vmem:[#allocation83_spill] sm:$0xff] }
 0x38c   :  { %v8459_v34 = vmax.f32 %v3032_v29, 0.0  ;;  %v8461_v17 = vmax.f32 %v3033_v24, 0.0  ;;  %v8463_v59 = vmax.f32 %v3034_v10, 0.0  ;;  %3051 = vst [vmem:[#allocation2 + $0x50] sm:$0xff] %v8449_v51  ;;  %v3117_v18 = vmul.f32 %v10447_v58, %v8417_v44  ;;  %v10461_v29 = vld [vmem:[#allocation85_spill] sm:$0xff] }
 0x38d   :  { %3052 = vst [vmem:[#allocation2 + $0x58] sm:$0xff] %v8451_v40  ;;  %3053 = vst [vmem:[#allocation2 + $0x60] sm:$0xff] %v8453_v11  ;;  %v3118_v46 = vmul.f32 %v10448_v6, %v8419_v45  ;;  %v3119_v56 = vmul.f32 %v10449_v35, %v8421_v47  ;;  %v3120_v20 = vmul.f32 %v10450_v9, %v8423_v42  ;;  %v3638_v58 = vsel %vm3166_vm11, %v8321_v57, 0  ;;  %v3958_v57 = vld [vmem:[#allocation12 + $0x14] sm:$0xf] }
 0x38e   :  { %3054 = vst [vmem:[#allocation2 + $0x68] sm:$0xff] %v8455_v33  ;;  %3055 = vst [vmem:[#allocation2 + $0x70] sm:$0xff] %v8457_v54  ;;  %v8481_v23 = vld [vmem:[#allocation2 + $0xf] sm:$0xff]  ;;  %v8483_v39 = vld [vmem:[#allocation2 + $0x17] sm:$0xff]  ;;  %v3121_v49 = vmul.f32 %v10451_v7, %v8425_v16  ;;  %v3122_v25 = vmul.f32 %v10452_v12, %v8427_v53  ;;  %v3123_v28 = vmul.f32 %v10453_v50, %v8429_v19 }
 0x38f   :  { %3056 = vst [vmem:[#allocation2 + $0x78] sm:$0xff] %v8459_v34  ;;  %3057 = vst [vmem:[#allocation2 + $0x80] sm:$0xff] %v8461_v17  ;;  %v8485_v15 = vld [vmem:[#allocation2 + $0x1f] sm:$0xff]  ;;  %v3124_v63 = vmul.f32 %v10454_v41, %v8431_v43  ;;  %v3132_v8 = vpack.c.bf16 %v3117_v18, %v8395_v30  ;;  %v3076_v2 = vmul.f32 %v10455_v27, %v8481_v23  ;;  %v8500_v14 = vld [vmem:[#allocation2 + $0x27] sm:$0xff] }
 0x390   :  { %3058 = vst [vmem:[#allocation2 + $0x88] sm:$0xff] %v8463_v59  ;;  %v3133_v61 = vpack.c.bf16 %v3119_v56, %v3118_v46  ;;  %v3077_v21 = vmul.f32 %v10456_v62, %v8483_v39  ;;  %v8502_v37 = vld [vmem:[#allocation2 + $0x2f] sm:$0xff]  ;;  %v3078_v60 = vmul.f32 %v10457_v36, %v8485_v15  ;;  %v3134_v31 = vpack.c.bf16 %v3121_v49, %v3120_v20  ;;  %v10459_v30 = vld [vmem:[#allocation72_spill] sm:$0xff]  ;;  %v3777_v20 = vld [vmem:[#allocation12 + $0x10] sm:$0xf] }
 0x391   :  { %v3079_v5 = vmul.f32 %v10458_v26, %v8500_v14  ;;  %v3080_v32 = vmul.f32 %v10459_v30, %v8502_v37  ;;  %5366 = vmatprep.mubr.msk.bf16.mxu0 %vm3141_vm4, %v3132_v8  ;;  %v3091_v22 = vpack.c.bf16 %v3076_v2, %v8398_v38  ;;  %v3135_v1 = vpack.c.bf16 %v3123_v28, %v3122_v25  ;;  %v8517_v13 = vld [vmem:[#allocation2 + $0x37] sm:$0xff]  ;;  %v8519_v0 = vld [vmem:[#allocation2 + $0x3f] sm:$0xff]  ;;  %v10463_v46 = vld [vmem:[#allocation90_spill] sm:$0xff] }
 0x392   :  { %5367 = vmatmul.mubr.msk.bf16.vlgmr.msra.gmra.mxu0 %vm3141_vm4, %v3133_v61  ;;  %v3092_v48 = vpack.c.bf16 %v3078_v60, %v3077_v21  ;;  %v3125_v52 = vmul.f32 %v10460_v55, %v8449_v51  ;;  %v3126_v24 = vmul.f32 %v10461_v29, %v8451_v40  ;;  %v10462_v38 = vld [vmem:[#allocation87_spill] sm:$0xff]  ;;  %v3128_v35 = vmul.f32 %v10463_v46, %v8455_v33  ;;  %v10467_v41 = vld [vmem:[#allocation77_spill] sm:$0xff]  ;;  %v10468_v8 = vld [vmem:[#allocation110_spill] sm:$0xff] }
 0x393   :  { %5384 = vmatprep.mubr.msk.bf16.mxu1 %vm3141_vm4, %v3091_v22  ;;  %5401 = vmatpush3.bf16.msra.mxu0 %v8402_v4  ;;  %v3093_v3 = vpack.c.bf16 %v3080_v32, %v3079_v5  ;;  %v3127_v10 = vmul.f32 %v10462_v38, %v8453_v11  ;;  %v8529_v4 = vld [vmem:[#allocation2 + $0x47] sm:$0xff]  ;;  %v8531_v6 = vld [vmem:[#allocation2 + $0x4f] sm:$0xff]  ;;  %v10474_v29 = vld [vmem:[#allocation32_spill] sm:$0xff] }
 0x394   :  { %5385 = vmatmul.mubr.msk.bf16.vlgmr.msra.gmra.mxu1 %vm3141_vm4, %v3092_v48  ;;  %5370 = vmatprep.mubr.msk.bf16.mxu0 %vm3141_vm4, %v3134_v31  ;;  %v3136_v18 = vpack.c.bf16 %v3125_v52, %v3124_v63  ;;  %v10464_v56 = vld [vmem:[#allocation71_spill] sm:$0xff]  ;;  %v8544_v63 = vmul.f32 %v10467_v41, %v8459_v34  ;;  %v3083_v27 = vmul.f32 %v10468_v8, %v8529_v4  ;;  %v10470_v62 = vld [vmem:[#allocation78_spill] sm:$0xff]  ;;  %v8562_v5 = vld [vmem:[#allocation2 + $0x5f] sm:$0xff] }
 0x395   :  { %v3129_v9 = vmul.f32 %v10464_v56, %v8457_v54  ;;  %5388 = vmatprep.mubr.msk.bf16.mxu1 %vm3141_vm4, %v3093_v3  ;;  %v3137_v7 = vpack.c.bf16 %v3127_v10, %v3126_v24  ;;  %v10465_v49 = vld [vmem:[#allocation55_spill] sm:$0xff]  ;;  %5419 = vmatpush3.bf16.msra.mxu1 %v3638_v58  ;;  %v8552_v21 = vmul.f32 %v10470_v62, %v8461_v17  ;;  %v8564_v30 = vld [vmem:[#allocation2 + $0x67] sm:$0xff]  ;;  %v10473_v52 = vld [vmem:[#allocation84_spill] sm:$0xff] }
 0x396   :  { %v3081_v12 = vmul.f32 %v10465_v49, %v8517_v13  ;;  %v10466_v25 = vld [vmem:[#allocation23_spill] sm:$0xff]  ;;  %5532 = vmatprep.subr.msk.bf16.mxu0 %vm3166_vm11, %v3777_v20  ;;  %5533 = vmatprep.subr.msk.bf16.mxu1 %vm3166_vm11, %v3958_v57  ;;  %v10471_v22 = vld [vmem:[#allocation82_spill] sm:$0xff]  ;;  %v3087_v3 = vmul.f32 %v10473_v52, %v8564_v30  ;;  %v8580_v10 = vld [vmem:[#allocation2 + $0x7f] sm:$0xff] }
 0x397   :  { %v3082_v50 = vmul.f32 %v10466_v25, %v8519_v0  ;;  %v3138_v28 = vpack.c.bf16 %v3129_v9, %v3128_v35  ;;  %v10469_v2 = vld [vmem:[#allocation111_spill] sm:$0xff]  ;;  %v3391_v58 = vld [vmem:[#allocation2 + $0x9] sm:$0xff]  ;;  %v8586_v35 = vld [vmem:[#allocation2 + $0x21] sm:$0xff] }
 0x398   :  { %v3084_v61 = vmul.f32 %v10469_v2, %v8531_v6  ;;  %v8559_v31 = vld [vmem:[#allocation2 + $0x57] sm:$0xff]  ;;  %v8566_v32 = vld [vmem:[#allocation2 + $0x6f] sm:$0xff] }
 0x399   :  { %v3094_v60 = vpack.c.bf16 %v3082_v50, %v3081_v12  ;;  %v3085_v48 = vmul.f32 %v10471_v22, %v8559_v31  ;;  %v3088_v24 = vmul.f32 %v10474_v29, %v8566_v32  ;;  %v8578_v38 = vld [vmem:[#allocation2 + $0x77] sm:$0xff]  ;;  %v8593_v41 = vld [vmem:[#allocation2 + $0x29] sm:$0xff] }
 0x39a   :  { %5371 = vmatmul.mubr.msk.bf16.gmra.mxu0 %vm3141_vm4, %v3135_v1  ;;  %v3095_v26 = vpack.c.bf16 %v3084_v61, %v3083_v27  ;;  %v10472_v1 = vld [vmem:[#allocation31_spill] sm:$0xff]  ;;  %v10477_v25 = vld [vmem:[#allocation48_spill] sm:$0xff]  ;;  %v10478_v27 = vld [vmem:[#allocation34_spill] sm:$0xff] }
 0x39b   :  { %5374 = vmatprep.mubr.msk.bf16.mxu0 %vm3141_vm4, %v3136_v18  ;;  %v3086_v55 = vmul.f32 %v10472_v1, %v8562_v5  ;;  %v8582_v18 = vld [vmem:[#allocation2 + $0x11] sm:$0xff]  ;;  %v8584_v46 = vld [vmem:[#allocation2 + $0x19] sm:$0xff]  ;;  %v3097_v9 = vpack.c.bf16 %v3088_v24, %v3087_v3  ;;  %v3090_v50 = vmul.f32 %v10477_v25, %v8580_v10  ;;  %v3407_v2 = vmul.f32 %v10478_v27, %v3391_v58  ;;  %v10486_v58 = vld [vmem:[#allocation25_spill] sm:$0xff] }
 0x39c   :  { %5389 = vmatmul.mubr.msk.bf16.gmra.mxu1 %vm3141_vm4, %v3094_v60  ;;  %10475 = vst [vmem:[#allocation157_spill] sm:$0xff] %v8582_v18  ;;  %v10476_v49 = vld [vmem:[#allocation43_spill] sm:$0xff]  ;;  %v10484_v52 = vld [vmem:[#allocation86_spill] sm:$0xff]  ;;  %v10488_v27 = vld [vmem:[#allocation65_spill] sm:$0xff] }
 0x39d   :  { %5392 = vmatprep.mubr.msk.bf16.mxu1 %vm3141_vm4, %v3095_v26  ;;  %v3096_v56 = vpack.c.bf16 %v3086_v55, %v3085_v48  ;;  %v3089_v12 = vmul.f32 %v10476_v49, %v8578_v38  ;;  %v8595_v8 = vld [vmem:[#allocation2 + $0x31] sm:$0xff]  ;;  %v10481_v26 = vld [vmem:[#allocation81_spill] sm:$0xff]  ;;  %v10483_v55 = vld [vmem:[#allocation56_spill] sm:$0xff]  ;;  %v8616_v3 = vmul.f32 %v10484_v52, %v8485_v15 }
 0x39e   :  { %v10479_v61 = vld [vmem:[#allocation35_spill] sm:$0xff]  ;;  %v3589_v22 = vmul.f32 %v10481_v26, %v8483_v39  ;;  %v10482_v48 = vld [vmem:[#allocation41_spill] sm:$0xff]  ;;  %v10487_v49 = vld [vmem:[#allocation36_spill] sm:$0xff]  ;;  %v3803_v26 = vsel %vm3166_vm11, %v3777_v20, 0  ;;  %v8659_v20 = vsel %vm3166_vm11, %v3958_v57, 0 }
 0x39f   :  { %v3408_v62 = vmul.f32 %v10479_v61, %v8582_v18  ;;  %v8608_v1 = vmul.f32 %v10482_v48, %v8584_v46  ;;  %v8618_v29 = vld [vmem:[#allocation2 + $0x39] sm:$0xff]  ;;  %v8631_v25 = vmul.f32 %v10487_v49, %v8593_v41  ;;  %v8635_v61 = vmul.f32 %v10488_v27, %v8595_v8  ;;  %v10492_v24 = vld [vmem:[#allocation117_spill] sm:$0xff] }
 0x3a0   :  { %v10489_v48 = vld [vmem:[#allocation88_spill] sm:$0xff]  ;;  %v3098_v36 = vpack.c.bf16 %v3090_v50, %v3089_v12  ;;  %v8663_v18 = vld [vmem:[#allocation2 + $0x49] sm:$0xff]  ;;  %v10493_v50 = vpack.c.bf16 %v8552_v21, %v8544_v63 }
 0x3a1   :  { %v10491_v49 = vld [vmem:[#allocation116_spill] sm:$0xff]  ;;  %v10496_v21 = vld [vmem:[#allocation118_spill] sm:$0xff] }
 0x3a2   :  { %5375 = vmatmul.mubr.msk.bf16.gmra.mxu0 %vm3141_vm4, %v3137_v7  ;;  %v10480_v7 = vld [vmem:[#allocation80_spill] sm:$0xff]  ;;  %v8652_v27 = vmul.f32 %v10491_v49, %v8618_v29 }
 0x3a3   :  { %5378 = vmatprep.mubr.msk.bf16.mxu0 %vm3141_vm4, %v3138_v28  ;;  %v3588_v60 = vmul.f32 %v10480_v7, %v8481_v23  ;;  %v8612_v28 = vmul.f32 %v10483_v55, %v8586_v35  ;;  %v8620_v23 = vld [vmem:[#allocation2 + $0x41] sm:$0xff]  ;;  %v10490_v55 = vld [vmem:[#allocation26_spill] sm:$0xff] }
 0x3a4   :  { %5393 = vmatmul.mubr.msk.bf16.gmra.mxu1 %vm3141_vm4, %v3096_v56  ;;  %10485 = vst [vmem:[#allocation175_spill] sm:$0xff] %v8620_v23  ;;  %v8627_v56 = vmul.f32 %v10486_v58, %v8500_v14  ;;  %v8646_v52 = vmul.f32 %v10490_v55, %v8517_v13  ;;  %v8656_v7 = vmul.f32 %v10492_v24, %v8620_v23  ;;  %v8665_v58 = vld [vmem:[#allocation2 + $0x51] sm:$0xff] }
 0x3a5   :  { %5396 = vmatprep.mubr.msk.bf16.mxu1 %vm3141_vm4, %v3097_v9  ;;  %v8642_v9 = vmul.f32 %v10489_v48, %v8502_v37  ;;  %v3423_v55 = vpack.c.bf16 %v3408_v62, %v3407_v2  ;;  %v3604_v44 = vpack.c.bf16 %v3589_v22, %v3588_v60  ;;  %v3424_v24 = vpack.c.bf16 %v8612_v28, %v8608_v1  ;;  %v10494_v62 = vld [vmem:[#allocation112_spill] sm:$0xff]  ;;  %v10495_v22 = vld [vmem:[#allocation113_spill] sm:$0xff] }
 0x3a6   :  { %v3605_v57 = vpack.c.bf16 %v8627_v56, %v8616_v3  ;;  %v3425_v23 = vpack.c.bf16 %v8635_v61, %v8631_v25  ;;  %v8685_v60 = vmul.f32 %v10494_v62, %v8519_v0  ;;  %v8689_v1 = vmul.f32 %v10495_v22, %v8529_v4  ;;  %v8691_v28 = vld [vmem:[#allocation2 + $0x59] sm:$0xff] }
 0x3a7   :  { %v3606_v2 = vpack.c.bf16 %v8646_v52, %v8642_v9  ;;  %v8700_v56 = vmul.f32 %v10496_v21, %v8663_v18  ;;  %v10497_v25 = vld [vmem:[#allocation119_spill] sm:$0xff]  ;;  %v10500_v22 = vld [vmem:[#allocation40_spill] sm:$0xff] }
 0x3a8   :  { %v8704_v61 = vmul.f32 %v10497_v25, %v8665_v58  ;;  %v10498_v52 = vld [vmem:[#allocation39_spill] sm:$0xff]  ;;  %v8719_v21 = vmul.f32 %v10500_v22, %v8483_v39  ;;  %v10502_v25 = vld [vmem:[#allocation42_spill] sm:$0xff] }
 0x3a9   :  { %v8723_v3 = vmul.f32 %v10502_v25, %v8485_v15  ;;  %v10508_v39 = vld [vmem:[#allocation59_spill] sm:$0xff]  ;;  %v10510_v25 = vld [vmem:[#allocation62_spill] sm:$0xff]  ;;  %v10513_v15 = vld [vmem:[#allocation29_spill] sm:$0xff] }
 0x3aa   :  { %5379 = vmatmul.mubr.msk.bf16.gmra.mxu0 %vm3141_vm4, %v10493_v50  ;;  %v8711_v50 = vmul.f32 %v10498_v52, %v8531_v6  ;;  %10501 = vst [vmem:[#allocation156_spill] sm:$0xff] %v8719_v21  ;;  %v10504_v52 = vld [vmem:[#allocation140_spill] sm:$0xff]  ;;  %v8740_v22 = vmul.f32 %v10508_v39, %v8500_v14  ;;  %v10512_v14 = vld [vmem:[#allocation58_spill] sm:$0xff]  ;;  %v8762_v63 = vmul.f32 %v10513_v15, %v8517_v13 }
 0x3ab   :  { %5402 = vmatprep.mubr.msk.bf16.mxu0 %vm3141_vm4, %v3423_v55  ;;  %v10499_v55 = vld [vmem:[#allocation54_spill] sm:$0xff]  ;;  %v8732_v12 = vmul.f32 %v10504_v52, %v8419_v45  ;;  %v10511_v52 = vld [vmem:[#allocation57_spill] sm:$0xff]  ;;  %v8758_v39 = vmul.f32 %v10512_v14, %v8425_v16  ;;  %v10519_v14 = vld [vmem:[#allocation91_spill] sm:$0xff] }
 0x3ac   :  { %5397 = vmatmul.mubr.msk.bf16.gmra.mxu1 %vm3141_vm4, %v3098_v36  ;;  %v8715_v62 = vmul.f32 %v10499_v55, %v8559_v31  ;;  %v10503_v36 = vld [vmem:[#allocation124_spill] sm:$0xff]  ;;  %v10506_v55 = vld [vmem:[#allocation141_spill] sm:$0xff]  ;;  %10509 = vst [vmem:[#allocation159_spill] sm:$0xff] %v8740_v22  ;;  %v8752_v48 = vmul.f32 %v10511_v52, %v8423_v42  ;;  %v8782_v13 = vld [vmem:[#allocation12 + $0x18] sm:$0xf] }
 0x3ad   :  { %5420 = vmatprep.mubr.msk.bf16.mxu1 %vm3141_vm4, %v3604_v44  ;;  %v8728_v9 = vmul.f32 %v10503_v36, %v8691_v28  ;;  %10505 = vst [vmem:[#allocation166_spill] sm:$0xff] %v8732_v12  ;;  %v8736_v49 = vmul.f32 %v10506_v55, %v8421_v47  ;;  %v8748_v36 = vmul.f32 %v10510_v25, %v8502_v37  ;;  %v10514_v44 = vld [vmem:[#allocation30_spill] sm:$0xff]  ;;  %v10515_v25 = vld [vmem:[#allocation27_spill] sm:$0xff]  ;;  %v10517_v55 = vld [vmem:[#allocation28_spill] sm:$0xff] }
 0x3ae   :  { %v8766_v21 = vmul.f32 %v10514_v44, %v8519_v0  ;;  %v8772_v52 = vmul.f32 %v10515_v25, %v8427_v53  ;;  %v8776_v12 = vmul.f32 %v10517_v55, %v8429_v19  ;;  %v10521_v44 = vld [vmem:[#allocation75_spill] sm:$0xff]  ;;  %v10523_v37 = vld [vmem:[#allocation142_spill] sm:$0xff]  ;;  %v10527_v0 = vld [vmem:[#allocation76_spill] sm:$0xff] }
 0x3af   :  { %10507 = vst [vmem:[#allocation174_spill] sm:$0xff] %v8736_v49  ;;  %v8780_v49 = vmul.f32 %v10519_v14, %v8529_v4  ;;  %v8790_v25 = vmul.f32 %v10521_v44, %v8531_v6  ;;  %v8794_v55 = vmul.f32 %v10523_v37, %v8431_v43  ;;  %v10525_v14 = vld [vmem:[#allocation143_spill] sm:$0xff]  ;;  %v8805_v15 = vmul.f32 %v10527_v0, %v8559_v31  ;;  %v10529_v6 = vld [vmem:[#allocation144_spill] sm:$0xff]  ;;  %v10531_v4 = vld [vmem:[#allocation98_spill] sm:$0xff] }
 0x3b0   :  { %10516 = vst [vmem:[#allocation163_spill] sm:$0xff] %v8772_v52  ;;  %10518 = vst [vmem:[#allocation158_spill] sm:$0xff] %v8776_v12  ;;  %v8801_v22 = vmul.f32 %v10525_v14, %v8449_v51  ;;  %v8809_v44 = vmul.f32 %v10529_v6, %v8562_v5  ;;  %v8812_v37 = vld [vmem:[#allocation12 + $0x1c] sm:$0xf]  ;;  %v8818_v14 = vmul.f32 %v10531_v4, %v8451_v40  ;;  %v8825_v0 = vld [vmem:[#allocation2 + $0x61] sm:$0xff] }
 0x3b1   :  { %10520 = vst [vmem:[#allocation165_spill] sm:$0xff] %v8780_v49  ;;  %10522 = vst [vmem:[#allocation178_spill] sm:$0xff] %v8790_v25  ;;  %v10533_v52 = vld [vmem:[#allocation99_spill] sm:$0xff]  ;;  %v10535_v4 = vld [vmem:[#allocation145_spill] sm:$0xff] }
 0x3b2   :  { %10524 = vst [vmem:[#allocation176_spill] sm:$0xff] %v8794_v55  ;;  %5403 = vmatmul.mubr.msk.bf16.vlgmr.msra.gmra.mxu0 %vm3141_vm4, %v3424_v24  ;;  %10526 = vst [vmem:[#allocation169_spill] sm:$0xff] %v8801_v22  ;;  %v8822_v31 = vmul.f32 %v10533_v52, %v8453_v11  ;;  %v8835_v6 = vmul.f32 %v10535_v4, %v8564_v30  ;;  %v10537_v52 = vld [vmem:[#allocation146_spill] sm:$0xff]  ;;  %v3427_v22 = vpack.c.bf16 %v8704_v61, %v8700_v56  ;;  %v10550_v49 = vld [vmem:[#allocation89_spill] sm:$0xff] }
 0x3b3   :  { %10528 = vst [vmem:[#allocation161_spill] sm:$0xff] %v8805_v15  ;;  %10530 = vst [vmem:[#allocation154_spill] sm:$0xff] %v8809_v44  ;;  %5437 = vmatpush3.bf16.msra.mxu0 %v3803_v26  ;;  %5406 = vmatprep.mubr.msk.bf16.mxu0 %vm3141_vm4, %v3425_v23  ;;  %v8843_v24 = vmul.f32 %v10537_v52, %v8566_v32  ;;  %v10539_v23 = vld [vmem:[#allocation100_spill] sm:$0xff]  ;;  %v8849_v26 = vld [vmem:[#allocation2 + $0x69] sm:$0xff]  ;;  %v8879_v25 = vmul.f32 %v10550_v49, %v8461_v17 }
 0x3b4   :  { %10532 = vst [vmem:[#allocation177_spill] sm:$0xff] %v8818_v14  ;;  %10534 = vst [vmem:[#allocation160_spill] sm:$0xff] %v8822_v31  ;;  %5421 = vmatmul.mubr.msk.bf16.vlgmr.msra.gmra.mxu1 %vm3141_vm4, %v3605_v57  ;;  %5534 = vmatprep.subr.msk.bf16.mxu0 %vm3166_vm11, %v8782_v13  ;;  %v8847_v55 = vmul.f32 %v10539_v23, %v8455_v33  ;;  %v10545_v52 = vld [vmem:[#allocation95_spill] sm:$0xff]  ;;  %v10547_v23 = vld [vmem:[#allocation69_spill] sm:$0xff] }
 0x3b5   :  { %10536 = vst [vmem:[#allocation155_spill] sm:$0xff] %v8835_v6  ;;  %5424 = vmatprep.mubr.msk.bf16.mxu1 %vm3141_vm4, %v3606_v2  ;;  %5455 = vmatpush3.bf16.msra.mxu1 %v8659_v20  ;;  %10538 = vst [vmem:[#allocation153_spill] sm:$0xff] %v8843_v24  ;;  %v10541_v2 = vld [vmem:[#allocation101_spill] sm:$0xff]  ;;  %v10543_v20 = vld [vmem:[#allocation94_spill] sm:$0xff]  ;;  %v8863_v14 = vmul.f32 %v10545_v52, %v8580_v10  ;;  %v8867_v31 = vmul.f32 %v10547_v23, %v8459_v34 }
 0x3b6   :  { %10540 = vst [vmem:[#allocation172_spill] sm:$0xff] %v8847_v55  ;;  %5535 = vmatprep.subr.msk.bf16.mxu1 %vm3166_vm11, %v8812_v37  ;;  %v8855_v4 = vmul.f32 %v10541_v2, %v8457_v54  ;;  %v8859_v57 = vmul.f32 %v10543_v20, %v8578_v38  ;;  %v10549_v15 = vld [vmem:[#allocation125_spill] sm:$0xff]  ;;  %v8873_v2 = vld [vmem:[#allocation2 + $0x71] sm:$0xff]  ;;  %10551 = vst [vmem:[#allocation170_spill] sm:$0xff] %v8879_v25  ;;  %v3608_v52 = vpack.c.bf16 %v8715_v62, %v8711_v50 }
 0x3b7   :  { %10546 = vst [vmem:[#allocation168_spill] sm:$0xff] %v8863_v14  ;;  %10548 = vst [vmem:[#allocation162_spill] sm:$0xff] %v8867_v31  ;;  %v3418_v44 = vmul.f32 %v10549_v15, %v8825_v0  ;;  %v10552_v61 = vld [vmem:[#allocation147_spill] sm:$0xff]  ;;  %v10554_v12 = vld [vmem:[#allocation126_spill] sm:$0xff]  ;;  %v10559_v23 = vpack.c.bf16 %v8656_v7, %v8652_v27 }
 0x3b8   :  { %10542 = vst [vmem:[#allocation164_spill] sm:$0xff] %v8855_v4  ;;  %10544 = vst [vmem:[#allocation171_spill] sm:$0xff] %v8859_v57  ;;  %v8889_v15 = vmul.f32 %v10552_v61, %v8584_v46  ;;  %v3419_v20 = vmul.f32 %v10554_v12, %v8849_v26  ;;  %v10555_v6 = vld [vmem:[#allocation148_spill] sm:$0xff]  ;;  %v10560_v61 = vld [vmem:[#allocation127_spill] sm:$0xff] }
 0x3b9   :  { %v8897_v24 = vmul.f32 %v10555_v6, %v8586_v35  ;;  %v10557_v50 = vld [vmem:[#allocation44_spill] sm:$0xff]  ;;  %v3420_v56 = vmul.f32 %v10560_v61, %v8873_v2  ;;  %v10561_v49 = vld [vmem:[#allocation46_spill] sm:$0xff]  ;;  %v10562_v31 = vld [vmem:[#allocation149_spill] sm:$0xff] }
 0x3ba   :  { %10553 = vst [vmem:[#allocation179_spill] sm:$0xff] %v8889_v15  ;;  %v8901_v62 = vmul.f32 %v10557_v50, %v8593_v41  ;;  %5407 = vmatmul.mubr.msk.bf16.gmra.mxu0 %vm3141_vm4, %v10559_v23  ;;  %v8909_v12 = vld [vmem:[#allocation2 + $0x79] sm:$0xff]  ;;  %v8911_v55 = vld [vmem:[#allocation2 + $0x81] sm:$0xff]  ;;  %v8915_v6 = vmul.f32 %v10561_v49, %v8595_v8  ;;  %v8919_v50 = vmul.f32 %v10562_v31, %v8618_v29  ;;  %v10565_v4 = vld [vmem:[#allocation150_spill] sm:$0xff] }
 0x3bb   :  { %10556 = vst [vmem:[#allocation167_spill] sm:$0xff] %v8897_v24  ;;  %v10564_v25 = vld [vmem:[#allocation175_spill] sm:$0xff]  ;;  %5410 = vmatprep.mubr.msk.bf16.mxu0 %vm3141_vm4, %v3427_v22  ;;  %v10569_v49 = vld [vmem:[#allocation152_spill] sm:$0xff]  ;;  %v10571_v31 = vld [vmem:[#allocation102_spill] sm:$0xff] }
 0x3bc   :  { %10558 = vst [vmem:[#allocation20_spill] sm:$0xff] %v8901_v62  ;;  %10563 = vst [vmem:[#allocation22_spill] sm:$0xff] %v8919_v50  ;;  %v8923_v7 = vmul.f32 %v10565_v4, %v10564_v25  ;;  %v10567_v23 = vld [vmem:[#allocation151_spill] sm:$0xff]  ;;  %v8934_v57 = vmul.f32 %v10569_v49, %v8665_v58  ;;  %v8938_v14 = vmul.f32 %v10571_v31, %v8691_v28  ;;  %v10574_v49 = vld [vmem:[#allocation104_spill] sm:$0xff] }
 0x3bd   :  { %v8930_v61 = vmul.f32 %v10567_v23, %v8663_v18  ;;  %v10572_v4 = vpack.c.bf16 %v8689_v1, %v8685_v60  ;;  %v10573_v27 = vld [vmem:[#allocation103_spill] sm:$0xff]  ;;  %v8954_v24 = vmul.f32 %v10574_v49, %v8849_v26  ;;  %v10575_v1 = vld [vmem:[#allocation105_spill] sm:$0xff]  ;;  %v10578_v49 = vld [vmem:[#allocation38_spill] sm:$0xff] }
 0x3be   :  { %10566 = vst [vmem:[#allocation33_spill] sm:$0xff] %v8923_v7  ;;  %10570 = vst [vmem:[#allocation24_spill] sm:$0xff] %v8934_v57  ;;  %v8950_v15 = vmul.f32 %v10573_v27, %v8825_v0  ;;  %v8961_v31 = vmul.f32 %v10575_v1, %v8873_v2  ;;  %v10577_v27 = vld [vmem:[#allocation107_spill] sm:$0xff]  ;;  %v3598_v50 = vmul.f32 %v10578_v49, %v8562_v5  ;;  %v10580_v1 = vld [vmem:[#allocation114_spill] sm:$0xff] }
 0x3bf   :  { %10568 = vst [vmem:[#allocation21_spill] sm:$0xff] %v8930_v61  ;;  %5425 = vmatmul.mubr.msk.bf16.gmra.mxu1 %vm3141_vm4, %v10572_v4  ;;  %v10576_v4 = vld [vmem:[#allocation106_spill] sm:$0xff]  ;;  %v8969_v22 = vmul.f32 %v10577_v27, %v8911_v55  ;;  %v3600_v61 = vmul.f32 %v10580_v1, %v8566_v32  ;;  %v10581_v57 = vld [vmem:[#allocation115_spill] sm:$0xff]  ;;  %v3428_v5 = vpack.c.bf16 %v3418_v44, %v8728_v9  ;;  %v10582_v32 = vld [vmem:[#allocation52_spill] sm:$0xff] }
 0x3c0   :  { %5428 = vmatprep.mubr.msk.bf16.mxu1 %vm3141_vm4, %v3608_v52  ;;  %v8965_v23 = vmul.f32 %v10576_v4, %v8909_v12  ;;  %v10579_v52 = vld [vmem:[#allocation66_spill] sm:$0xff]  ;;  %v3601_v4 = vmul.f32 %v10581_v57, %v8578_v38  ;;  %v4498_v62 = vpack.c.bf16 %v8961_v31, %v8954_v24  ;;  %v3429_v49 = vpack.c.bf16 %v3420_v56, %v3419_v20  ;;  %v10583_v57 = vld [vmem:[#allocation132_spill] sm:$0xff]  ;;  %v10585_v20 = vld [vmem:[#allocation121_spill] sm:$0xff] }
 0x3c1   :  { %v3599_v7 = vmul.f32 %v10579_v52, %v8564_v30  ;;  %v8988_v60 = vld [vmem:[#allocation2 + $0x87] sm:$0xff]  ;;  %v3421_v38 = vmul.f32 %v10582_v32, %v8909_v12  ;;  %v3422_v1 = vmul.f32 %v10583_v57, %v8911_v55  ;;  %v10584_v9 = vld [vmem:[#allocation120_spill] sm:$0xff] }
 0x3c2   :  { %v4499_v27 = vpack.c.bf16 %v8969_v22, %v8965_v23  ;;  %5411 = vmatmul.mubr.msk.bf16.gmra.mxu0 %vm3141_vm4, %v3428_v5  ;;  %v3610_v52 = vpack.c.bf16 %v3601_v4, %v3600_v61  ;;  %v3602_v44 = vmul.f32 %v10584_v9, %v8580_v10  ;;  %v3603_v56 = vmul.f32 %v10585_v20, %v8988_v60  ;;  %v10588_v4 = vld [vmem:[#allocation123_spill] sm:$0xff]  ;;  %v10589_v32 = vld [vmem:[#allocation173_spill] sm:$0xff]  ;;  %v10591_v10 = vld [vmem:[#allocation128_spill] sm:$0xff] }
 0x3c3   :  { %v3609_v30 = vpack.c.bf16 %v3599_v7, %v3598_v50  ;;  %5414 = vmatprep.mubr.msk.bf16.mxu0 %vm3141_vm4, %v3429_v49  ;;  %v10586_v50 = vld [vmem:[#allocation157_spill] sm:$0xff]  ;;  %v10587_v7 = vld [vmem:[#allocation122_spill] sm:$0xff]  ;;  %v3935_v5 = vmul.f32 %v10588_v4, %v8584_v46  ;;  %v3430_v49 = vpack.c.bf16 %v3422_v1, %v3421_v38  ;;  %v10590_v57 = vpack.c.bf16 %v8419_v45, %v10589_v32 }
 0x3c4   :  { %v3934_v61 = vmul.f32 %v10587_v7, %v10586_v50  ;;  %v3936_v9 = vmul.f32 %v10591_v10, %v8586_v35  ;;  %v10592_v20 = vld [vmem:[#allocation129_spill] sm:$0xff]  ;;  %v10593_v38 = vld [vmem:[#allocation130_spill] sm:$0xff]  ;;  %v4165_v45 = vsel %vm3166_vm11, %v8782_v13, 0  ;;  %v4501_v50 = vld [vmem:[#allocation12 + $0x20] sm:$0xf]  ;;  %v10595_v7 = vpack.c.bf16 %v8423_v42, %v8421_v47 }
 0x3c5   :  { %v3937_v46 = vmul.f32 %v10592_v20, %v8593_v41  ;;  %v3938_v1 = vmul.f32 %v10593_v38, %v8595_v8  ;;  %v4346_v35 = vsel %vm3166_vm11, %v8812_v37, 0  ;;  %v10596_v41 = vpack.c.bf16 %v8427_v53, %v8425_v16  ;;  %v10597_v47 = vld [vmem:[#allocation133_spill] sm:$0xff]  ;;  %v10599_v37 = vld [vmem:[#allocation135_spill] sm:$0xff]  ;;  %v10600_v16 = vld [vmem:[#allocation136_spill] sm:$0xff] }
 0x3c6   :  { %v3940_v42 = vmul.f32 %v10597_v47, %v10564_v25  ;;  %v3942_v4 = vmul.f32 %v10599_v37, %v8665_v58  ;;  %v3943_v53 = vmul.f32 %v10600_v16, %v8691_v28  ;;  %v10604_v28 = vld [vmem:[#allocation137_spill] sm:$0xff]  ;;  %v10608_v10 = vpack.c.bf16 %v8459_v34, %v8457_v54  ;;  %v10612_v54 = vld [vmem:[#allocation156_spill] sm:$0xff]  ;;  %v10615_v38 = vld [vmem:[#allocation166_spill] sm:$0xff] }
 0x3c7   :  { %5429 = vmatmul.mubr.msk.bf16.gmra.mxu1 %vm3141_vm4, %v3609_v30  ;;  %v3611_v30 = vpack.c.bf16 %v3603_v56, %v3602_v44  ;;  %v10594_v44 = vld [vmem:[#allocation131_spill] sm:$0xff]  ;;  %v3945_v32 = vmul.f32 %v10604_v28, %v8849_v26  ;;  %v10609_v26 = vld [vmem:[#allocation45_spill] sm:$0xff]  ;;  %v10613_v34 = vpack.c.bf16 %v8723_v3, %v10612_v54  ;;  %v10619_v3 = vpack.c.bf16 %v8766_v21, %v8762_v63  ;;  %v10631_v47 = vld [vmem:[#allocation176_spill] sm:$0xff] }
 0x3c8   :  { %5432 = vmatprep.mubr.msk.bf16.mxu1 %vm3141_vm4, %v3610_v52  ;;  %v3950_v52 = vpack.c.bf16 %v3935_v5, %v3934_v61  ;;  %v3939_v56 = vmul.f32 %v10594_v44, %v8618_v29  ;;  %v3951_v61 = vpack.c.bf16 %v3937_v46, %v3936_v9  ;;  %v10598_v29 = vld [vmem:[#allocation134_spill] sm:$0xff]  ;;  %v10601_v5 = vpack.c.bf16 %v8431_v43, %v8429_v19  ;;  %v10617_v44 = vld [vmem:[#allocation159_spill] sm:$0xff]  ;;  %v10630_v21 = vld [vmem:[#allocation169_spill] sm:$0xff] }
 0x3c9   :  { %v3941_v13 = vmul.f32 %v10598_v29, %v8663_v18  ;;  %v3954_v25 = vpack.c.bf16 %v3943_v53, %v3942_v4  ;;  %v10603_v18 = vld [vmem:[#allocation37_spill] sm:$0xff]  ;;  %v10605_v19 = vld [vmem:[#allocation138_spill] sm:$0xff]  ;;  %v10637_v4 = vld [vmem:[#allocation155_spill] sm:$0xff] }
 0x3ca   :  { %5415 = vmatmul.mubr.msk.bf16.gmra.mxu0 %vm3141_vm4, %v3430_v49  ;;  %v3952_v8 = vpack.c.bf16 %v3939_v56, %v3938_v1  ;;  %v3944_v58 = vmul.f32 %v10603_v18, %v8825_v0  ;;  %v3946_v43 = vmul.f32 %v10605_v19, %v8873_v2  ;;  %v3933_v9 = vld [vmem:[#allocation2 + $0x89] sm:$0xff]  ;;  %v3948_v2 = vmul.f32 %v10609_v26, %v8911_v55  ;;  %v10639_v53 = vld [vmem:[#allocation168_spill] sm:$0xff] }
 0x3cb   :  { %5438 = vmatprep.mubr.msk.bf16.mxu0 %vm3141_vm4, %v10590_v57  ;;  %v3953_v49 = vpack.c.bf16 %v3941_v13, %v3940_v42  ;;  %v10606_v57 = vld [vmem:[#allocation139_spill] sm:$0xff]  ;;  %v10614_v46 = vld [vmem:[#allocation174_spill] sm:$0xff]  ;;  %v4527_v55 = vsel %vm3166_vm11, %v4501_v50, 0  ;;  %v10620_v56 = vpack.c.bf16 %v8758_v39, %v8752_v48  ;;  %v10632_v48 = vpack.c.bf16 %v10630_v21, %v10631_v47  ;;  %v10633_v39 = vld [vmem:[#allocation160_spill] sm:$0xff] }
 0x3cc   :  { %v10616_v1 = vpack.c.bf16 %v10614_v46, %v10615_v38  ;;  %v10634_v42 = vld [vmem:[#allocation177_spill] sm:$0xff]  ;;  %v4114_v13 = vld [vmem:[#allocation2 + $0x8f] sm:$0xff] }
 0x3cd   :  { %v10635_v29 = vpack.c.bf16 %v10633_v39, %v10634_v42  ;;  %v10636_v37 = vld [vmem:[#allocation153_spill] sm:$0xff]  ;;  %v10658_v54 = vld [vmem:[#allocation22_spill] sm:$0xff] }
 0x3ce   :  { %v10638_v16 = vpack.c.bf16 %v10636_v37, %v10637_v4  ;;  %v10661_v46 = vld [vmem:[#allocation21_spill] sm:$0xff] }
 0x3cf   :  { %5433 = vmatmul.mubr.msk.bf16.gmra.mxu1 %vm3141_vm4, %v3611_v30  ;;  %v10602_v30 = vpack.c.bf16 %v8451_v40, %v8449_v51  ;;  %v10607_v51 = vpack.c.bf16 %v8455_v33, %v8453_v11  ;;  %v3955_v40 = vpack.c.bf16 %v3945_v32, %v3944_v58  ;;  %v10611_v11 = vpack.c.bf16 %v8463_v59, %v8461_v17  ;;  %v10645_v58 = vld [vmem:[#allocation96_spill] sm:$0xff]  ;;  %v10646_v32 = vld [vmem:[#allocation97_spill] sm:$0xff] }
 0x3d0   :  { %5456 = vmatprep.mubr.msk.bf16.mxu1 %vm3141_vm4, %v3950_v52  ;;  %v3947_v52 = vmul.f32 %v10606_v57, %v8909_v12  ;;  %v10610_v12 = vld [vmem:[#allocation47_spill] sm:$0xff]  ;;  %v10618_v17 = vpack.c.bf16 %v8748_v36, %v10617_v44  ;;  %v10625_v36 = vld [vmem:[#allocation165_spill] sm:$0xff]  ;;  %v4129_v28 = vmul.f32 %v10645_v58, %v8988_v60  ;;  %v4130_v19 = vmul.f32 %v10646_v32, %v4114_v13  ;;  %v10648_v57 = vld [vmem:[#allocation162_spill] sm:$0xff] }
 0x3d1   :  { %v3949_v20 = vmul.f32 %v10610_v12, %v3933_v9  ;;  %v10653_v12 = vld [vmem:[#allocation179_spill] sm:$0xff]  ;;  %v10655_v60 = vld [vmem:[#allocation20_spill] sm:$0xff]  ;;  %v10665_v44 = vld [vmem:[#allocation109_spill] sm:$0xff] }
 0x3d2   :  { %5439 = vmatmul.mubr.msk.bf16.vlgmr.msra.gmra.mxu0 %vm3141_vm4, %v10595_v7  ;;  %v3956_v0 = vpack.c.bf16 %v3947_v52, %v3946_v43  ;;  %v10622_v7 = vld [vmem:[#allocation163_spill] sm:$0xff]  ;;  %v10647_v43 = vld [vmem:[#allocation170_spill] sm:$0xff] }
 0x3d3   :  { %5473 = vmatpush3.bf16.msra.mxu0 %v4165_v45  ;;  %5442 = vmatprep.mubr.msk.bf16.mxu0 %vm3141_vm4, %v10596_v41  ;;  %v3957_v33 = vpack.c.bf16 %v3949_v20, %v3948_v2  ;;  %v10621_v45 = vld [vmem:[#allocation158_spill] sm:$0xff]  ;;  %v10649_v52 = vpack.c.bf16 %v10647_v43, %v10648_v57  ;;  %v10652_v2 = vld [vmem:[#allocation167_spill] sm:$0xff] }
 0x3d4   :  { %5536 = vmatprep.subr.msk.bf16.mxu0 %vm3166_vm11, %v4501_v50  ;;  %v10624_v50 = vld [vmem:[#allocation178_spill] sm:$0xff]  ;;  %v10654_v20 = vpack.c.bf16 %v10652_v2, %v10653_v12 }
 0x3d5   :  { %v10627_v41 = vld [vmem:[#allocation154_spill] sm:$0xff] }
 0x3d7   :  { %5457 = vmatmul.mubr.msk.bf16.vlgmr.msra.gmra.mxu1 %vm3141_vm4, %v3951_v61  ;;  %v10623_v61 = vpack.c.bf16 %v10621_v45, %v10622_v7 }
 0x3d8   :  { %5460 = vmatprep.mubr.msk.bf16.mxu1 %vm3141_vm4, %v3952_v8  ;;  %5491 = vmatpush3.bf16.msra.mxu1 %v4346_v35  ;;  %v10626_v35 = vpack.c.bf16 %v10624_v50, %v10625_v36  ;;  %v10628_v8 = vld [vmem:[#allocation161_spill] sm:$0xff] }
 0x3d9   :  { %v10629_v63 = vpack.c.bf16 %v10627_v41, %v10628_v8 }
 0x3da   :  { %5443 = vmatmul.mubr.msk.bf16.gmra.mxu0 %vm3141_vm4, %v10601_v5  ;;  %v10640_v5 = vld [vmem:[#allocation171_spill] sm:$0xff] }
 0x3db   :  { %5446 = vmatprep.mubr.msk.bf16.mxu0 %vm3141_vm4, %v10602_v30  ;;  %v10642_v30 = vld [vmem:[#allocation164_spill] sm:$0xff] }
 0x3df   :  { %5461 = vmatmul.mubr.msk.bf16.gmra.mxu1 %vm3141_vm4, %v3953_v49  ;;  %v10641_v49 = vpack.c.bf16 %v10639_v53, %v10640_v5 }
 0x3e0   :  { %5464 = vmatprep.mubr.msk.bf16.mxu1 %vm3141_vm4, %v3954_v25  ;;  %v10643_v25 = vld [vmem:[#allocation172_spill] sm:$0xff] }
 0x3e1   :  { %v10644_v18 = vpack.c.bf16 %v10642_v30, %v10643_v25 }
 0x3e2   :  { %5447 = vmatmul.mubr.msk.bf16.gmra.mxu0 %vm3141_vm4, %v10607_v51  ;;  %v10650_v51 = vld [vmem:[#allocation92_spill] sm:$0xff] }
 0x3e3   :  { %5450 = vmatprep.mubr.msk.bf16.mxu0 %vm3141_vm4, %v10608_v10  ;;  %v4138_v10 = vpack.c.bf16 %v4130_v19, %v4129_v28 }
 0x3e7   :  { %5465 = vmatmul.mubr.msk.bf16.gmra.mxu1 %vm3141_vm4, %v3955_v40  ;;  %v4310_v40 = vmul.f32 %v10650_v51, %v8463_v59 }
 0x3e8   :  { %5468 = vmatprep.mubr.msk.bf16.mxu1 %vm3141_vm4, %v3956_v0  ;;  %v10651_v0 = vld [vmem:[#allocation93_spill] sm:$0xff] }
 0x3e9   :  { %v4319_v26 = vpack.c.bf16 %v10651_v0, %v4310_v40 }
 0x3ea   :  { %5451 = vmatmul.mubr.msk.bf16.gmra.mxu0 %vm3141_vm4, %v10611_v11  ;;  %v10656_v11 = vpack.c.bf16 %v8915_v6, %v10655_v60  ;;  %v10664_v6 = vld [vmem:[#allocation108_spill] sm:$0xff] }
 0x3eb   :  { %5474 = vmatprep.mubr.msk.bf16.mxu0 %vm3141_vm4, %v10613_v34  ;;  %v10660_v34 = vld [vmem:[#allocation24_spill] sm:$0xff] }
 0x3ec   :  { %v10662_v38 = vpack.c.bf16 %v10660_v34, %v10661_v46 }
 0x3ef   :  { %5469 = vmatmul.mubr.msk.bf16.gmra.mxu1 %vm3141_vm4, %v3957_v33  ;;  %v10657_v33 = vld [vmem:[#allocation33_spill] sm:$0xff] }
 0x3f0   :  { %5492 = vmatprep.mubr.msk.bf16.mxu1 %vm3141_vm4, %v10616_v1  ;;  %v10659_v59 = vpack.c.bf16 %v10657_v33, %v10658_v54  ;;  %v10663_v1 = vpack.c.bf16 %v8950_v15, %v8938_v14 }
 0x3f2   :  { %5475 = vmatmul.mubr.msk.bf16.vlgmr.msra.gmra.mxu0 %vm3141_vm4, %v10618_v17 }
 0x3f3   :  { %5509 = vmatpush3.bf16.msra.mxu0 %v4527_v55  ;;  %5478 = vmatprep.mubr.msk.bf16.mxu0 %vm3141_vm4, %v10619_v3  ;;  %v4491_v55 = vmul.f32 %v10664_v6, %v3933_v9 }
 0x3f5   :  { %v4500_v17 = vpack.c.bf16 %v10665_v44, %v4491_v55 }
 0x3f7   :  { %5493 = vmatmul.mubr.msk.bf16.vlgmr.msra.gmra.mxu1 %vm3141_vm4, %v10620_v56 }
 0x3f8   :  { %5496 = vmatprep.mubr.msk.bf16.mxu1 %vm3141_vm4, %v10623_v61 }
 0x3fa   :  { %5479 = vmatmul.mubr.msk.bf16.gmra.mxu0 %vm3141_vm4, %v10626_v35 }
 0x3fb   :  { %5482 = vmatprep.mubr.msk.bf16.mxu0 %vm3141_vm4, %v10629_v63 }
 0x3ff   :  { %5497 = vmatmul.mubr.msk.bf16.gmra.mxu1 %vm3141_vm4, %v10632_v48 }
 0x400   :  { %5500 = vmatprep.mubr.msk.bf16.mxu1 %vm3141_vm4, %v10635_v29 }
 0x402   :  { %5483 = vmatmul.mubr.msk.bf16.gmra.mxu0 %vm3141_vm4, %v10638_v16 }
 0x403   :  { %5486 = vmatprep.mubr.msk.bf16.mxu0 %vm3141_vm4, %v10641_v49 }
 0x407   :  { %5501 = vmatmul.mubr.msk.bf16.gmra.mxu1 %vm3141_vm4, %v10644_v18 }
 0x408   :  { %5504 = vmatprep.mubr.msk.bf16.mxu1 %vm3141_vm4, %v10649_v52 }
 0x40a   :  { %5487 = vmatmul.mubr.msk.bf16.gmra.mxu0 %vm3141_vm4, %v4138_v10 }
 0x40b   :  { %5510 = vmatprep.mubr.msk.bf16.mxu0 %vm3141_vm4, %v10654_v20 }
 0x40f   :  { %5505 = vmatmul.mubr.msk.bf16.gmra.mxu1 %vm3141_vm4, %v4319_v26 }
 0x412   :  { %5511 = vmatmul.mubr.msk.bf16.vlgmr.msra.gmra.mxu0 %vm3141_vm4, %v10656_v11 }
 0x413   :  { %5514 = vmatprep.mubr.msk.bf16.mxu0 %vm3141_vm4, %v10659_v59 }
 0x41a   :  { %5515 = vmatmul.mubr.msk.bf16.gmra.mxu0 %vm3141_vm4, %v10662_v38 }
 0x41b   :  { %5518 = vmatprep.mubr.msk.bf16.mxu0 %vm3141_vm4, %v10663_v1 }
 0x422   :  { %5519 = vmatmul.mubr.msk.bf16.gmra.mxu0 %vm3141_vm4, %v4498_v62 }
 0x423   :  { %5522 = vmatprep.mubr.msk.bf16.mxu0 %vm3141_vm4, %v4499_v27 }
 0x42a   :  { %5523 = vmatmul.mubr.msk.bf16.gmra.mxu0 %vm3141_vm4, %v4500_v17 }
 0x452   :  { %v5368_v3 = vpop.f32.mrf.mxu0 }
 0x454   :  { %v5386_v14 = vpop.f32.mrf.mxu1  ;;  %v3204_v15 = vpop.f32.mrf.mxu0 }
 0x455   :  { %v3337_v56 = vadd.f32 %v5386_v14, %v5368_v3 }
 0x456   :  { %v3328_v45 = vpop.f32.mrf.mxu1  ;;  %v5369_v7 = vpop.f32.mrf.mxu0 }
 0x457   :  { %v3329_v24 = vadd.f32 %v3328_v45, %v3204_v15 }
 0x458   :  { %v5387_v31 = vpop.f32.mrf.mxu1  ;;  %v3207_v62 = vpop.f32.mrf.mxu0 }
 0x459   :  { %v3340_v61 = vadd.f32 %v5387_v31, %v5369_v7 }
 0x45a   :  { %v3331_v50 = vpop.f32.mrf.mxu1  ;;  %v5372_v22 = vpop.f32.mrf.mxu0 }
 0x45b   :  { %v3332_v23 = vadd.f32 %v3331_v50, %v3207_v62 }
 0x45c   :  { %v5390_v27 = vpop.f32.mrf.mxu1  ;;  %v3220_v36 = vpop.f32.mrf.mxu0 }
 0x45d   :  { %v3353_v9 = vadd.f32 %v5390_v27, %v5372_v22 }
 0x45e   :  { %v3344_v35 = vpop.f32.mrf.mxu1  ;;  %v5373_v41 = vpop.f32.mrf.mxu0 }
 0x45f   :  { %v3345_v8 = vadd.f32 %v3344_v35, %v3220_v36 }
 0x460   :  { %v5391_v63 = vpop.f32.mrf.mxu1  ;;  %v3223_v21 = vpop.f32.mrf.mxu0 }
 0x461   :  { %v3356_v47 = vadd.f32 %v5391_v63, %v5373_v41 }
 0x462   :  { %v3347_v48 = vpop.f32.mrf.mxu1  ;;  %v5376_v39 = vpop.f32.mrf.mxu0 }
 0x463   :  { %v3348_v42 = vadd.f32 %v3347_v48, %v3223_v21 }
 0x464   :  { %v5394_v29 = vpop.f32.mrf.mxu1  ;;  %v3236_v13 = vpop.f32.mrf.mxu0 }
 0x465   :  { %v3369_v37 = vadd.f32 %v5394_v29, %v5376_v39 }
 0x466   :  { %v3360_v4 = vpop.f32.mrf.mxu1  ;;  %v5377_v16 = vpop.f32.mrf.mxu0 }
 0x467   :  { %v3361_v53 = vadd.f32 %v3360_v4, %v3236_v13 }
 0x468   :  { %v5395_v5 = vpop.f32.mrf.mxu1  ;;  %v3239_v49 = vpop.f32.mrf.mxu0 }
 0x469   :  { %v3372_v30 = vadd.f32 %v5395_v5, %v5377_v16 }
 0x46a   :  { %v3363_v25 = vpop.f32.mrf.mxu1  ;;  %v5380_v18 = vpop.f32.mrf.mxu0 }
 0x46b   :  { %v3364_v58 = vadd.f32 %v3363_v25, %v3239_v49 }
 0x46c   :  { %v5398_v28 = vpop.f32.mrf.mxu1  ;;  %v3252_v32 = vpop.f32.mrf.mxu0 }
 0x46d   :  { %v3385_v19 = vadd.f32 %v5398_v28, %v5380_v18 }
 0x46e   :  { %v3376_v43 = vpop.f32.mrf.mxu1  ;;  %v5381_v57 = vpop.f32.mrf.mxu0 }
 0x46f   :  { %v3377_v52 = vadd.f32 %v3376_v43, %v3252_v32 }
 0x470   :  { %v5399_v51 = vpop.f32.mrf.mxu1  ;;  %v3255_v40 = vpop.f32.mrf.mxu0 }
 0x471   :  { %v3388_v10 = vadd.f32 %v5399_v51, %v5381_v57 }
 0x472   :  { %v3379_v0 = vpop.f32.mrf.mxu1  ;;  %v5404_v26 = vpop.f32.mrf.mxu0 }
 0x473   :  { %v3380_v2 = vadd.f32 %v3379_v0, %v3255_v40  ;;  %v9174_v12 = vadd.f32 %v5404_v26, %v3337_v56 }
 0x474   :  { %v9176_v20 = vpop.f32.mrf.mxu1  ;;  %v3493_v60 = vpop.f32.mrf.mxu0 }
 0x475   :  { %v9178_v11 = vadd.f32 %v3493_v60, %v3329_v24 }
 0x476   :  { %v9180_v33 = vpop.f32.mrf.mxu1  ;;  %v5405_v54 = vpop.f32.mrf.mxu0 }
 0x477   :  { %v9182_v59 = vadd.f32 %v5405_v54, %v3340_v61 }
 0x478   :  { %v9184_v34 = vpop.f32.mrf.mxu1  ;;  %v3496_v46 = vpop.f32.mrf.mxu0 }
 0x479   :  { %v9186_v38 = vadd.f32 %v3496_v46, %v3332_v23 }
 0x47a   :  { %v9188_v1 = vpop.f32.mrf.mxu1  ;;  %v5408_v6 = vpop.f32.mrf.mxu0 }
 0x47b   :  { %v9190_v55 = vadd.f32 %v5408_v6, %v3353_v9 }
 0x47c   :  { %v3509_v17 = vpop.f32.mrf.mxu0 }
 0x47d   :  { %v9194_v3 = vadd.f32 %v3509_v17, %v3345_v8 }
 0x47e   :  { %v5409_v15 = vpop.f32.mrf.mxu0 }
 0x47f   :  { %v9192_v44 = vpop.f32.mrf.mxu1  ;;  %v9198_v56 = vadd.f32 %v5409_v15, %v3356_v47 }
 0x480   :  { %v3512_v7 = vpop.f32.mrf.mxu0 }
 0x481   :  { %v9196_v14 = vpop.f32.mrf.mxu1  ;;  %v9202_v24 = vadd.f32 %v3512_v7, %v3348_v42 }
 0x482   :  { %v5412_v62 = vpop.f32.mrf.mxu0 }
 0x483   :  { %v9200_v45 = vpop.f32.mrf.mxu1  ;;  %v9206_v61 = vadd.f32 %v5412_v62, %v3369_v37 }
 0x484   :  { %v3525_v22 = vpop.f32.mrf.mxu0 }
 0x485   :  { %v9204_v31 = vpop.f32.mrf.mxu1  ;;  %v9210_v23 = vadd.f32 %v3525_v22, %v3361_v53 }
 0x486   :  { %v5413_v36 = vpop.f32.mrf.mxu0 }
 0x487   :  { %v9208_v50 = vpop.f32.mrf.mxu1  ;;  %v9214_v9 = vadd.f32 %v5413_v36, %v3372_v30 }
 0x488   :  { %v3528_v41 = vpop.f32.mrf.mxu0 }
 0x489   :  { %v9212_v27 = vpop.f32.mrf.mxu1  ;;  %v9218_v8 = vadd.f32 %v3528_v41, %v3364_v58 }
 0x48a   :  { %v5416_v21 = vpop.f32.mrf.mxu0 }
 0x48b   :  { %v9216_v35 = vpop.f32.mrf.mxu1  ;;  %10666 = vst [vmem:[#allocation49_spill] sm:$0xff] %v9218_v8  ;;  %v9222_v47 = vadd.f32 %v5416_v21, %v3385_v19 }
 0x48c   :  { %v3541_v39 = vpop.f32.mrf.mxu0 }
 0x48d   :  { %v9220_v63 = vpop.f32.mrf.mxu1  ;;  %10668 = vst [vmem:[#allocation51_spill] sm:$0xff] %v9222_v47  ;;  %v9226_v42 = vadd.f32 %v3541_v39, %v3377_v52 }
 0x48e   :  { %10667 = vst [vmem:[#allocation50_spill] sm:$0xff] %v9220_v63  ;;  %v5417_v13 = vpop.f32.mrf.mxu0  ;;  %v3737_v63 = vadd.f32 %v9180_v33, %v9178_v11  ;;  %v3743_v11 = vadd.f32 %v9192_v44, %v9190_v55  ;;  %v9340_v55 = vld [vmem:[%s9433_s7] ss:$0 sm:$0xff]  ;;  %s5794_s7 = smov [#allocation14]  }
 0x48f   :  { %v9224_v48 = vpop.f32.mrf.mxu1  ;;  %10670 = vst [vmem:[#allocation61_spill] sm:$0xff] %v9226_v42  ;;  %v9230_v37 = vadd.f32 %v5417_v13, %v3388_v10  ;;  %s4702_s1 = sshll.u32 %s5794_s7, 4  ;;  %s4703_s1 = int_to_ptr.vmem [resolvable:$true] %s4702_s1 }
 0x490   :  { %10669 = vst [vmem:[#allocation60_spill] sm:$0xff] %v9224_v48  ;;  %v3544_v16 = vpop.f32.mrf.mxu0  ;;  %s5749_s19 = scalar_lea.vmem %s4703_s1, 2048  ;;  %p5754_p3 = scmp.lt.s32.totalorder %s4703_s1, %s4703_s1 }
 0x491   :  { %v9228_v29 = vpop.f32.mrf.mxu1  ;;  %10672 = vst [vmem:[#allocation68_spill] sm:$0xff] %v9230_v37  ;;  %v9234_v53 = vadd.f32 %v3544_v16, %v3380_v2  ;;  %p5750_p2 = scmp.ne.s32.totalorder %s4703_s1, %s5749_s19  ;;  %p5755_p4 = scmp.lt.s32.totalorder %s5749_s19, %s5749_s19 }
 0x492   :  { %10671 = vst [vmem:[#allocation67_spill] sm:$0xff] %v9228_v29  ;;  %v5440_v49 = vpop.f32.mrf.mxu0 }
 0x493   :  { %v9232_v4 = vpop.f32.mrf.mxu1  ;;  %10674 = vst [vmem:[#allocation74_spill] sm:$0xff] %v9234_v53  ;;  %p5756_p5 = por %p5755_p4, %p5754_p3 }
 0x494   :  { %10673 = vst [vmem:[#allocation73_spill] sm:$0xff] %v9232_v4  ;;  %v3839_v25 = vpop.f32.mrf.mxu0 }
 0x495   :  { %v9236_v5 = vpop.f32.mrf.mxu1  ;;  %p5757_p6 = pnand %p5756_p5, %p5750_p2 }
 0x496   :  { %10675 = vst [vmem:[#allocation79_spill] sm:$0xff] %v9236_v5  ;;  %v5441_v58 = vpop.f32.mrf.mxu0 }
 0x497   :  { %v5458_v30 = vpop.f32.mrf.mxu1 }
 0x498   :  { %v9240_v32 = vpop.f32.mrf.mxu0 }
 0x499   :  { %v4020_v18 = vpop.f32.mrf.mxu1 }
 0x49a   :  { %v9244_v43 = vpop.f32.mrf.mxu0 }
 0x49b   :  { %v9238_v28 = vpop.f32.mrf.mxu1 }
 0x49c   :  { %v9248_v52 = vpop.f32.mrf.mxu0 }
 0x49d   :  { %v9242_v19 = vpop.f32.mrf.mxu1 }
 0x49e   :  { %v9252_v40 = vpop.f32.mrf.mxu0 }
 0x49f   :  { %v9246_v57 = vpop.f32.mrf.mxu1 }
 0x4a0   :  { %v9256_v0 = vpop.f32.mrf.mxu0 }
 0x4a1   :  { %v9250_v51 = vpop.f32.mrf.mxu1 }
 0x4a2   :  { %v9260_v2 = vpop.f32.mrf.mxu0 }
 0x4a3   :  { %v9254_v10 = vpop.f32.mrf.mxu1 }
 0x4a4   :  { %v9264_v54 = vpop.f32.mrf.mxu0 }
 0x4a5   :  { %v9258_v26 = vpop.f32.mrf.mxu1  ;;  %10676 = vst [vmem:[#allocation53_spill] sm:$0xff] %v9264_v54 }
 0x4a6   :  { %v9268_v6 = vpop.f32.mrf.mxu0 }
 0x4a7   :  { %v9262_v60 = vpop.f32.mrf.mxu1  ;;  %10678 = vst [vmem:[#allocation64_spill] sm:$0xff] %v9268_v6  ;;  %v3739_v6 = vadd.f32 %v9176_v20, %v9174_v12  ;;  %v3738_v12 = vadd.f32 %v9188_v1, %v9186_v38  ;;  %v3908_v38 = vadd.f32 %v9244_v43, %v3743_v11 }
 0x4a8   :  { %v9272_v15 = vpop.f32.mrf.mxu0 }
 0x4a9   :  { %v9266_v46 = vpop.f32.mrf.mxu1  ;;  %10680 = vst [vmem:[#allocation72_spill] sm:$0xff] %v9272_v15  ;;  %v3904_v8 = vadd.f32 %v5440_v49, %v3739_v6 }
 0x4aa   :  { %10677 = vst [vmem:[#allocation63_spill] sm:$0xff] %v9266_v46  ;;  %v9276_v62 = vpop.f32.mrf.mxu0 }
 0x4ab   :  { %v9270_v17 = vpop.f32.mrf.mxu1  ;;  %10682 = vst [vmem:[#allocation85_spill] sm:$0xff] %v9276_v62 }
 0x4ac   :  { %10679 = vst [vmem:[#allocation70_spill] sm:$0xff] %v9270_v17  ;;  %v9280_v36 = vpop.f32.mrf.mxu0 }
 0x4ad   :  { %v9274_v7 = vpop.f32.mrf.mxu1  ;;  %10684 = vst [vmem:[#allocation90_spill] sm:$0xff] %v9280_v36 }
 0x4ae   :  { %10681 = vst [vmem:[#allocation83_spill] sm:$0xff] %v9274_v7  ;;  %v9284_v21 = vpop.f32.mrf.mxu0 }
 0x4af   :  { %v9278_v22 = vpop.f32.mrf.mxu1  ;;  %10686 = vst [vmem:[#allocation55_spill] sm:$0xff] %v9284_v21 }
 0x4b0   :  { %10683 = vst [vmem:[#allocation87_spill] sm:$0xff] %v9278_v22  ;;  %v9288_v13 = vpop.f32.mrf.mxu0 }
 0x4b1   :  { %v9282_v41 = vpop.f32.mrf.mxu1  ;;  %10688 = vst [vmem:[#allocation77_spill] sm:$0xff] %v9288_v13 }
 0x4b2   :  { %10685 = vst [vmem:[#allocation71_spill] sm:$0xff] %v9282_v41  ;;  %v5476_v5 = vpop.f32.mrf.mxu0 }
 0x4b3   :  { %v9286_v39 = vpop.f32.mrf.mxu1 }
 0x4b4   :  { %10687 = vst [vmem:[#allocation23_spill] sm:$0xff] %v9286_v39  ;;  %v4201_v4 = vpop.f32.mrf.mxu0 }
 0x4b5   :  { %v9290_v16 = vpop.f32.mrf.mxu1 }
 0x4b6   :  { %10689 = vst [vmem:[#allocation110_spill] sm:$0xff] %v9290_v16  ;;  %v5477_v7 = vpop.f32.mrf.mxu0 }
 0x4b7   :  { %v5494_v53 = vpop.f32.mrf.mxu1 }
 0x4b8   :  { %v4204_v29 = vpop.f32.mrf.mxu0 }
 0x4b9   :  { %v4382_v37 = vpop.f32.mrf.mxu1 }
 0x4ba   :  { %v5480_v22 = vpop.f32.mrf.mxu0 }
 0x4bb   :  { %v5495_v62 = vpop.f32.mrf.mxu1 }
 0x4bc   :  { %v9292_v36 = vpop.f32.mrf.mxu0 }
 0x4bd   :  { %v4385_v42 = vpop.f32.mrf.mxu1 }
 0x4be   :  { %v9294_v41 = vpop.f32.mrf.mxu0 }
 0x4bf   :  { %v5498_v21 = vpop.f32.mrf.mxu1 }
 0x4c0   :  { %v9296_v15 = vpop.f32.mrf.mxu0 }
 0x4c1   :  { %10690 = vst [vmem:[#allocation111_spill] sm:$0xff] %v9296_v15  ;;  %v9300_v13 = vpop.f32.mrf.mxu1 }
 0x4c2   :  { %v9298_v39 = vpop.f32.mrf.mxu0 }
 0x4c3   :  { %10691 = vst [vmem:[#allocation78_spill] sm:$0xff] %v9298_v39  ;;  %v9306_v48 = vpop.f32.mrf.mxu1 }
 0x4c4   :  { %v9302_v16 = vpop.f32.mrf.mxu0  ;;  %10694 = vst [vmem:[#allocation84_spill] sm:$0xff] %v9306_v48  ;;  %v3902_v48 = vadd.f32 %v3839_v25, %v3737_v63  ;;  %v3741_v63 = vadd.f32 %v9196_v14, %v9194_v3 }
 0x4c5   :  { %10692 = vst [vmem:[#allocation82_spill] sm:$0xff] %v9302_v16  ;;  %v9316_v39 = vpop.f32.mrf.mxu1  ;;  %v4085_v16 = vadd.f32 %v5458_v30, %v3904_v8 }
 0x4c6   :  { %v9304_v17 = vpop.f32.mrf.mxu0  ;;  %v4083_v20 = vadd.f32 %v4020_v18, %v3902_v48  ;;  %v3906_v3 = vadd.f32 %v9248_v52, %v3741_v63 }
 0x4c7   :  { %10693 = vst [vmem:[#allocation31_spill] sm:$0xff] %v9304_v17  ;;  %v3740_v17 = vadd.f32 %v9184_v34, %v9182_v59  ;;  %v9328_v33 = vpop.f32.mrf.mxu1  ;;  %v3903_v59 = vadd.f32 %v9240_v32, %v3738_v12 }
 0x4c8   :  { %v9308_v47 = vpop.f32.mrf.mxu0  ;;  %v4264_v8 = vadd.f32 %v4201_v4, %v4083_v20  ;;  %v4089_v4 = vadd.f32 %v9246_v57, %v3908_v38  ;;  %v4087_v32 = vadd.f32 %v9250_v51, %v3906_v3  ;;  %v10697_v20 = vld [vmem:[#allocation53_spill] sm:$0xff]  ;;  %v10702_v38 = vld [vmem:[#allocation63_spill] sm:$0xff]  ;;  %v10706_v3 = vld [vmem:[#allocation60_spill] sm:$0xff] }
 0x4c9   :  { %10695 = vst [vmem:[#allocation32_spill] sm:$0xff] %v9308_v47  ;;  %v4266_v47 = vadd.f32 %v5476_v5, %v4085_v16  ;;  %v4084_v44 = vadd.f32 %v9242_v19, %v3903_v59  ;;  %v9347_v14 = vpop.f32.mrf.mxu1  ;;  %v3748_v16 = vadd.f32 %v9216_v35, %v9214_v9  ;;  %v10703_v9 = vld [vmem:[#allocation64_spill] sm:$0xff] }
 0x4ca   :  { %v9312_v46 = vpop.f32.mrf.mxu0  ;;  %v4445_v48 = vadd.f32 %v4382_v37, %v4264_v8  ;;  %v3742_v37 = vadd.f32 %v9204_v31, %v9202_v24  ;;  %v4268_v51 = vadd.f32 %v9292_v36, %v4087_v32  ;;  %v10701_v8 = vld [vmem:[#allocation50_spill] sm:$0xff] }
 0x4cb   :  { %10696 = vst [vmem:[#allocation43_spill] sm:$0xff] %v9312_v46  ;;  %v3905_v46 = vadd.f32 %v5441_v58, %v3740_v17  ;;  %v4447_v34 = vadd.f32 %v5494_v53, %v4266_v47  ;;  %v3744_v47 = vadd.f32 %v9200_v45, %v9198_v56  ;;  %v4265_v18 = vadd.f32 %v4204_v29, %v4084_v44  ;;  %v5503_v24 = vpop.f32.mrf.mxu1 }
 0x4cc   :  { %v9318_v15 = vpop.f32.mrf.mxu0  ;;  %v4270_v56 = vadd.f32 %v5480_v22, %v4089_v4  ;;  %v3747_v29 = vadd.f32 %v9208_v50, %v9206_v61  ;;  %v3907_v17 = vadd.f32 %v9256_v0, %v3742_v37  ;;  %v4449_v0 = vadd.f32 %v9300_v13, %v4268_v51  ;;  %v10705_v4 = vld [vmem:[#allocation51_spill] sm:$0xff] }
 0x4cd   :  { %v4086_v6 = vadd.f32 %v9238_v28, %v3905_v46  ;;  %v3909_v19 = vadd.f32 %v9252_v40, %v3744_v47  ;;  %v4446_v43 = vadd.f32 %v4385_v42, %v4265_v18  ;;  %v4417_v11 = vpop.f32.mrf.mxu1  ;;  %v3913_v35 = vadd.f32 %v10703_v9, %v3748_v16  ;;  %v10718_v16 = vld [vmem:[#allocation90_spill] sm:$0xff] }
 0x4ce   :  { %v9322_v54 = vpop.f32.mrf.mxu0  ;;  %v4088_v22 = vadd.f32 %v9258_v26, %v3907_v17  ;;  %v3912_v61 = vadd.f32 %v9260_v2, %v3747_v29  ;;  %v10714_v51 = vld [vmem:[#allocation31_spill] sm:$0xff] }
 0x4cf   :  { %v4267_v5 = vadd.f32 %v5477_v7, %v4086_v6  ;;  %v4090_v46 = vadd.f32 %v9254_v10, %v3909_v19  ;;  %v4451_v7 = vadd.f32 %v5498_v21, %v4270_v56  ;;  %v10699_v6 = vld [vmem:[#allocation111_spill] sm:$0xff]  ;;  %v5506_v32 = vpop.f32.mrf.mxu1  ;;  %v10709_v56 = vld [vmem:[#allocation82_spill] sm:$0xff] }
 0x4d0   :  { %v9330_v49 = vpop.f32.mrf.mxu0  ;;  %v4093_v12 = vadd.f32 %v9262_v60, %v3912_v61  ;;  %v10704_v60 = vld [vmem:[#allocation78_spill] sm:$0xff] }
 0x4d1   :  { %v4448_v25 = vadd.f32 %v5495_v62, %v4267_v5  ;;  %v3745_v62 = vadd.f32 %v9212_v27, %v9210_v23  ;;  %v4271_v50 = vadd.f32 %v9294_v41, %v4090_v46  ;;  %v10698_v27 = vld [vmem:[#allocation84_spill] sm:$0xff]  ;;  %v4269_v41 = vadd.f32 %v10699_v6, %v4088_v22  ;;  %v10712_v46 = vld [vmem:[#allocation83_spill] sm:$0xff] }
 0x4d2   :  { %v5512_v1 = vpop.f32.mrf.mxu0  ;;  %v4274_v44 = vadd.f32 %v10704_v60, %v4093_v12  ;;  %v10724_v9 = vld [vmem:[#allocation43_spill] sm:$0xff] }
 0x4d3   :  { %v4628_v30 = vadd.f32 %v5512_v1, %v4447_v34  ;;  %v3910_v23 = vadd.f32 %v10697_v20, %v3745_v62  ;;  %v4452_v26 = vadd.f32 %v10698_v27, %v4271_v50  ;;  %v10700_v34 = vld [vmem:[#allocation49_spill] sm:$0xff]  ;;  %v4450_v5 = vadd.f32 %v9316_v39, %v4269_v41  ;;  %v10715_v50 = vld [vmem:[#allocation68_spill] sm:$0xff] }
 0x4d4   :  { %v4563_v53 = vpop.f32.mrf.mxu0  ;;  %v3746_v63 = vadd.f32 %v10701_v8, %v10700_v34  ;;  %v4455_v37 = vadd.f32 %v9328_v33, %v4274_v44  ;;  %v10722_v8 = vld [vmem:[#allocation71_spill] sm:$0xff] }
 0x4d5   :  { %v4651_v58 = vadd.f32 %v9340_v55, %v4628_v30  ;;  %v4626_v28 = vadd.f32 %v4563_v53, %v4445_v48  ;;  %v4091_v1 = vadd.f32 %v10702_v38, %v3910_v23  ;;  %v3751_v53 = vadd.f32 %v10706_v3, %v10705_v4  ;;  %v4430_v23 = vpop.f32.mrf.mxu1  ;;  %v10723_v38 = vld [vmem:[#allocation55_spill] sm:$0xff]  ;;  %v10726_v4 = vld [vmem:[#allocation77_spill] sm:$0xff] }
 0x4d6   :  { %v5513_v45 = vpop.f32.mrf.mxu0 }
 0x4d7   :  { %5594 = vtanh.f32 %v4651_v58  ;;  %v4649_v57 = vadd.f32 %v9340_v55, %v4626_v28  ;;  %v4629_v52 = vadd.f32 %v5513_v45, %v4448_v25  ;;  %v10707_v25 = vld [vmem:[#allocation70_spill] sm:$0xff]  ;;  %v10708_v58 = vld [vmem:[#allocation72_spill] sm:$0xff]  ;;  %v4272_v45 = vadd.f32 %v10709_v56, %v4091_v1 }
 0x4d8   :  { %v4566_v31 = vpop.f32.mrf.mxu0  ;;  %v4094_v18 = vadd.f32 %v10707_v25, %v3913_v35  ;;  %v3911_v28 = vadd.f32 %v10708_v58, %v3746_v63  ;;  %v5507_v25 = vpop.f32.mrf.mxu1 }
 0x4d9   :  { %5596 = vtanh.f32 %v4649_v57  ;;  %v4652_v40 = vadd.f32 %v9340_v55, %v4629_v52  ;;  %v4627_v42 = vadd.f32 %v4566_v31, %v4446_v43  ;;  %v10710_v57 = vld [vmem:[#allocation61_spill] sm:$0xff]  ;;  %v10711_v52 = vld [vmem:[#allocation67_spill] sm:$0xff]  ;;  %v4453_v33 = vadd.f32 %v9347_v14, %v4272_v45 }
 0x4da   :  { %v5516_v10 = vpop.f32.mrf.mxu0  ;;  %v3749_v29 = vadd.f32 %v10711_v52, %v10710_v57  ;;  %v4092_v17 = vadd.f32 %v10712_v46, %v3911_v28 }
 0x4db   :  { %5598 = vtanh.f32 %v4652_v40  ;;  %v4650_v21 = vadd.f32 %v9340_v55, %v4627_v42  ;;  %v4632_v36 = vadd.f32 %v5516_v10, %v4451_v7  ;;  %v10713_v7 = vld [vmem:[#allocation85_spill] sm:$0xff]  ;;  %v4275_v40 = vadd.f32 %v10714_v51, %v4094_v18 }
 0x4dc   :  { %v4579_v2 = vpop.f32.mrf.mxu0  ;;  %v3916_v31 = vadd.f32 %v10713_v7, %v3751_v53  ;;  %v10716_v10 = vld [vmem:[#allocation73_spill] sm:$0xff]  ;;  %v3914_v12 = vadd.f32 %v10718_v16, %v3749_v29 }
 0x4dd   :  { %5600 = vtanh.f32 %v4650_v21  ;;  %v4655_v13 = vadd.f32 %v9340_v55, %v4632_v36  ;;  %v4630_v59 = vadd.f32 %v4579_v2, %v4449_v0  ;;  %v3752_v0 = vadd.f32 %v10716_v10, %v10715_v50  ;;  %v10717_v21 = vld [vmem:[#allocation87_spill] sm:$0xff] }
 0x4de   :  { %v5517_v48 = vpop.f32.mrf.mxu0  ;;  %v4097_v36 = vadd.f32 %v10717_v21, %v3916_v31  ;;  %v4456_v20 = vadd.f32 %v5503_v24, %v4275_v40  ;;  %v4095_v63 = vadd.f32 %v10722_v8, %v3914_v12 }
 0x4df   :  { %5602 = vtanh.f32 %v4655_v13  ;;  %v4653_v30 = vadd.f32 %v9340_v55, %v4630_v59  ;;  %v4633_v47 = vadd.f32 %v5517_v48, %v4452_v26  ;;  %v10719_v26 = vld [vmem:[#allocation32_spill] sm:$0xff]  ;;  %v10720_v13 = vld [vmem:[#allocation74_spill] sm:$0xff]  ;;  %v10721_v59 = vld [vmem:[#allocation79_spill] sm:$0xff]  ;;  %v3917_v1 = vadd.f32 %v10723_v38, %v3752_v0 }
 0x4e0   :  { %v4582_v19 = vpop.f32.mrf.mxu0  ;;  %v4273_v2 = vadd.f32 %v10719_v26, %v4092_v17  ;;  %v3750_v34 = vadd.f32 %v10721_v59, %v10720_v13  ;;  %v4278_v35 = vadd.f32 %v10724_v9, %v4097_v36  ;;  %v4276_v58 = vadd.f32 %v9318_v15, %v4095_v63  ;;  %v4433_v15 = vpop.f32.mrf.mxu1 }
 0x4e1   :  { %5604 = vtanh.f32 %v4653_v30  ;;  %v4656_v39 = vadd.f32 %v9340_v55, %v4633_v47  ;;  %v4631_v43 = vadd.f32 %v4582_v19, %v4450_v5  ;;  %v10725_v30 = vld [vmem:[#allocation23_spill] sm:$0xff]  ;;  %v10727_v19 = vld [vmem:[#allocation110_spill] sm:$0xff] }
 0x4e2   :  { %v5520_v42 = vpop.f32.mrf.mxu0  ;;  %v4454_v60 = vadd.f32 %v4417_v11, %v4273_v2  ;;  %v4098_v47 = vadd.f32 %v10725_v30, %v3917_v1  ;;  %v3915_v3 = vadd.f32 %v10726_v4, %v3750_v34  ;;  %v4459_v53 = vadd.f32 %v5506_v32, %v4278_v35 }
 0x4e3   :  { %5606 = vtanh.f32 %v4656_v39  ;;  %v4654_v62 = vadd.f32 %v9340_v55, %v4631_v43  ;;  %v4636_v22 = vadd.f32 %v5520_v42, %v4455_v37  ;;  %v4457_v43 = vadd.f32 %v4430_v23, %v4276_v58 }
 0x4e4   :  { %v5595_v61 = vpop.eup %5594  ;;  %v4595_v27 = vpop.f32.mrf.mxu0  ;;  %v4096_v56 = vadd.f32 %v10727_v19, %v3915_v3  ;;  %v4279_v45 = vadd.f32 %v9322_v54, %v4098_v47 }
 0x4e5   :  { %4683 = vst [vmem:[#allocation14 + $0x10] sm:$0xff] %v5595_v61  ;;  %5608 = vtanh.f32 %v4654_v62  ;;  %v4659_v14 = vadd.f32 %v9340_v55, %v4636_v22  ;;  %v4634_v6 = vadd.f32 %v4595_v27, %v4453_v33 }
 0x4e6   :  { %v5597_v41 = vpop.eup %5596  ;;  %v5521_v24 = vpop.f32.mrf.mxu0  ;;  %v4460_v29 = vadd.f32 %v5507_v25, %v4279_v45  ;;  %v4277_v17 = vadd.f32 %v9330_v49, %v4096_v56 }
 0x4e7   :  { %4681 = vst [vmem:[#allocation14] sm:$0xff] %v5597_v41  ;;  %5610 = vtanh.f32 %v4659_v14  ;;  %v4657_v44 = vadd.f32 %v9340_v55, %v4634_v6  ;;  %v4637_v48 = vadd.f32 %v5521_v24, %v4456_v20 }
 0x4e8   :  { %v5599_v5 = vpop.eup %5598  ;;  %v4598_v18 = vpop.f32.mrf.mxu0  ;;  %v4458_v40 = vadd.f32 %v4433_v15, %v4277_v17 }
 0x4e9   :  { %4684 = vst [vmem:[#allocation14 + $0x18] sm:$0xff] %v5599_v5  ;;  %5612 = vtanh.f32 %v4657_v44  ;;  %v4660_v28 = vadd.f32 %v9340_v55, %v4637_v48  ;;  %v4635_v11 = vadd.f32 %v4598_v18, %v4454_v60 }
 0x4ea   :  { %v5601_v37 = vpop.eup %5600  ;;  %v5524_v39 = vpop.f32.mrf.mxu0 }
 0x4eb   :  { %4682 = vst [vmem:[#allocation14 + $0x8] sm:$0xff] %v5601_v37  ;;  %5614 = vtanh.f32 %v4660_v28  ;;  %v4658_v32 = vadd.f32 %v9340_v55, %v4635_v11  ;;  %v4640_v57 = vadd.f32 %v5524_v39, %v4459_v53 }
 0x4ec   :  { %v5603_v52 = vpop.eup %5602  ;;  %v4611_v46 = vpop.f32.mrf.mxu0 }
 0x4ed   :  { %4687 = vst [vmem:[#allocation14 + $0x30] sm:$0xff] %v5603_v52  ;;  %5616 = vtanh.f32 %v4658_v32  ;;  %v4663_v7 = vadd.f32 %v9340_v55, %v4640_v57  ;;  %v4638_v31 = vadd.f32 %v4611_v46, %v4457_v43 }
 0x4ee   :  { %v5605_v51 = vpop.eup %5604  ;;  %v5525_v54 = vpop.f32.mrf.mxu0 }
 0x4ef   :  { %4685 = vst [vmem:[#allocation14 + $0x20] sm:$0xff] %v5605_v51  ;;  %5618 = vtanh.f32 %v4663_v7  ;;  %v4661_v42 = vadd.f32 %v9340_v55, %v4638_v31  ;;  %v4641_v33 = vadd.f32 %v5525_v54, %v4460_v29 }
 0x4f0   :  { %v5607_v62 = vpop.eup %5606  ;;  %v4614_v22 = vpop.f32.mrf.mxu0 }
 0x4f1   :  { %4688 = vst [vmem:[#allocation14 + $0x38] sm:$0xff] %v5607_v62  ;;  %5620 = vtanh.f32 %v4661_v42  ;;  %v4664_v61 = vadd.f32 %v9340_v55, %v4641_v33  ;;  %v4639_v49 = vadd.f32 %v4614_v22, %v4458_v40 }
 0x4f2   :  { %v5609_v50 = vpop.eup %5608 }
 0x4f3   :  { %4686 = vst [vmem:[#allocation14 + $0x28] sm:$0xff] %v5609_v50  ;;  %5622 = vtanh.f32 %v4664_v61  ;;  %v4662_v10 = vadd.f32 %v9340_v55, %v4639_v49 }
 0x4f4   :  { %v5611_v0 = vpop.eup %5610 }
 0x4f5   :  { %4691 = vst [vmem:[#allocation14 + $0x50] sm:$0xff] %v5611_v0  ;;  %5624 = vtanh.f32 %v4662_v10 }
 0x4f6   :  { %v5613_v21 = vpop.eup %5612 }
 0x4f7   :  { %4689 = vst [vmem:[#allocation14 + $0x40] sm:$0xff] %v5613_v21 }
 0x4f8   :  { %v5615_v36 = vpop.eup %5614 }
 0x4f9   :  { %4692 = vst [vmem:[#allocation14 + $0x58] sm:$0xff] %v5615_v36 }
 0x4fa   :  { %v5617_v16 = vpop.eup %5616 }
 0x4fb   :  { %4690 = vst [vmem:[#allocation14 + $0x48] sm:$0xff] %v5617_v16 }
 0x4fc   :  { %v5619_v12 = vpop.eup %5618 }
 0x4fd   :  { %4695 = vst [vmem:[#allocation14 + $0x70] sm:$0xff] %v5619_v12 }
 0x4fe   :  { %v5621_v20 = vpop.eup %5620 }
 0x4ff   :  { %4693 = vst [vmem:[#allocation14 + $0x60] sm:$0xff] %v5621_v20 }
 0x500   :  { %v5623_v23 = vpop.eup %5622 }
 0x501   :  { %4696 = vst [vmem:[#allocation14 + $0x78] sm:$0xff] %v5623_v23 }
 0x502   :  { %v5625_v27 = vpop.eup %5624 }
 0x503   :  { %4694 = vst [vmem:[#allocation14 + $0x68] sm:$0xff] %v5625_v27 }
 0x504   :  { %5760 = shalt.err (!%p5757_p6)
}
 0x505   :  { %4708 = dma.vmem_to_hbm [thread:$0]  %s4703_s1, 2048, %s9434_s8, [#allocation5], %s5783_s15, %s5783_s15, %s5784_s16  }
 0x506   :  { %5777 = dma.done.wait [#allocation5], 2048  }
 0x507   :  { %5778 = vsyncadd [#allocation5], 4294965248 }
 0x508   :  { %4712 = vsyncpa [#allocation4], 1 }
 0x509   :  { %4713 = vsyncpa [#allocation7], 1 }
 0x50a   :  { %4714 = vsyncpa [#allocation10], 1 }
 0x50b   :  { %4715 = vsyncpa [#allocation13], 1 }
 0x50c   :  { %4716 = vsyncpa [#allocation5], 1 }

</bundles_post_ra>
